<compile_context>
chip_gen: v7x
topology: tpu7x:2x2x1
jax: 0.10.0
libtpu: 0.0.40
codegen_flags: <defaults>
</compile_context>

<pallas_src>
import functools

import numpy as np
import jax
import jax.numpy as jnp
from jax import lax
from jax.experimental import pallas as pl
from jax.experimental.pallas import tpu as pltpu

_EPS = 1e-5
_PREC_REF = lax.Precision.HIGHEST          # reference only


# ---------------------------------------------------------------------------
# Fused Pallas kernel: conv1+bn1+relu -> conv2(3x3,s)+bn2+relu
#                      -> conv3+bn3 (+) downsample+bn -> relu
# ---------------------------------------------------------------------------
def _bottleneck_kernel(x_ref, w1_ref, b1_ref, w2_ref, b2_ref,
                       w3_ref, b3_ref, wd_ref, bd_ref,
                       o_ref, a1_ref, *, TH, Wo, stride):
    """One (batch, output-row-tile) step of the whole Bottleneck block.

    x_ref : (H, W, Cin)        unpadded input image (one batch element), bf16
    w1_ref: (Cin, planes)      bf16, bn1 scale folded in
    w2_ref: (9, planes, planes) bf16, bn2 scale folded in (tap-major)
    w3_ref: (planes, cout)     bf16, bn3 scale folded in
    wd_ref: (Cin, cout)        bf16, bn_d scale folded in
    b*_ref: (1, C) f32         folded BN biases
    o_ref : (TH*Wo, cout)      final bf16 output tile (flat, lane-dense)
    a1_ref: (TH_in, W+2, planes) VMEM scratch: halo'd conv1 activation
    """
    H, W, Cin = x_ref.shape
    planes = w1_ref.shape[1]
    TH_in, Wp, _ = a1_ref.shape
    M = TH * Wo

    hb = pl.program_id(1)
    r0 = hb * (TH * stride)                 # first input row feeding this tile
    if (TH * stride) % 8 == 0:
        r0 = pl.multiple_of(r0, 8)

    # ---- conv1 (1x1) + bn1 (scale folded into w1) + relu --------------------
    def conv1_rows(xrows):
        # (m, W, Cin) -> (m, W+2, planes) bf16 with the 1-px column pad zeroed.
        m = xrows.shape[0]
        a = jnp.dot(xrows.reshape(m * W, Cin), w1_ref[...],
                    preferred_element_type=jnp.float32)
        a = jnp.maximum(a + b1_ref[...], 0.0).astype(a1_ref.dtype)
        zc = jnp.zeros((m, 1, planes), a1_ref.dtype)
        return jnp.concatenate([zc, a.reshape(m, W, planes), zc], axis=1)

    # Middle halo rows are always inside the image (proved by r0 <= (Ho-TH)*s).
    a1_ref[1:TH_in - 1] = conv1_rows(x_ref[pl.ds(r0, TH_in - 2), :, :])

    zero_row = jnp.zeros((1, Wp, planes), a1_ref.dtype)

    top_in = r0 > 0                         # top halo row: image row r0-1 or 0-pad
    @pl.when(top_in)
    def _():
        a1_ref[0:1] = conv1_rows(x_ref[pl.ds(r0 - 1, 1), :, :])

    @pl.when(jnp.logical_not(top_in))
    def _():
        a1_ref[0:1] = zero_row

    bot = r0 + TH_in - 2                    # bottom halo row index in the image
    bot_in = bot < H
    @pl.when(bot_in)
    def _():
        a1_ref[TH_in - 1:TH_in] = conv1_rows(x_ref[pl.ds(bot, 1), :, :])

    @pl.when(jnp.logical_not(bot_in))
    def _():
        a1_ref[TH_in - 1:TH_in] = zero_row

    # ---- conv2 (3x3, stride) + bn2 + relu: 9 accumulating channel matmuls ---
    acc = jnp.zeros((M, planes), jnp.float32)
    for dh in range(3):
        for dw in range(3):
            if stride == 1:
                tap = a1_ref[dh:dh + TH, dw:dw + Wo, :]
            else:
                tap = a1_ref[pl.ds(dh, TH, stride=stride),
                             pl.ds(dw, Wo, stride=stride), :]
            acc = acc + jnp.dot(tap.reshape(M, planes), w2_ref[dh * 3 + dw],
                                preferred_element_type=jnp.float32)
    y2 = jnp.maximum(acc + b2_ref[...], 0.0).astype(jnp.bfloat16)

    # ---- conv3 (1x1) + bn3, downsample (1x1, stride) + bn, add, relu --------
    main = jnp.dot(y2, w3_ref[...],
                   preferred_element_type=jnp.float32) + b3_ref[...]
    if stride == 1:
        xr = x_ref[pl.ds(r0, TH), :, :]
    else:
        xr = x_ref[pl.ds(r0, TH, stride=stride),
                   pl.ds(0, Wo, stride=stride), :]
    res = jnp.dot(xr.reshape(M, Cin), wd_ref[...],
                  preferred_element_type=jnp.float32) + bd_ref[...]
    o_ref[...] = jnp.maximum(main + res, 0.0).astype(o_ref.dtype)


# ---------------------------------------------------------------------------
# pallas_call wrapper
# ---------------------------------------------------------------------------
def _vmem_limit_bytes():
    try:
        cap = int(pltpu.get_tpu_info().vmem_capacity_bytes)
    except Exception:
        cap = 64 * 1024 * 1024
    return max(32 * 1024 * 1024, min(cap * 3 // 4, 96 * 1024 * 1024))


def _target_pixels(vmem_bytes):
    # Bigger output-row tiles on 128-MiB-VMEM chips (v5e/v6e), conservative on v7x.
    return 4096 if vmem_bytes >= (64 << 20) else 2048


def _pick_th(Ho, Wo, n_batch, target_pixels):
    """Output-row tile: divides Ho, keeps (TH*Wo) sublane-aligned, caps size.

    Falls back to TH=Ho (single tile); that is still legal because the output
    block dim then equals the full array dim (N, Ho*Wo, cout) layout."""
    aligned = [th for th in range(1, Ho + 1)
               if Ho % th == 0 and (th * Wo) % 8 == 0]
    if not aligned:
        return Ho
    if n_batch == 1:
        # keep >=2 row tiles so both v7x TensorCores get work
        proper = [th for th in aligned if th < Ho]
        if proper:
            aligned = proper
    small = [th for th in aligned if th * Wo <= target_pixels]
    return max(small) if small else min(aligned)


def _fused_bottleneck(x, w1, b1, w2, b2, w3, b3, wd, bd, *, Ho, Wo, stride):
    N, H, W, Cin = x.shape
    planes = w1.shape[1]
    cout = w3.shape[1]

    vmem_limit = _vmem_limit_bytes()
    TH = _pick_th(Ho, Wo, N, _target_pixels(vmem_limit))
    nHB = Ho // TH
    TH_in = stride * (TH - 1) + 3

    kernel = functools.partial(_bottleneck_kernel, TH=TH, Wo=Wo, stride=stride)

    return pl.pallas_call(
        kernel,
        out_shape=jax.ShapeDtypeStruct((N, Ho * Wo, cout), jnp.bfloat16),
        grid_spec=pltpu.PrefetchScalarGridSpec(
            num_scalar_prefetch=0,
            grid=(N, nHB),
            in_specs=[
                # whole (unpadded) image per n; constant over hb -> fetched once per n
                pl.BlockSpec((None, H, W, Cin), lambda n, hb: (n, 0, 0, 0)),
                pl.BlockSpec((Cin, planes), lambda n, hb: (0, 0)),
                pl.BlockSpec((1, planes), lambda n, hb: (0, 0)),
                pl.BlockSpec((9, planes, planes), lambda n, hb: (0, 0, 0)),
                pl.BlockSpec((1, planes), lambda n, hb: (0, 0)),
                pl.BlockSpec((planes, cout), lambda n, hb: (0, 0)),
                pl.BlockSpec((1, cout), lambda n, hb: (0, 0)),
                pl.BlockSpec((Cin, cout), lambda n, hb: (0, 0)),
                pl.BlockSpec((1, cout), lambda n, hb: (0, 0)),
            ],
            out_specs=pl.BlockSpec((None, TH * Wo, cout),
                                   lambda n, hb: (n, hb, 0)),
            scratch_shapes=[pltpu.VMEM((TH_in, W + 2, planes), jnp.bfloat16)],
        ),
        compiler_params=pltpu.CompilerParams(
            dimension_semantics=("parallel", "parallel"),
            vmem_limit_bytes=vmem_limit),
    )(x, w1, b1, w2, b2, w3, b3, wd, bd)


# ---------------------------------------------------------------------------
# Bottleneck forward (NCHW in, NCHW f32 out)
# ---------------------------------------------------------------------------
def _fold_bn(gamma, beta, mean, var):
    s = gamma / jnp.sqrt(var + _EPS)
    b = beta - mean * s
    return (s.reshape(1, -1).astype(jnp.float32),
            b.reshape(1, -1).astype(jnp.float32))


def bottleneck_forward(x_nchw, p, stride=1):
    N, Cin, H, W = x_nchw.shape
    planes = p["w1"].shape[1]
    cout = p["w3"].shape[1]
    Ho = (H - 1) // stride + 1
    Wo = (W - 1) // stride + 1

    # NHWC, bf16 activations so channels sit on the TPU lane axis.
    x = jnp.transpose(x_nchw, (0, 2, 3, 1)).astype(jnp.bfloat16)

    s1, b1 = _fold_bn(*p["bn1"])
    s2, b2 = _fold_bn(*p["bn2"])
    s3, b3 = _fold_bn(*p["bn3"])
    sd, bd = _fold_bn(*p["bnd"])

    # Fold the BN scale into the bf16 weights once, at wrapper/trace time.
    w1 = (p["w1"] * s1).astype(jnp.bfloat16)
    w2 = (p["w2"] * s2.reshape(1, 1, 1, -1)).astype(jnp.bfloat16)
    w2 = w2.reshape(9, planes, planes)                       # tap-major (dh*3+dw)
    w3 = (p["w3"] * s3).astype(jnp.bfloat16)
    wd = (p["wd"] * sd).astype(jnp.bfloat16)

    out = _fused_bottleneck(x, w1, b1, w2, b2, w3, b3, wd, bd,
                            Ho=Ho, Wo=Wo, stride=stride)
    out = out.reshape(N, Ho, Wo, cout).astype(jnp.float32)
    return jnp.transpose(out, (0, 3, 1, 2))                  # NCHW, float32


# ---------------------------------------------------------------------------
# Pure-JAX reference (mirrors the PyTorch forward in eval mode, full f32)
# ---------------------------------------------------------------------------
def bottleneck_reference(x_nchw, p, stride=1):
    def bn(y, params):
        g, be, m, v = params
        sh = (1, -1, 1, 1)
        return ((y - m.reshape(sh)) / jnp.sqrt(v.reshape(sh) + _EPS)
                * g.reshape(sh) + be.reshape(sh))

    def conv(y, w_oihw, s):
        return lax.conv_general_dilated(
            y, w_oihw, window_strides=(s, s),
            padding=[(w_oihw.shape[2] // 2,) * 2, (w_oihw.shape[3] // 2,) * 2],
            dimension_numbers=("NCHW", "OIHW", "NCHW"), precision=_PREC_REF)

    w1 = jnp.transpose(p["w1"])[:, :, None, None]
    w2 = jnp.transpose(p["w2"], (3, 2, 0, 1))
    w3 = jnp.transpose(p["w3"])[:, :, None, None]
    wd = jnp.transpose(p["wd"])[:, :, None, None]

    out = jax.nn.relu(bn(conv(x_nchw, w1, 1), p["bn1"]))
    out = jax.nn.relu(bn(conv(out, w2, stride), p["bn2"]))
    out = bn(conv(out, w3, 1), p["bn3"])
    residual = bn(conv(x_nchw, wd, stride), p["bnd"])
    return jax.nn.relu(out + residual)


# ---------------------------------------------------------------------------
# Deterministic parameter init
# ---------------------------------------------------------------------------
def make_params(key, inplanes, planes):
    cout = planes * 2
    ks = jax.random.split(key, 8)

    def bn_params(k, c):
        k1, k2, k3, k4 = jax.random.split(k, 4)
        gamma = jax.random.uniform(k1, (c,), jnp.float32, 0.5, 1.5)
        beta = jax.random.normal(k2, (c,), jnp.float32) * 0.1
        mean = jax.random.normal(k3, (c,), jnp.float32) * 0.1
        var = jax.random.uniform(k4, (c,), jnp.float32, 0.5, 1.5)
        return (gamma, beta, mean, var)

    return {
        "w1": jax.random.normal(ks[0], (inplanes, planes), jnp.float32) * 0.2,
        "bn1": bn_params(ks[1], planes),
        "w2": jax.random.normal(ks[2], (3, 3, planes, planes), jnp.float32) * 0.2,
        "bn2": bn_params(ks[3], planes),
        "w3": jax.random.normal(ks[4], (planes, cout), jnp.float32) * 0.2,
        "bn3": bn_params(ks[5], cout),
        "wd": jax.random.normal(ks[6], (inplanes, cout), jnp.float32) * 0.2,
        "bnd": bn_params(ks[7], cout),
    }


if __name__ == "__main__":
    key = jax.random.PRNGKey(0)
    kx, kp = jax.random.split(key)

    N, inplanes, H, W = 2, 4, 16, 16
    planes, stride = 4, 1

    x = jax.random.normal(kx, (N, inplanes, H, W), jnp.float32)
    params = make_params(kp, inplanes, planes)

    out = jax.block_until_ready(bottleneck_forward(x, params, stride=stride))
    ref = jax.block_until_ready(bottleneck_reference(x, params, stride=stride))

    assert out.shape == (N, planes * 2, H // stride, W // stride), out.shape
    # Kernel runs bf16 operands (BN scale folded into the weights) with f32
    # accumulation and a bf16 writeback; compare against the full-f32
    # reference with bf16-level tolerance.
    assert np.allclose(np.asarray(out), np.asarray(ref), rtol=5e-2, atol=5e-2), (
        float(np.max(np.abs(np.asarray(out) - np.asarray(ref)))))
    print("KERNEL_OK")
</pallas_src>

<mosaic_0001>
module attributes {stable_mosaic.version = 11 : i64} {
  func.func @_bottleneck_kernel(%arg0: i32, %arg1: i32, %arg2: memref<1x16x16x4xbf16, #tpu.memory_space<vmem>>, %arg3: memref<4x4xbf16, #tpu.memory_space<vmem>>, %arg4: memref<1x4xf32, #tpu.memory_space<vmem>>, %arg5: memref<9x4x4xbf16, #tpu.memory_space<vmem>>, %arg6: memref<1x4xf32, #tpu.memory_space<vmem>>, %arg7: memref<4x8xbf16, #tpu.memory_space<vmem>>, %arg8: memref<1x8xf32, #tpu.memory_space<vmem>>, %arg9: memref<4x8xbf16, #tpu.memory_space<vmem>>, %arg10: memref<1x8xf32, #tpu.memory_space<vmem>>, %arg11: memref<1x256x8xbf16, #tpu.memory_space<vmem>>, %arg12: memref<18x18x4xbf16, #tpu.memory_space<vmem>>) attributes {dimension_semantics = [#tpu.dimension_semantics<parallel>, #tpu.dimension_semantics<parallel>], iteration_bounds = array<i64: 2, 1>, scalar_prefetch = 0 : i64, scratch_operands = 1 : i64, tpu.core_type = #tpu.core_type<tc>, window_params = [{transform_indices = @transform_0, window_bounds = array<i64: 1, 16, 16, 4>}, {pipeline_mode = #tpu.pipeline_mode<synchronous>, transform_indices = @transform_1, window_bounds = array<i64: 4, 4>}, {pipeline_mode = #tpu.pipeline_mode<synchronous>, transform_indices = @transform_2, window_bounds = array<i64: 1, 4>}, {pipeline_mode = #tpu.pipeline_mode<synchronous>, transform_indices = @transform_3, window_bounds = array<i64: 9, 4, 4>}, {pipeline_mode = #tpu.pipeline_mode<synchronous>, transform_indices = @transform_4, window_bounds = array<i64: 1, 4>}, {pipeline_mode = #tpu.pipeline_mode<synchronous>, transform_indices = @transform_5, window_bounds = array<i64: 4, 8>}, {pipeline_mode = #tpu.pipeline_mode<synchronous>, transform_indices = @transform_6, window_bounds = array<i64: 1, 8>}, {pipeline_mode = #tpu.pipeline_mode<synchronous>, transform_indices = @transform_7, window_bounds = array<i64: 4, 8>}, {pipeline_mode = #tpu.pipeline_mode<synchronous>, transform_indices = @transform_8, window_bounds = array<i64: 1, 8>}, {transform_indices = @transform_9, window_bounds = array<i64: 1, 256, 8>}]} {
    %c16_i32 = arith.constant 16 : i32
    %0 = arith.muli %arg1, %c16_i32 : i32
    %1 = tpu.assume_multiple %0, 8 : i32
    %c0 = arith.constant 0 : index
    %2 = arith.index_cast %1 : i32 to index
    %c0_0 = arith.constant 0 : index
    %c0_1 = arith.constant 0 : index
    %3 = vector.load %arg2[%c0, %2, %c0_0, %c0_1] : memref<1x16x16x4xbf16, #tpu.memory_space<vmem>>, vector<1x16x16x4xbf16>
    %4 = vector.shape_cast %3 : vector<1x16x16x4xbf16> to vector<16x16x4xbf16>
    %5 = vector.shape_cast %4 : vector<16x16x4xbf16> to vector<256x4xbf16>
    %c0_2 = arith.constant 0 : index
    %c0_3 = arith.constant 0 : index
    %6 = vector.load %arg3[%c0_2, %c0_3] : memref<4x4xbf16, #tpu.memory_space<vmem>>, vector<4x4xbf16>
    %cst = arith.constant dense<0.000000e+00> : vector<256x4xf32>
    %7 = tpu.matmul %5, %6, %cst {dimension_numbers = #tpu.dot_dimension_numbers<[1], [0], [0], [1], [0, 0, 1, 1], [], []>} : vector<256x4xbf16>, vector<4x4xbf16>, vector<256x4xf32> -> vector<256x4xf32>
    %c0_4 = arith.constant 0 : index
    %c0_5 = arith.constant 0 : index
    %8 = vector.load %arg4[%c0_4, %c0_5] : memref<1x4xf32, #tpu.memory_space<vmem>>, vector<1x4xf32>
    %9 = vector.broadcast %8 : vector<1x4xf32> to vector<256x4xf32>
    %10 = arith.addf %7, %9 : vector<256x4xf32>
    %cst_6 = arith.constant 0.000000e+00 : f32
    %11 = vector.broadcast %cst_6 : f32 to vector<256x4xf32>
    %12 = arith.maximumf %10, %11 : vector<256x4xf32>
    %13 = arith.truncf %12 : vector<256x4xf32> to vector<256x4xbf16>
    %cst_7 = arith.constant 0.000000e+00 : bf16
    %14 = vector.broadcast %cst_7 : bf16 to vector<16x1x4xbf16>
    %15 = vector.shape_cast %13 : vector<256x4xbf16> to vector<16x16x4xbf16>
    %16 = tpu.concatenate %14, %15, %14 in 1 : vector<16x1x4xbf16>, vector<16x16x4xbf16>, vector<16x1x4xbf16> -> vector<16x18x4xbf16>
    %c1 = arith.constant 1 : index
    %c0_8 = arith.constant 0 : index
    %c0_9 = arith.constant 0 : index
    %17 = vector.load %arg12[%c1, %c0_8, %c0_9] : memref<18x18x4xbf16, #tpu.memory_space<vmem>>, vector<16x18x4xbf16>
    tpu.vector_store %arg12[%c1, %c0_8, %c0_9], %16 {strides = array<i32>} : memref<18x18x4xbf16, #tpu.memory_space<vmem>>, vector<16x18x4xbf16>,
    %cst_10 = arith.constant 0.000000e+00 : bf16
    %18 = vector.broadcast %cst_10 : bf16 to vector<1x18x4xbf16>
    %c0_i32 = arith.constant 0 : i32
    %19 = arith.cmpi sgt, %1, %c0_i32 : i32
    %20 = arith.extui %19 : i1 to i32
    %c0_i32_11 = arith.constant 0 : i32
    %21 = arith.cmpi ne, %20, %c0_i32_11 : i32
    scf.if %21 {
      %c1_i32 = arith.constant 1 : i32
      %115 = arith.subi %1, %c1_i32 : i32
      %c0_94 = arith.constant 0 : index
      %116 = arith.index_cast %115 : i32 to index
      %c0_95 = arith.constant 0 : index
      %c0_96 = arith.constant 0 : index
      %117 = vector.load %arg2[%c0_94, %116, %c0_95, %c0_96] : memref<1x16x16x4xbf16, #tpu.memory_space<vmem>>, vector<1x1x16x4xbf16>
      %118 = vector.shape_cast %117 : vector<1x1x16x4xbf16> to vector<1x16x4xbf16>
      %119 = vector.shape_cast %118 : vector<1x16x4xbf16> to vector<16x4xbf16>
      %c0_97 = arith.constant 0 : index
      %c0_98 = arith.constant 0 : index
      %120 = vector.load %arg3[%c0_97, %c0_98] : memref<4x4xbf16, #tpu.memory_space<vmem>>, vector<4x4xbf16>
      %cst_99 = arith.constant dense<0.000000e+00> : vector<16x4xf32>
      %121 = tpu.matmul %119, %120, %cst_99 {dimension_numbers = #tpu.dot_dimension_numbers<[1], [0], [0], [1], [0, 0, 1, 1], [], []>} : vector<16x4xbf16>, vector<4x4xbf16>, vector<16x4xf32> -> vector<16x4xf32>
      %c0_100 = arith.constant 0 : index
      %c0_101 = arith.constant 0 : index
      %122 = vector.load %arg4[%c0_100, %c0_101] : memref<1x4xf32, #tpu.memory_space<vmem>>, vector<1x4xf32>
      %123 = vector.broadcast %122 : vector<1x4xf32> to vector<16x4xf32>
      %124 = arith.addf %121, %123 : vector<16x4xf32>
      %cst_102 = arith.constant 0.000000e+00 : f32
      %125 = vector.broadcast %cst_102 : f32 to vector<16x4xf32>
      %126 = arith.maximumf %124, %125 : vector<16x4xf32>
      %127 = arith.truncf %126 : vector<16x4xf32> to vector<16x4xbf16>
      %cst_103 = arith.constant 0.000000e+00 : bf16
      %128 = vector.broadcast %cst_103 : bf16 to vector<1x1x4xbf16>
      %129 = vector.shape_cast %127 : vector<16x4xbf16> to vector<1x16x4xbf16>
      %130 = tpu.concatenate %128, %129, %128 in 1 : vector<1x1x4xbf16>, vector<1x16x4xbf16>, vector<1x1x4xbf16> -> vector<1x18x4xbf16>
      %c0_104 = arith.constant 0 : index
      %c0_105 = arith.constant 0 : index
      %c0_106 = arith.constant 0 : index
      %131 = vector.load %arg12[%c0_104, %c0_105, %c0_106] : memref<18x18x4xbf16, #tpu.memory_space<vmem>>, vector<1x18x4xbf16>
      tpu.vector_store %arg12[%c0_104, %c0_105, %c0_106], %130 {strides = array<i32>} : memref<18x18x4xbf16, #tpu.memory_space<vmem>>, vector<1x18x4xbf16>,
    } else {
    }
    %true = arith.constant true
    %22 = arith.xori %19, %true : i1
    %23 = arith.extui %22 : i1 to i32
    %c0_i32_12 = arith.constant 0 : i32
    %24 = arith.cmpi ne, %23, %c0_i32_12 : i32
    scf.if %24 {
      %c0_94 = arith.constant 0 : index
      %c0_95 = arith.constant 0 : index
      %c0_96 = arith.constant 0 : index
      %115 = vector.load %arg12[%c0_94, %c0_95, %c0_96] : memref<18x18x4xbf16, #tpu.memory_space<vmem>>, vector<1x18x4xbf16>
      tpu.vector_store %arg12[%c0_94, %c0_95, %c0_96], %18 {strides = array<i32>} : memref<18x18x4xbf16, #tpu.memory_space<vmem>>, vector<1x18x4xbf16>,
    } else {
    }
    %c18_i32 = arith.constant 18 : i32
    %25 = arith.addi %1, %c18_i32 : i32
    %c2_i32 = arith.constant 2 : i32
    %26 = arith.subi %25, %c2_i32 : i32
    %c16_i32_13 = arith.constant 16 : i32
    %27 = arith.cmpi slt, %26, %c16_i32_13 : i32
    %28 = arith.extui %27 : i1 to i32
    %c0_i32_14 = arith.constant 0 : i32
    %29 = arith.cmpi ne, %28, %c0_i32_14 : i32
    scf.if %29 {
      %c0_94 = arith.constant 0 : index
      %115 = arith.index_cast %26 : i32 to index
      %c0_95 = arith.constant 0 : index
      %c0_96 = arith.constant 0 : index
      %116 = vector.load %arg2[%c0_94, %115, %c0_95, %c0_96] : memref<1x16x16x4xbf16, #tpu.memory_space<vmem>>, vector<1x1x16x4xbf16>
      %117 = vector.shape_cast %116 : vector<1x1x16x4xbf16> to vector<1x16x4xbf16>
      %118 = vector.shape_cast %117 : vector<1x16x4xbf16> to vector<16x4xbf16>
      %c0_97 = arith.constant 0 : index
      %c0_98 = arith.constant 0 : index
      %119 = vector.load %arg3[%c0_97, %c0_98] : memref<4x4xbf16, #tpu.memory_space<vmem>>, vector<4x4xbf16>
      %cst_99 = arith.constant dense<0.000000e+00> : vector<16x4xf32>
      %120 = tpu.matmul %118, %119, %cst_99 {dimension_numbers = #tpu.dot_dimension_numbers<[1], [0], [0], [1], [0, 0, 1, 1], [], []>} : vector<16x4xbf16>, vector<4x4xbf16>, vector<16x4xf32> -> vector<16x4xf32>
      %c0_100 = arith.constant 0 : index
      %c0_101 = arith.constant 0 : index
      %121 = vector.load %arg4[%c0_100, %c0_101] : memref<1x4xf32, #tpu.memory_space<vmem>>, vector<1x4xf32>
      %122 = vector.broadcast %121 : vector<1x4xf32> to vector<16x4xf32>
      %123 = arith.addf %120, %122 : vector<16x4xf32>
      %cst_102 = arith.constant 0.000000e+00 : f32
      %124 = vector.broadcast %cst_102 : f32 to vector<16x4xf32>
      %125 = arith.maximumf %123, %124 : vector<16x4xf32>
      %126 = arith.truncf %125 : vector<16x4xf32> to vector<16x4xbf16>
      %cst_103 = arith.constant 0.000000e+00 : bf16
      %127 = vector.broadcast %cst_103 : bf16 to vector<1x1x4xbf16>
      %128 = vector.shape_cast %126 : vector<16x4xbf16> to vector<1x16x4xbf16>
      %129 = tpu.concatenate %127, %128, %127 in 1 : vector<1x1x4xbf16>, vector<1x16x4xbf16>, vector<1x1x4xbf16> -> vector<1x18x4xbf16>
      %c17 = arith.constant 17 : index
      %c0_104 = arith.constant 0 : index
      %c0_105 = arith.constant 0 : index
      %130 = vector.load %arg12[%c17, %c0_104, %c0_105] : memref<18x18x4xbf16, #tpu.memory_space<vmem>>, vector<1x18x4xbf16>
      tpu.vector_store %arg12[%c17, %c0_104, %c0_105], %129 {strides = array<i32>} : memref<18x18x4xbf16, #tpu.memory_space<vmem>>, vector<1x18x4xbf16>,
    } else {
    }
    %true_15 = arith.constant true
    %30 = arith.xori %27, %true_15 : i1
    %31 = arith.extui %30 : i1 to i32
    %c0_i32_16 = arith.constant 0 : i32
    %32 = arith.cmpi ne, %31, %c0_i32_16 : i32
    scf.if %32 {
      %c17 = arith.constant 17 : index
      %c0_94 = arith.constant 0 : index
      %c0_95 = arith.constant 0 : index
      %115 = vector.load %arg12[%c17, %c0_94, %c0_95] : memref<18x18x4xbf16, #tpu.memory_space<vmem>>, vector<1x18x4xbf16>
      tpu.vector_store %arg12[%c17, %c0_94, %c0_95], %18 {strides = array<i32>} : memref<18x18x4xbf16, #tpu.memory_space<vmem>>, vector<1x18x4xbf16>,
    } else {
    }
    %cst_17 = arith.constant 0.000000e+00 : f32
    %33 = vector.broadcast %cst_17 : f32 to vector<256x4xf32>
    %c0_18 = arith.constant 0 : index
    %c0_19 = arith.constant 0 : index
    %c0_20 = arith.constant 0 : index
    %34 = vector.load %arg12[%c0_18, %c0_19, %c0_20] : memref<18x18x4xbf16, #tpu.memory_space<vmem>>, vector<16x16x4xbf16>
    %35 = vector.shape_cast %34 : vector<16x16x4xbf16> to vector<256x4xbf16>
    %c0_21 = arith.constant 0 : index
    %c0_22 = arith.constant 0 : index
    %c0_23 = arith.constant 0 : index
    %36 = vector.load %arg5[%c0_21, %c0_22, %c0_23] : memref<9x4x4xbf16, #tpu.memory_space<vmem>>, vector<1x4x4xbf16>
    %37 = vector.shape_cast %36 : vector<1x4x4xbf16> to vector<4x4xbf16>
    %cst_24 = arith.constant dense<0.000000e+00> : vector<256x4xf32>
    %38 = tpu.matmul %35, %37, %cst_24 {dimension_numbers = #tpu.dot_dimension_numbers<[1], [0], [0], [1], [0, 0, 1, 1], [], []>} : vector<256x4xbf16>, vector<4x4xbf16>, vector<256x4xf32> -> vector<256x4xf32>
    %39 = arith.addf %33, %38 : vector<256x4xf32>
    %c0_25 = arith.constant 0 : index
    %c1_26 = arith.constant 1 : index
    %c0_27 = arith.constant 0 : index
    %40 = vector.load %arg12[%c0_25, %c1_26, %c0_27] : memref<18x18x4xbf16, #tpu.memory_space<vmem>>, vector<16x16x4xbf16>
    %41 = vector.shape_cast %40 : vector<16x16x4xbf16> to vector<256x4xbf16>
    %c1_28 = arith.constant 1 : index
    %c0_29 = arith.constant 0 : index
    %c0_30 = arith.constant 0 : index
    %42 = vector.load %arg5[%c1_28, %c0_29, %c0_30] : memref<9x4x4xbf16, #tpu.memory_space<vmem>>, vector<1x4x4xbf16>
    %43 = vector.shape_cast %42 : vector<1x4x4xbf16> to vector<4x4xbf16>
    %cst_31 = arith.constant dense<0.000000e+00> : vector<256x4xf32>
    %44 = tpu.matmul %41, %43, %cst_31 {dimension_numbers = #tpu.dot_dimension_numbers<[1], [0], [0], [1], [0, 0, 1, 1], [], []>} : vector<256x4xbf16>, vector<4x4xbf16>, vector<256x4xf32> -> vector<256x4xf32>
    %45 = arith.addf %39, %44 : vector<256x4xf32>
    %c0_32 = arith.constant 0 : index
    %c2 = arith.constant 2 : index
    %c0_33 = arith.constant 0 : index
    %46 = vector.load %arg12[%c0_32, %c2, %c0_33] : memref<18x18x4xbf16, #tpu.memory_space<vmem>>, vector<16x16x4xbf16>
    %47 = vector.shape_cast %46 : vector<16x16x4xbf16> to vector<256x4xbf16>
    %c2_34 = arith.constant 2 : index
    %c0_35 = arith.constant 0 : index
    %c0_36 = arith.constant 0 : index
    %48 = vector.load %arg5[%c2_34, %c0_35, %c0_36] : memref<9x4x4xbf16, #tpu.memory_space<vmem>>, vector<1x4x4xbf16>
    %49 = vector.shape_cast %48 : vector<1x4x4xbf16> to vector<4x4xbf16>
    %cst_37 = arith.constant dense<0.000000e+00> : vector<256x4xf32>
    %50 = tpu.matmul %47, %49, %cst_37 {dimension_numbers = #tpu.dot_dimension_numbers<[1], [0], [0], [1], [0, 0, 1, 1], [], []>} : vector<256x4xbf16>, vector<4x4xbf16>, vector<256x4xf32> -> vector<256x4xf32>
    %51 = arith.addf %45, %50 : vector<256x4xf32>
    %c1_38 = arith.constant 1 : index
    %c0_39 = arith.constant 0 : index
    %c0_40 = arith.constant 0 : index
    %52 = vector.load %arg12[%c1_38, %c0_39, %c0_40] : memref<18x18x4xbf16, #tpu.memory_space<vmem>>, vector<16x16x4xbf16>
    %53 = vector.shape_cast %52 : vector<16x16x4xbf16> to vector<256x4xbf16>
    %c3 = arith.constant 3 : index
    %c0_41 = arith.constant 0 : index
    %c0_42 = arith.constant 0 : index
    %54 = vector.load %arg5[%c3, %c0_41, %c0_42] : memref<9x4x4xbf16, #tpu.memory_space<vmem>>, vector<1x4x4xbf16>
    %55 = vector.shape_cast %54 : vector<1x4x4xbf16> to vector<4x4xbf16>
    %cst_43 = arith.constant dense<0.000000e+00> : vector<256x4xf32>
    %56 = tpu.matmul %53, %55, %cst_43 {dimension_numbers = #tpu.dot_dimension_numbers<[1], [0], [0], [1], [0, 0, 1, 1], [], []>} : vector<256x4xbf16>, vector<4x4xbf16>, vector<256x4xf32> -> vector<256x4xf32>
    %57 = arith.addf %51, %56 : vector<256x4xf32>
    %c1_44 = arith.constant 1 : index
    %c1_45 = arith.constant 1 : index
    %c0_46 = arith.constant 0 : index
    %58 = vector.load %arg12[%c1_44, %c1_45, %c0_46] : memref<18x18x4xbf16, #tpu.memory_space<vmem>>, vector<16x16x4xbf16>
    %59 = vector.shape_cast %58 : vector<16x16x4xbf16> to vector<256x4xbf16>
    %c4 = arith.constant 4 : index
    %c0_47 = arith.constant 0 : index
    %c0_48 = arith.constant 0 : index
    %60 = vector.load %arg5[%c4, %c0_47, %c0_48] : memref<9x4x4xbf16, #tpu.memory_space<vmem>>, vector<1x4x4xbf16>
    %61 = vector.shape_cast %60 : vector<1x4x4xbf16> to vector<4x4xbf16>
    %cst_49 = arith.constant dense<0.000000e+00> : vector<256x4xf32>
    %62 = tpu.matmul %59, %61, %cst_49 {dimension_numbers = #tpu.dot_dimension_numbers<[1], [0], [0], [1], [0, 0, 1, 1], [], []>} : vector<256x4xbf16>, vector<4x4xbf16>, vector<256x4xf32> -> vector<256x4xf32>
    %63 = arith.addf %57, %62 : vector<256x4xf32>
    %c1_50 = arith.constant 1 : index
    %c2_51 = arith.constant 2 : index
    %c0_52 = arith.constant 0 : index
    %64 = vector.load %arg12[%c1_50, %c2_51, %c0_52] : memref<18x18x4xbf16, #tpu.memory_space<vmem>>, vector<16x16x4xbf16>
    %65 = vector.shape_cast %64 : vector<16x16x4xbf16> to vector<256x4xbf16>
    %c5 = arith.constant 5 : index
    %c0_53 = arith.constant 0 : index
    %c0_54 = arith.constant 0 : index
    %66 = vector.load %arg5[%c5, %c0_53, %c0_54] : memref<9x4x4xbf16, #tpu.memory_space<vmem>>, vector<1x4x4xbf16>
    %67 = vector.shape_cast %66 : vector<1x4x4xbf16> to vector<4x4xbf16>
    %cst_55 = arith.constant dense<0.000000e+00> : vector<256x4xf32>
    %68 = tpu.matmul %65, %67, %cst_55 {dimension_numbers = #tpu.dot_dimension_numbers<[1], [0], [0], [1], [0, 0, 1, 1], [], []>} : vector<256x4xbf16>, vector<4x4xbf16>, vector<256x4xf32> -> vector<256x4xf32>
    %69 = arith.addf %63, %68 : vector<256x4xf32>
    %c2_56 = arith.constant 2 : index
    %c0_57 = arith.constant 0 : index
    %c0_58 = arith.constant 0 : index
    %70 = vector.load %arg12[%c2_56, %c0_57, %c0_58] : memref<18x18x4xbf16, #tpu.memory_space<vmem>>, vector<16x16x4xbf16>
    %71 = vector.shape_cast %70 : vector<16x16x4xbf16> to vector<256x4xbf16>
    %c6 = arith.constant 6 : index
    %c0_59 = arith.constant 0 : index
    %c0_60 = arith.constant 0 : index
    %72 = vector.load %arg5[%c6, %c0_59, %c0_60] : memref<9x4x4xbf16, #tpu.memory_space<vmem>>, vector<1x4x4xbf16>
    %73 = vector.shape_cast %72 : vector<1x4x4xbf16> to vector<4x4xbf16>
    %cst_61 = arith.constant dense<0.000000e+00> : vector<256x4xf32>
    %74 = tpu.matmul %71, %73, %cst_61 {dimension_numbers = #tpu.dot_dimension_numbers<[1], [0], [0], [1], [0, 0, 1, 1], [], []>} : vector<256x4xbf16>, vector<4x4xbf16>, vector<256x4xf32> -> vector<256x4xf32>
    %75 = arith.addf %69, %74 : vector<256x4xf32>
    %c2_62 = arith.constant 2 : index
    %c1_63 = arith.constant 1 : index
    %c0_64 = arith.constant 0 : index
    %76 = vector.load %arg12[%c2_62, %c1_63, %c0_64] : memref<18x18x4xbf16, #tpu.memory_space<vmem>>, vector<16x16x4xbf16>
    %77 = vector.shape_cast %76 : vector<16x16x4xbf16> to vector<256x4xbf16>
    %c7 = arith.constant 7 : index
    %c0_65 = arith.constant 0 : index
    %c0_66 = arith.constant 0 : index
    %78 = vector.load %arg5[%c7, %c0_65, %c0_66] : memref<9x4x4xbf16, #tpu.memory_space<vmem>>, vector<1x4x4xbf16>
    %79 = vector.shape_cast %78 : vector<1x4x4xbf16> to vector<4x4xbf16>
    %cst_67 = arith.constant dense<0.000000e+00> : vector<256x4xf32>
    %80 = tpu.matmul %77, %79, %cst_67 {dimension_numbers = #tpu.dot_dimension_numbers<[1], [0], [0], [1], [0, 0, 1, 1], [], []>} : vector<256x4xbf16>, vector<4x4xbf16>, vector<256x4xf32> -> vector<256x4xf32>
    %81 = arith.addf %75, %80 : vector<256x4xf32>
    %c2_68 = arith.constant 2 : index
    %c2_69 = arith.constant 2 : index
    %c0_70 = arith.constant 0 : index
    %82 = vector.load %arg12[%c2_68, %c2_69, %c0_70] : memref<18x18x4xbf16, #tpu.memory_space<vmem>>, vector<16x16x4xbf16>
    %83 = vector.shape_cast %82 : vector<16x16x4xbf16> to vector<256x4xbf16>
    %c8 = arith.constant 8 : index
    %c0_71 = arith.constant 0 : index
    %c0_72 = arith.constant 0 : index
    %84 = vector.load %arg5[%c8, %c0_71, %c0_72] : memref<9x4x4xbf16, #tpu.memory_space<vmem>>, vector<1x4x4xbf16>
    %85 = vector.shape_cast %84 : vector<1x4x4xbf16> to vector<4x4xbf16>
    %cst_73 = arith.constant dense<0.000000e+00> : vector<256x4xf32>
    %86 = tpu.matmul %83, %85, %cst_73 {dimension_numbers = #tpu.dot_dimension_numbers<[1], [0], [0], [1], [0, 0, 1, 1], [], []>} : vector<256x4xbf16>, vector<4x4xbf16>, vector<256x4xf32> -> vector<256x4xf32>
    %87 = arith.addf %81, %86 : vector<256x4xf32>
    %c0_74 = arith.constant 0 : index
    %c0_75 = arith.constant 0 : index
    %88 = vector.load %arg6[%c0_74, %c0_75] : memref<1x4xf32, #tpu.memory_space<vmem>>, vector<1x4xf32>
    %89 = vector.broadcast %88 : vector<1x4xf32> to vector<256x4xf32>
    %90 = arith.addf %87, %89 : vector<256x4xf32>
    %cst_76 = arith.constant 0.000000e+00 : f32
    %91 = vector.broadcast %cst_76 : f32 to vector<256x4xf32>
    %92 = arith.maximumf %90, %91 : vector<256x4xf32>
    %93 = arith.truncf %92 : vector<256x4xf32> to vector<256x4xbf16>
    %c0_77 = arith.constant 0 : index
    %c0_78 = arith.constant 0 : index
    %94 = vector.load %arg7[%c0_77, %c0_78] : memref<4x8xbf16, #tpu.memory_space<vmem>>, vector<4x8xbf16>
    %cst_79 = arith.constant dense<0.000000e+00> : vector<256x8xf32>
    %95 = tpu.matmul %93, %94, %cst_79 {dimension_numbers = #tpu.dot_dimension_numbers<[1], [0], [0], [1], [0, 0, 1, 1], [], []>} : vector<256x4xbf16>, vector<4x8xbf16>, vector<256x8xf32> -> vector<256x8xf32>
    %c0_80 = arith.constant 0 : index
    %c0_81 = arith.constant 0 : index
    %96 = vector.load %arg8[%c0_80, %c0_81] : memref<1x8xf32, #tpu.memory_space<vmem>>, vector<1x8xf32>
    %97 = vector.broadcast %96 : vector<1x8xf32> to vector<256x8xf32>
    %98 = arith.addf %95, %97 : vector<256x8xf32>
    %c0_82 = arith.constant 0 : index
    %99 = arith.index_cast %1 : i32 to index
    %c0_83 = arith.constant 0 : index
    %c0_84 = arith.constant 0 : index
    %100 = vector.load %arg2[%c0_82, %99, %c0_83, %c0_84] : memref<1x16x16x4xbf16, #tpu.memory_space<vmem>>, vector<1x16x16x4xbf16>
    %101 = vector.shape_cast %100 : vector<1x16x16x4xbf16> to vector<16x16x4xbf16>
    %102 = vector.shape_cast %101 : vector<16x16x4xbf16> to vector<256x4xbf16>
    %c0_85 = arith.constant 0 : index
    %c0_86 = arith.constant 0 : index
    %103 = vector.load %arg9[%c0_85, %c0_86] : memref<4x8xbf16, #tpu.memory_space<vmem>>, vector<4x8xbf16>
    %cst_87 = arith.constant dense<0.000000e+00> : vector<256x8xf32>
    %104 = tpu.matmul %102, %103, %cst_87 {dimension_numbers = #tpu.dot_dimension_numbers<[1], [0], [0], [1], [0, 0, 1, 1], [], []>} : vector<256x4xbf16>, vector<4x8xbf16>, vector<256x8xf32> -> vector<256x8xf32>
    %c0_88 = arith.constant 0 : index
    %c0_89 = arith.constant 0 : index
    %105 = vector.load %arg10[%c0_88, %c0_89] : memref<1x8xf32, #tpu.memory_space<vmem>>, vector<1x8xf32>
    %106 = vector.broadcast %105 : vector<1x8xf32> to vector<256x8xf32>
    %107 = arith.addf %104, %106 : vector<256x8xf32>
    %108 = arith.addf %98, %107 : vector<256x8xf32>
    %cst_90 = arith.constant 0.000000e+00 : f32
    %109 = vector.broadcast %cst_90 : f32 to vector<256x8xf32>
    %110 = arith.maximumf %108, %109 : vector<256x8xf32>
    %111 = arith.truncf %110 : vector<256x8xf32> to vector<256x8xbf16>
    %c0_91 = arith.constant 0 : index
    %c0_92 = arith.constant 0 : index
    %c0_93 = arith.constant 0 : index
    %112 = vector.load %arg11[%c0_91, %c0_92, %c0_93] : memref<1x256x8xbf16, #tpu.memory_space<vmem>>, vector<1x256x8xbf16>
    %113 = vector.shape_cast %112 : vector<1x256x8xbf16> to vector<256x8xbf16>
    %114 = vector.shape_cast %111 : vector<256x8xbf16> to vector<1x256x8xbf16>
    tpu.vector_store %arg11[%c0_91, %c0_92, %c0_93], %114 {strides = array<i32>} : memref<1x256x8xbf16, #tpu.memory_space<vmem>>, vector<1x256x8xbf16>,
    return
  }
  func.func @transform_0(%arg0: i32, %arg1: i32) -> (i32, i32, i32, i32) {
    %c0_i32 = arith.constant 0 : i32
    %c0_i32_0 = arith.constant 0 : i32
    %c0_i32_1 = arith.constant 0 : i32
    %c0_i32_2 = arith.constant 0 : i32
    return %arg0, %c0_i32, %c0_i32_0, %c0_i32_1 : i32, i32, i32, i32
  }
  func.func @transform_1(%arg0: i32, %arg1: i32) -> (i32, i32) {
    %c0_i32 = arith.constant 0 : i32
    %c0_i32_0 = arith.constant 0 : i32
    %c0_i32_1 = arith.constant 0 : i32
    return %c0_i32, %c0_i32_0 : i32, i32
  }
  func.func @transform_2(%arg0: i32, %arg1: i32) -> (i32, i32) {
    %c0_i32 = arith.constant 0 : i32
    %c0_i32_0 = arith.constant 0 : i32
    %c0_i32_1 = arith.constant 0 : i32
    return %c0_i32, %c0_i32_0 : i32, i32
  }
  func.func @transform_3(%arg0: i32, %arg1: i32) -> (i32, i32, i32) {
    %c0_i32 = arith.constant 0 : i32
    %c0_i32_0 = arith.constant 0 : i32
    %c0_i32_1 = arith.constant 0 : i32
    %c0_i32_2 = arith.constant 0 : i32
    return %c0_i32, %c0_i32_0, %c0_i32_1 : i32, i32, i32
  }
  func.func @transform_4(%arg0: i32, %arg1: i32) -> (i32, i32) {
    %c0_i32 = arith.constant 0 : i32
    %c0_i32_0 = arith.constant 0 : i32
    %c0_i32_1 = arith.constant 0 : i32
    return %c0_i32, %c0_i32_0 : i32, i32
  }
  func.func @transform_5(%arg0: i32, %arg1: i32) -> (i32, i32) {
    %c0_i32 = arith.constant 0 : i32
    %c0_i32_0 = arith.constant 0 : i32
    %c0_i32_1 = arith.constant 0 : i32
    return %c0_i32, %c0_i32_0 : i32, i32
  }
  func.func @transform_6(%arg0: i32, %arg1: i32) -> (i32, i32) {
    %c0_i32 = arith.constant 0 : i32
    %c0_i32_0 = arith.constant 0 : i32
    %c0_i32_1 = arith.constant 0 : i32
    return %c0_i32, %c0_i32_0 : i32, i32
  }
  func.func @transform_7(%arg0: i32, %arg1: i32) -> (i32, i32) {
    %c0_i32 = arith.constant 0 : i32
    %c0_i32_0 = arith.constant 0 : i32
    %c0_i32_1 = arith.constant 0 : i32
    return %c0_i32, %c0_i32_0 : i32, i32
  }
  func.func @transform_8(%arg0: i32, %arg1: i32) -> (i32, i32) {
    %c0_i32 = arith.constant 0 : i32
    %c0_i32_0 = arith.constant 0 : i32
    %c0_i32_1 = arith.constant 0 : i32
    return %c0_i32, %c0_i32_0 : i32, i32
  }
  func.func @transform_9(%arg0: i32, %arg1: i32) -> (i32, i32, i32) {
    %c0_i32 = arith.constant 0 : i32
    %c0_i32_0 = arith.constant 0 : i32
    return %arg0, %arg1, %c0_i32 : i32, i32, i32
  }
}

</mosaic_0001>

<bundles_post_ra>
// kernel: tpu_custom_call.1
= control target key start
LH: loop header
LB: loop body
LE: loop exit
PB: predicated region body
PF: predicated region fallthrough
CT: control target
= control target key end

     0   :  { %s8626_s30 = smov 0   ;;  %s8628_s10 = smov 0   ;;  %s10523_s0 = inlined_call_operand.vmem [shape: bf16[2,16,16,4], index: 0, kind: input, shape index: {}]   ;;  %s10524_s1 = inlined_call_operand.vmem [shape: bf16[4,4], index: 1, kind: input, shape index: {}]   ;;  %s10525_s2 = inlined_call_operand.vmem [shape: f32[1,4], index: 2, kind: input, shape index: {}]   ;;  %s10526_s3 = inlined_call_operand.vmem [shape: bf16[9,4,4], index: 3, kind: input, shape index: {}]   ;;  %s10527_s4 = inlined_call_operand.vmem [shape: f32[1,4], index: 4, kind: input, shape index: {}]   ;;  %s10528_s5 = inlined_call_operand.vmem [shape: bf16[4,8], index: 5, kind: input, shape index: {}]   ;;  %s10529_s6 = inlined_call_operand.vmem [shape: f32[1,8], index: 6, kind: input, shape index: {}]   ;;  %s10530_s7 = inlined_call_operand.vmem [shape: bf16[4,8], index: 7, kind: input, shape index: {}]   ;;  %s10531_s8 = inlined_call_operand.vmem [shape: f32[1,8], index: 8, kind: input, shape index: {}]   ;;  %s10532_s9 = inlined_call_operand.vmem [shape: bf16[2,256,8], index: 9, kind: output, shape index: {}]  }
   0x1   :  { %s8630_s11 = smov 0  }
   0x2 LB: > { %s31_s12 = sadd.s32 1, %s8569_s10  ;;  %p6874_p0 = scmp.ge.s32.totalorder %s8573_s11, 1  ;;  %s8573_s11 = sphi %s8630_s11, %s19_s11   ;;  %s8569_s10 = sphi %s8628_s10, %s10633_s10   ;;  %s8565_s30 = sphi %s8626_s30, %s10632_s30  }
   0x3   : > { %p33_p1 = scmp.ge.s32.totalorder %s31_s12, 2  ;;  %p301_p2 = scmp.lt.s32.totalorder %s8573_s11, 3 }
   0x5   : > { %s10635_s12 = smov (%p33_p1, %s31_s12), 0  ;;  %p302_p3 = pnand %p6874_p0, %p301_p2 }
   0x7   : > { %305 = sbr.rel (%p302_p3) target bundleno = 1207 (0x4b7), region = 56 }
   0xe   : > { %v393_v0 = vld [vmem:[%s10524_s1] sm:$0x3]  ;;  %vm530_vm0 = vcmask 1041408   ;;  %p341_p4 = scmp.lt.s32.totalorder %s8565_s30, 1  ;;  %vm481_vm1 = vcmask 31744   ;;  %vm1099_vm2 = vcmask 27648  }
   0xf   : > { %8403 = vmatprep.subr.msk.bf16.mxu0 %vm530_vm0, %v393_v0  ;;  %v532_v1 = vsel %vm530_vm0, %v393_v0, 0  ;;  %vm1102_vm3 = vcmask 24576   ;;  %v8575_v18 = vmov 0   ;;  %v7090_v19 = vld [vmem:[%s10526_s3 + $0x6] sm:$0x3]  ;;  %vm887_vm7 = vcmask 1040384  }
  0x10   : > { %7644 = vmatpush3.bf16.msra.mxu0 %v532_v1  ;;  %s10637_s30 = smov (!%p341_p4, %s8565_s30), 1  ;;  %1251 = vst.msk [vmem:[#allocation2] sm:$0xf] %vm1099_vm2, %v8575_v18  ;;  %1252 = vst.msk [vmem:[#allocation2 + $0x4] sm:$0xf] %vm1099_vm2, %v8575_v18  ;;  %8407 = vmatprep.subr.msk.bf16.mxu1 %vm530_vm0, %v7090_v19  ;;  %v2971_v20 = vsel %vm530_vm0, %v7090_v19, 0 }
  0x11   : > { %s7405_s15 = sshll.u32 %s10637_s30, 7  ;;  %1253 = vst.msk [vmem:[#allocation2 + $0x8] sm:$0x1] %vm1102_vm3, %v8575_v18  ;;  %1360 = vst.msk [vmem:[#allocation2 + $0xd4] sm:$0x1] %vm1102_vm3, %v8575_v18  ;;  %7780 = vmatpush3.bf16.msra.mxu1 %v2971_v20  ;;  %vm2399_vm10 = vcmask 1042432  }
  0x12   : > { %s8657_s18 = scalar_lea.vmem %s10523_s0, %s7405_s15  ;;  %1358 = vst.msk [vmem:[#allocation2 + $0xcc] sm:$0xf] %vm1099_vm2, %v8575_v18  ;;  %1359 = vst.msk [vmem:[#allocation2 + $0xd0] sm:$0xf] %vm1099_vm2, %v8575_v18  ;;  %vm1410_vm4 = vsmask.f32 3328  ;;  %s10420_s20 = scalar_lea.vmem %s10532_s9, %s7405_s15 }
  0x13   : > { %v8440_v2 = vld [vmem:[%s8657_s18] sm:$0xff]   ;;  %v8441_v3 = vld [vmem:[%s8657_s18 + $0x8] sm:$0xff]   ;;  %v8442_v4 = vld [vmem:[%s8657_s18 + $0x10] sm:$0xff]   ;;  %vm1411_vm5 = vsmask.f32 7440  ;;  %vm2400_vm11 = vcmask 1046532  }
  0x14   : > { %7645 = vmatprep.mubr.msk.bf16.mxu0 %vm481_vm1, %v8440_v2  ;;  %v8443_v5 = vld [vmem:[%s8657_s18 + $0x18] sm:$0xff]   ;;  %v8444_v6 = vld [vmem:[%s8657_s18 + $0x20] sm:$0xff]   ;;  %v8445_v7 = vld [vmem:[%s8657_s18 + $0x28] sm:$0xff]   ;;  %vm888_vm8 = vsmask.f32 256  ;;  %vm6748_vm13 = vcmask 60416  }
  0x15   : > { %7646 = vmatmul.mubr.msk.bf16.vlgmr.msra.gmra.mrb[0].mxu0 %vm481_vm1, %v8441_v3  ;;  %v8446_v8 = vld [vmem:[%s8657_s18 + $0x30] sm:$0xff]   ;;  %v8447_v9 = vld [vmem:[%s8657_s18 + $0x38] sm:$0xff]   ;;  %v8448_v10 = vld [vmem:[%s8657_s18 + $0x40] sm:$0xff]  }
  0x16   : > { %7649 = vmatprep.mubr.msk.bf16.mxu0 %vm481_vm1, %v8442_v4  ;;  %v8449_v11 = vld [vmem:[%s8657_s18 + $0x48] sm:$0xff]   ;;  %v8450_v12 = vld [vmem:[%s8657_s18 + $0x50] sm:$0xff]   ;;  %v8451_v13 = vld [vmem:[%s8657_s18 + $0x58] sm:$0xff]  }
  0x17   : > { %v8452_v14 = vld [vmem:[%s8657_s18 + $0x60] sm:$0xff]   ;;  %v8453_v15 = vld [vmem:[%s8657_s18 + $0x68] sm:$0xff]   ;;  %v8454_v16 = vld [vmem:[%s8657_s18 + $0x70] sm:$0xff]  }
  0x18   : > { %v8455_v17 = vld [vmem:[%s8657_s18 + $0x78] sm:$0xff]   ;;  %v8702_v21 = vld [vmem:[#allocation2] sm:$0xf]  ;;  %v8704_v22 = vld [vmem:[#allocation2 + $0x4] sm:$0xf] }
  0x19   : > { %v1414_v23 = vshrl.u32 %v8702_v21, 16  ;;  %v1417_v24 = vshll.u32 %v8702_v21, 16  ;;  %v1423_v25 = vshll.u32 %v8704_v22, 16  ;;  %v1427_v26 = vshrl.u32 %v8704_v22, 16  ;;  %v1394_v31 = vld [vmem:[#allocation2 + $0x8] sm:$0x1]  ;;  %vm8713_vm6 = vmor %vm1410_vm4, %vm1411_vm5 }
  0x1a   : > { %v1433_v34 = vshll.u32 %v1394_v31, 16  ;;  %v6976_v37 = vld [vmem:[%s10526_s3 + $0x2] sm:$0x3]  ;;  %v8727_v44 = vld [vmem:[%s10526_s3 + $0x8] sm:$0x3]  ;;  %vm8741_vm9 = vmand %vm887_vm7, %vm888_vm8 }
  0x1b   : > { %v1416_v27 = vrot.slane %v1414_v23, 4  ;;  %v1419_v28 = vrot.slane %v1417_v24, 5  ;;  %v1425_v29 = vrot.slane %v1423_v25, 5  ;;  %v1429_v30 = vrot.slane %v1427_v26, 4  ;;  %8404 = vmatprep.subr.msk.bf16.mxu0 %vm530_vm0, %v6976_v37  ;;  %8408 = vmatprep.subr.msk.bf16.mxu1 %vm530_vm0, %v8727_v44  ;;  %v8734_v45 = vld [vmem:[%s10525_s2] ss:$0 sm:$0xff]  ;;  %vm9374_vm12 = vmor %vm2399_vm10, %vm2400_vm11 }
  0x1c   : > { %v1435_v39 = vrot.slane %v1433_v34, 5  ;;  %v1896_v40 = vsel %vm530_vm0, %v6976_v37, 0  ;;  %v8761_v34 = vld [vmem:[%s10526_s3 + $0xa] sm:$0x3] }
  0x1d   : > { %7650 = vmatmul.mubr.msk.bf16.gmra.mrb[4].mxu0 %vm481_vm1, %v8443_v5  ;;  %v1420_v32 = vor.u32 %v1419_v28, %v1416_v27  ;;  %v1430_v33 = vor.u32 %v1429_v30, %v1425_v29 }
  0x1e   : > { %7653 = vmatprep.mubr.msk.bf16.mxu0 %vm481_vm1, %v8444_v6  ;;  %7678 = vmatpush3.bf16.msra.mxu0 %v1896_v40  ;;  %v8769_v40 = vsel %vm530_vm0, %v8727_v44, 0 }
  0x1f   : > { %v1421_v35 = vrot.slane %v1420_v32, 4  ;;  %v1431_v36 = vrot.slane %v1430_v33, 4 }
  0x21   : > { %v1426_v41 = vsel %vm8713_vm6, %v1421_v35, %v1425_v29  ;;  %v1436_v42 = vsel %vm8713_vm6, %v1431_v36, %v1435_v39 }
  0x22   : > { %v6977_v43 = vcombine.low %v1426_v41, %v1436_v42 }
  0x25   : > { %7654 = vmatmul.mubr.msk.bf16.gmra.mrb[8].mxu0 %vm481_vm1, %v8445_v7 }
  0x26   : > { %7657 = vmatprep.mubr.msk.bf16.mxu0 %vm481_vm1, %v8446_v8 }
  0x2d   : > { %7658 = vmatmul.mubr.msk.bf16.gmra.mrb[12].mxu0 %vm481_vm1, %v8447_v9 }
  0x2e   : > { %7661 = vmatprep.mubr.msk.bf16.mxu0 %vm481_vm1, %v8448_v10 }
  0x35   : > { %7662 = vmatmul.mubr.msk.bf16.gmra.mrb[16].mxu0 %vm481_vm1, %v8449_v11 }
  0x36   : > { %7665 = vmatprep.mubr.msk.bf16.mxu0 %vm481_vm1, %v8450_v12 }
  0x3d   : > { %7666 = vmatmul.mubr.msk.bf16.gmra.mrb[20].mxu0 %vm481_vm1, %v8451_v13 }
  0x3e   : > { %7669 = vmatprep.mubr.msk.bf16.mxu0 %vm481_vm1, %v8452_v14 }
  0x45   : > { %7670 = vmatmul.mubr.msk.bf16.gmra.mrb[24].mxu0 %vm481_vm1, %v8453_v15 }
  0x46   : > { %7673 = vmatprep.mubr.msk.bf16.mxu0 %vm481_vm1, %v8454_v16 }
  0x4d   : > { %7674 = vmatmul.mubr.msk.bf16.gmra.mrb[28].mxu0 %vm481_vm1, %v8455_v17 }
  0x4e   : > { %7679 = vmatprep.mubr.msk.bf16.mxu0 %vm481_vm1, %v6977_v43 }
  0xe8   : > { %v7647_v46 = vpop.f32.mrb[0].mxu0 }
  0xe9   : > { %v577_v47 = vadd.f32 %v7647_v46, %v8734_v45  ;;  %v568_v48 = vpop.f32.mrb[1].mxu0 }
  0xea   : > { %v569_v49 = vadd.f32 %v8734_v45, %v568_v48  ;;  %v7648_v50 = vpop.f32.mrb[2].mxu0 }
  0xeb   : > { %v580_v51 = vadd.f32 %v7648_v50, %v8734_v45  ;;  %v571_v52 = vpop.f32.mrb[3].mxu0  ;;  %v697_v54 = vmax.f32 %v577_v47, 0.0 }
  0xec   : > { %v572_v53 = vadd.f32 %v8734_v45, %v571_v52  ;;  %v695_v56 = vmax.f32 %v569_v49, 0.0 }
  0xed   : > { %v698_v55 = vmax.f32 %v580_v51, 0.0  ;;  %v8777_v51 = vsel %vm530_vm0, %v8761_v34, 0 }
  0xee   : > { %v696_v57 = vmax.f32 %v572_v53, 0.0 }
  0xef   : > { %v728_v58 = vpack.c.bf16 %v698_v55, %v697_v54  ;;  %v1393_v55 = vld [vmem:[%s10526_s3] sm:$0x3] }
  0xf0   : > { %v727_v59 = vpack.c.bf16 %v696_v57, %v695_v56  ;;  %v7651_v60 = vpop.f32.mrb[4].mxu0  ;;  %8405 = vmatprep.subr.msk.bf16.mxu0 %vm530_vm0, %v1393_v55 }
  0xf1   : > { %v751_v61 = vshrl.u32 %v728_v58, 16  ;;  %v593_v62 = vadd.f32 %v7651_v60, %v8734_v45  ;;  %v584_v63 = vpop.f32.mrb[5].mxu0  ;;  %v754_v5 = vshll.u32 %v728_v58, 16 }
  0xf2   : > { %v744_v1 = vshrl.u32 %v727_v59, 16  ;;  %v585_v2 = vadd.f32 %v8734_v45, %v584_v63  ;;  %v7652_v3 = vpop.f32.mrb[6].mxu0  ;;  %v747_v9 = vshll.u32 %v727_v59, 16  ;;  %v8790_v63 = vsel %vm530_vm0, %v1393_v55, 0 }
  0xf3   : > { %v753_v4 = vrot.slane %v751_v61, 7  ;;  %v596_v6 = vadd.f32 %v7652_v3, %v8734_v45  ;;  %v587_v7 = vpop.f32.mrb[7].mxu0  ;;  %v701_v10 = vmax.f32 %v593_v62, 0.0 }
  0xf4   : > { %v746_v8 = vrot.slane %v744_v1, 7  ;;  %v588_v11 = vadd.f32 %v8734_v45, %v587_v7  ;;  %v699_v14 = vmax.f32 %v585_v2, 0.0 }
  0xf5   : > { %v756_v12 = vor.u32 %v754_v5, %v753_v4  ;;  %v907_v13 = vsel %vm8741_vm9, %v753_v4, 0  ;;  %v702_v15 = vmax.f32 %v596_v6, 0.0 }
  0xf6   : > { %v6917_v16 = vcombine.low %v907_v13, %v907_v13  ;;  %v749_v17 = vor.u32 %v747_v9, %v746_v8  ;;  %v906_v18 = vsel %vm8741_vm9, %v746_v8, 0  ;;  %v700_v19 = vmax.f32 %v588_v11, 0.0 }
  0xf7   : > { %v891_v20 = vsel %vm8741_vm9, 0, %v756_v12  ;;  %v6914_v23 = vcombine.low %v906_v18, %v906_v18  ;;  %v730_v24 = vpack.c.bf16 %v702_v15, %v701_v10 }
  0xf8   : > { %v6915_v25 = vcombine.low %v891_v20, %v891_v20  ;;  %v6916_v26 = vcombine.high %v891_v20, %v891_v20  ;;  %1106 = vst.msk [vmem:[#allocation2 + $0x20] sm:$0x1] %vm1102_vm3, %v6917_v16  ;;  %v890_v27 = vsel %vm8741_vm9, 0, %v749_v17  ;;  %v729_v28 = vpack.c.bf16 %v700_v19, %v699_v14  ;;  %v7655_v29 = vpop.f32.mrb[8].mxu0 }
  0xf9   : > { %v6912_v30 = vcombine.low %v890_v27, %v890_v27  ;;  %v6913_v31 = vcombine.high %v890_v27, %v890_v27  ;;  %1103 = vst.msk [vmem:[#allocation2 + $0x14] sm:$0x1] %vm1102_vm3, %v6914_v23  ;;  %v765_v32 = vshrl.u32 %v730_v24, 16  ;;  %v600_v33 = vpop.f32.mrb[9].mxu0  ;;  %v609_v36 = vadd.f32 %v7655_v29, %v8734_v45 }
  0xfa   : > { %1104 = vst.msk [vmem:[#allocation2 + $0x18] sm:$0xf] %vm1099_vm2, %v6915_v25  ;;  %1105 = vst.msk [vmem:[#allocation2 + $0x1c] sm:$0xf] %vm1099_vm2, %v6916_v26  ;;  %v758_v35 = vshrl.u32 %v729_v28, 16  ;;  %v601_v37 = vadd.f32 %v8734_v45, %v600_v33  ;;  %v7656_v39 = vpop.f32.mrb[10].mxu0  ;;  %v7009_v23 = vcombine.low %v8702_v21, %v8704_v22 }
  0xfb   : > { %1100 = vst.msk [vmem:[#allocation2 + $0xc] sm:$0xf] %vm1099_vm2, %v6912_v30  ;;  %1101 = vst.msk [vmem:[#allocation2 + $0x10] sm:$0xf] %vm1099_vm2, %v6913_v31  ;;  %v767_v41 = vrot.slane %v765_v32, 7  ;;  %v768_v42 = vshll.u32 %v730_v24, 16  ;;  %v612_v46 = vadd.f32 %v7656_v39, %v8734_v45 }
  0xfc   : > { %v761_v43 = vshll.u32 %v729_v28, 16  ;;  %v603_v47 = vpop.f32.mrb[11].mxu0  ;;  %v760_v48 = vrot.slane %v758_v35, 7  ;;  %v705_v49 = vmax.f32 %v609_v36, 0.0  ;;  %v703_v53 = vmax.f32 %v601_v37, 0.0 }
  0xfd   : > { %v604_v50 = vadd.f32 %v8734_v45, %v603_v47  ;;  %v770_v44 = vor.u32 %v768_v42, %v767_v41  ;;  %v909_v52 = vsel %vm8741_vm9, %v767_v41, 0  ;;  %v706_v54 = vmax.f32 %v612_v46, 0.0 }
  0xfe   : > { %v6923_v56 = vcombine.low %v909_v52, %v909_v52  ;;  %v763_v57 = vor.u32 %v761_v43, %v760_v48  ;;  %v908_v58 = vsel %vm8741_vm9, %v760_v48, 0 }
  0xff   : > { %v704_v59 = vmax.f32 %v604_v50, 0.0  ;;  %v893_v60 = vsel %vm8741_vm9, 0, %v770_v44  ;;  %v6920_v61 = vcombine.low %v908_v58, %v908_v58  ;;  %v732_v62 = vpack.c.bf16 %v706_v54, %v705_v49 }
 0x100   : > { %v6921_v1 = vcombine.low %v893_v60, %v893_v60  ;;  %v6922_v2 = vcombine.high %v893_v60, %v893_v60  ;;  %1112 = vst.msk [vmem:[#allocation2 + $0x38] sm:$0x1] %vm1102_vm3, %v6923_v56  ;;  %v892_v3 = vsel %vm8741_vm9, 0, %v763_v57  ;;  %v7659_v5 = vpop.f32.mrb[12].mxu0 }
 0x101   : > { %v731_v4 = vpack.c.bf16 %v704_v59, %v703_v53  ;;  %v6918_v6 = vcombine.low %v892_v3, %v892_v3  ;;  %v6919_v7 = vcombine.high %v892_v3, %v892_v3  ;;  %1109 = vst.msk [vmem:[#allocation2 + $0x2c] sm:$0x1] %vm1102_vm3, %v6920_v61  ;;  %v779_v8 = vshrl.u32 %v732_v62, 16  ;;  %v616_v10 = vpop.f32.mrb[13].mxu0  ;;  %v8457_v11 = vld [vmem:[#allocation2 + $0x18] sm:$0xff]  }
 0x102   : > { %v782_v9 = vshll.u32 %v732_v62, 16  ;;  %1110 = vst.msk [vmem:[#allocation2 + $0x30] sm:$0xf] %vm1099_vm2, %v6921_v1  ;;  %1111 = vst.msk [vmem:[#allocation2 + $0x34] sm:$0xf] %vm1099_vm2, %v6922_v2  ;;  %v625_v14 = vadd.f32 %v7659_v5, %v8734_v45  ;;  %v617_v15 = vadd.f32 %v8734_v45, %v616_v10  ;;  %v7660_v16 = vpop.f32.mrb[14].mxu0 }
 0x103   : > { %v772_v12 = vshrl.u32 %v731_v4, 16  ;;  %v775_v13 = vshll.u32 %v731_v4, 16  ;;  %v8456_v17 = vld [vmem:[#allocation2 + $0xc] sm:$0xff]   ;;  %1107 = vst.msk [vmem:[#allocation2 + $0x24] sm:$0xf] %vm1099_vm2, %v6918_v6  ;;  %v781_v18 = vrot.slane %v779_v8, 7  ;;  %v628_v19 = vadd.f32 %v7660_v16, %v8734_v45 }
 0x104   : > { %1108 = vst.msk [vmem:[#allocation2 + $0x28] sm:$0xf] %vm1099_vm2, %v6919_v7  ;;  %v619_v20 = vpop.f32.mrb[15].mxu0  ;;  %v709_v25 = vmax.f32 %v625_v14, 0.0  ;;  %v707_v26 = vmax.f32 %v617_v15, 0.0  ;;  %7781 = vmatprep.mubr.msk.bf16.mxu1 %vm481_vm1, %v8456_v17 }
 0x105   : > { %v774_v24 = vrot.slane %v772_v12, 7  ;;  %v620_v27 = vadd.f32 %v8734_v45, %v619_v20  ;;  %v1363_v28 = vld [vmem:[#allocation2 + $0xc] sm:$0xf]  ;;  %v784_v29 = vor.u32 %v782_v9, %v781_v18  ;;  %v911_v30 = vsel %vm8741_vm9, %v781_v18, 0  ;;  %7782 = vmatmul.mubr.msk.bf16.vlgmr.msra.gmra.mrb[0].mxu1 %vm481_vm1, %v8457_v11  ;;  %v1395_v20 = vld [vmem:[#allocation2 + $0x14] sm:$0x1] }
 0x106   : > { %v710_v31 = vmax.f32 %v628_v19, 0.0  ;;  %v1438_v32 = vshrl.u32 %v1363_v28, 16  ;;  %v6929_v33 = vcombine.low %v911_v30, %v911_v30  ;;  %7814 = vmatpush3.bf16.msra.mxu1 %v8769_v40  ;;  %v8822_v40 = vld [vmem:[#allocation2 + $0x10] sm:$0xf]  ;;  %v1441_v3 = vshll.u32 %v1363_v28, 16 }
 0x107   : > { %v777_v35 = vor.u32 %v775_v13, %v774_v24  ;;  %v910_v36 = vsel %vm8741_vm9, %v774_v24, 0  ;;  %v708_v37 = vmax.f32 %v620_v27, 0.0  ;;  %v895_v39 = vsel %vm8741_vm9, 0, %v784_v29  ;;  %8409 = vmatprep.subr.msk.bf16.mxu1 %vm530_vm0, %v8761_v34  ;;  %v1365_v29 = vld [vmem:[#allocation2 + $0x18] sm:$0xf] }
 0x108   : > { %v6926_v41 = vcombine.low %v910_v36, %v910_v36  ;;  %v734_v42 = vpack.c.bf16 %v710_v31, %v709_v25  ;;  %v8815_v43 = vrot.slane %v1438_v32, 4  ;;  %v6927_v46 = vcombine.low %v895_v39, %v895_v39  ;;  %1118 = vst.msk [vmem:[#allocation2 + $0x50] sm:$0x1] %vm1102_vm3, %v6929_v33  ;;  %v7663_v50 = vpop.f32.mrb[16].mxu0  ;;  %v8846_v30 = vld [vmem:[#allocation2 + $0x1c] sm:$0xf] }
 0x109   : > { %v6928_v47 = vcombine.high %v895_v39, %v895_v39  ;;  %v894_v48 = vsel %vm8741_vm9, 0, %v777_v35  ;;  %v733_v49 = vpack.c.bf16 %v708_v37, %v707_v26  ;;  %v632_v55 = vpop.f32.mrb[17].mxu0  ;;  %v8459_v56 = vld [vmem:[#allocation2 + $0x30] sm:$0xff]   ;;  %v641_v58 = vadd.f32 %v7663_v50, %v8734_v45 }
 0x10a   : > { %v6924_v44 = vcombine.low %v894_v48, %v894_v48  ;;  %v6925_v52 = vcombine.high %v894_v48, %v894_v48  ;;  %1115 = vst.msk [vmem:[#allocation2 + $0x44] sm:$0x1] %vm1102_vm3, %v6926_v41  ;;  %v793_v53 = vshrl.u32 %v734_v42, 16  ;;  %v796_v54 = vshll.u32 %v734_v42, 16  ;;  %v7664_v60 = vpop.f32.mrb[18].mxu0 }
 0x10b   : > { %1116 = vst.msk [vmem:[#allocation2 + $0x48] sm:$0xf] %vm1099_vm2, %v6927_v46  ;;  %1117 = vst.msk [vmem:[#allocation2 + $0x4c] sm:$0xf] %vm1099_vm2, %v6928_v47  ;;  %v786_v34 = vshrl.u32 %v733_v49, 16  ;;  %v789_v57 = vshll.u32 %v733_v49, 16  ;;  %v633_v59 = vadd.f32 %v8734_v45, %v632_v55  ;;  %v644_v1 = vadd.f32 %v7664_v60, %v8734_v45 }
 0x10c   : > { %v8458_v61 = vld [vmem:[#allocation2 + $0x24] sm:$0xff]   ;;  %1113 = vst.msk [vmem:[#allocation2 + $0x3c] sm:$0xf] %vm1099_vm2, %v6924_v44  ;;  %1114 = vst.msk [vmem:[#allocation2 + $0x40] sm:$0xf] %vm1099_vm2, %v6925_v52  ;;  %v795_v62 = vrot.slane %v793_v53, 7 }
 0x10d   : > { %v635_v2 = vpop.f32.mrb[19].mxu0  ;;  %v1447_v4 = vshll.u32 %v8822_v40, 16  ;;  %v788_v5 = vrot.slane %v786_v34, 7  ;;  %v713_v6 = vmax.f32 %v641_v58, 0.0  ;;  %v711_v7 = vmax.f32 %v633_v59, 0.0  ;;  %7785 = vmatprep.mubr.msk.bf16.mxu1 %vm481_vm1, %v8458_v61 }
 0x10e   : > { %v636_v8 = vadd.f32 %v8734_v45, %v635_v2  ;;  %v798_v9 = vor.u32 %v796_v54, %v795_v62  ;;  %v913_v10 = vsel %vm8741_vm9, %v795_v62, 0  ;;  %v714_v11 = vmax.f32 %v644_v1, 0.0  ;;  %7786 = vmatmul.mubr.msk.bf16.gmra.mrb[4].mxu1 %vm481_vm1, %v8459_v56 }
 0x10f   : > { %v1443_v12 = vrot.slane %v1441_v3, 5  ;;  %v6935_v13 = vcombine.low %v913_v10, %v913_v10  ;;  %v791_v14 = vor.u32 %v789_v57, %v788_v5  ;;  %v912_v15 = vsel %vm8741_vm9, %v788_v5, 0  ;;  %v1396_v5 = vld [vmem:[#allocation2 + $0x20] sm:$0x1] }
 0x110   : > { %v712_v16 = vmax.f32 %v636_v8, 0.0  ;;  %v897_v17 = vsel %vm8741_vm9, 0, %v798_v9  ;;  %v6932_v18 = vcombine.low %v912_v15, %v912_v15  ;;  %v736_v19 = vpack.c.bf16 %v714_v11, %v713_v6  ;;  %v7667_v31 = vpop.f32.mrb[20].mxu0 }
 0x111   : > { %v1444_v24 = vor.u32 %v1443_v12, %v8815_v43  ;;  %v6933_v25 = vcombine.low %v897_v17, %v897_v17  ;;  %v6934_v26 = vcombine.high %v897_v17, %v897_v17  ;;  %1124 = vst.msk [vmem:[#allocation2 + $0x68] sm:$0x1] %vm1102_vm3, %v6935_v13  ;;  %v896_v27 = vsel %vm8741_vm9, 0, %v791_v14  ;;  %v648_v37 = vpop.f32.mrb[21].mxu0  ;;  %v1368_v17 = vld [vmem:[#allocation2 + $0x28] sm:$0xf] }
 0x112   : > { %v735_v28 = vpack.c.bf16 %v712_v16, %v711_v7  ;;  %v6930_v32 = vcombine.low %v896_v27, %v896_v27  ;;  %v6931_v33 = vcombine.high %v896_v27, %v896_v27  ;;  %1121 = vst.msk [vmem:[#allocation2 + $0x5c] sm:$0x1] %vm1102_vm3, %v6932_v18  ;;  %v807_v35 = vshrl.u32 %v736_v19, 16  ;;  %v7668_v46 = vpop.f32.mrb[22].mxu0  ;;  %v8461_v53 = vld [vmem:[#allocation2 + $0x48] sm:$0xff]  }
 0x113   : > { %v810_v36 = vshll.u32 %v736_v19, 16  ;;  %1122 = vst.msk [vmem:[#allocation2 + $0x60] sm:$0xf] %vm1099_vm2, %v6933_v25  ;;  %1123 = vst.msk [vmem:[#allocation2 + $0x64] sm:$0xf] %vm1099_vm2, %v6934_v26  ;;  %v1445_v42 = vrot.slane %v1444_v24, 4  ;;  %v657_v24 = vadd.f32 %v7667_v31, %v8734_v45  ;;  %v649_v25 = vadd.f32 %v8734_v45, %v648_v37 }
 0x114   : > { %v800_v39 = vshrl.u32 %v735_v28, 16  ;;  %v803_v41 = vshll.u32 %v735_v28, 16  ;;  %v1449_v43 = vrot.slane %v1447_v4, 5  ;;  %v8460_v47 = vld [vmem:[#allocation2 + $0x3c] sm:$0xff]   ;;  %1119 = vst.msk [vmem:[#allocation2 + $0x54] sm:$0xf] %vm1099_vm2, %v6930_v32  ;;  %v660_v32 = vadd.f32 %v7668_v46, %v8734_v45 }
 0x115   : > { %1120 = vst.msk [vmem:[#allocation2 + $0x58] sm:$0xf] %vm1099_vm2, %v6931_v33  ;;  %v809_v48 = vrot.slane %v807_v35, 7  ;;  %v1451_v49 = vshrl.u32 %v8822_v40, 16  ;;  %v1457_v50 = vshll.u32 %v1395_v20, 16  ;;  %v1462_v44 = vshrl.u32 %v1365_v29, 16  ;;  %7789 = vmatprep.mubr.msk.bf16.mxu1 %vm481_vm1, %v8460_v47 }
 0x116   : > { %v651_v52 = vpop.f32.mrb[23].mxu0  ;;  %v802_v54 = vrot.slane %v800_v39, 7  ;;  %v1450_v55 = vsel %vm8713_vm6, %v1445_v42, %v1449_v43  ;;  %v1465_v56 = vshll.u32 %v1365_v29, 16  ;;  %v1471_v34 = vshll.u32 %v8846_v30, 16  ;;  %7790 = vmatmul.mubr.msk.bf16.gmra.mrb[8].mxu1 %vm481_vm1, %v8461_v53  ;;  %v1367_v16 = vld [vmem:[#allocation2 + $0x24] sm:$0xf] }
 0x117   : > { %v812_v57 = vor.u32 %v810_v36, %v809_v48  ;;  %v915_v58 = vsel %vm8741_vm9, %v809_v48, 0  ;;  %v1453_v59 = vrot.slane %v1451_v49, 4  ;;  %v1459_v60 = vrot.slane %v1457_v50, 5 }
 0x118   : > { %v6941_v40 = vcombine.low %v915_v58, %v915_v58  ;;  %v805_v61 = vor.u32 %v803_v41, %v802_v54  ;;  %v914_v62 = vsel %vm8741_vm9, %v802_v54, 0  ;;  %v1464_v1 = vrot.slane %v1462_v44, 4  ;;  %v8870_v11 = vpop.f32.mrb[24].mxu0  ;;  %v1397_v41 = vld [vmem:[#allocation2 + $0x2c] sm:$0x1] }
 0x119   : > { %v899_v2 = vsel %vm8741_vm9, 0, %v812_v57  ;;  %v6938_v3 = vcombine.low %v914_v62, %v914_v62  ;;  %v1454_v4 = vor.u32 %v1453_v59, %v1449_v43  ;;  %v1467_v6 = vrot.slane %v1465_v56, 5  ;;  %v8873_v18 = vpop.f32.mrb[25].mxu0  ;;  %v1369_v56 = vld [vmem:[#allocation2 + $0x30] sm:$0xf] }
 0x11a   : > { %v6939_v7 = vcombine.low %v899_v2, %v899_v2  ;;  %v6940_v8 = vcombine.high %v899_v2, %v899_v2  ;;  %1130 = vst.msk [vmem:[#allocation2 + $0x80] sm:$0x1] %vm1102_vm3, %v6941_v40  ;;  %v898_v9 = vsel %vm8741_vm9, 0, %v805_v61  ;;  %v8868_v10 = vrot.slane %v1471_v34, 5  ;;  %v8880_v26 = vpop.f32.mrb[26].mxu0  ;;  %v8463_v31 = vld [vmem:[#allocation2 + $0x60] sm:$0xff]  }
 0x11b   : > { %v6936_v12 = vcombine.low %v898_v9, %v898_v9  ;;  %v6937_v13 = vcombine.high %v898_v9, %v898_v9  ;;  %1127 = vst.msk [vmem:[#allocation2 + $0x74] sm:$0x1] %vm1102_vm3, %v6938_v3  ;;  %v1455_v14 = vrot.slane %v1454_v4, 4  ;;  %v1468_v15 = vor.u32 %v1467_v6, %v1464_v1  ;;  %v8888_v33 = vpop.f32.mrb[27].mxu0  ;;  %v8897_v34 = vld [vmem:[#allocation2 + $0x34] sm:$0xf] }
 0x11c   : > { %1128 = vst.msk [vmem:[#allocation2 + $0x78] sm:$0xf] %vm1099_vm2, %v6939_v7  ;;  %1129 = vst.msk [vmem:[#allocation2 + $0x7c] sm:$0xf] %vm1099_vm2, %v6940_v8  ;;  %v1475_v19 = vshrl.u32 %v8846_v30, 16  ;;  %v1481_v20 = vshll.u32 %v1396_v5, 16  ;;  %v652_v30 = vadd.f32 %v8734_v45, %v651_v52 }
 0x11d   : > { %v8462_v27 = vld [vmem:[#allocation2 + $0x54] sm:$0xff]   ;;  %1125 = vst.msk [vmem:[#allocation2 + $0x6c] sm:$0xf] %vm1099_vm2, %v6936_v12  ;;  %1126 = vst.msk [vmem:[#allocation2 + $0x70] sm:$0xf] %vm1099_vm2, %v6937_v13  ;;  %v1460_v28 = vsel %vm8713_vm6, %v1455_v14, %v1459_v60  ;;  %v1469_v29 = vrot.slane %v1468_v15, 4 }
 0x11e   : > { %v6978_v35 = vcombine.low %v1450_v55, %v1460_v28  ;;  %v1477_v36 = vrot.slane %v1475_v19, 4  ;;  %v1483_v37 = vrot.slane %v1481_v20, 5  ;;  %v717_v39 = vmax.f32 %v657_v24, 0.0  ;;  %7793 = vmatprep.mubr.msk.bf16.mxu1 %vm481_vm1, %v8462_v27 }
 0x11f   : > { %v1474_v42 = vsel %vm8713_vm6, %v1469_v29, %v8868_v10  ;;  %v715_v43 = vmax.f32 %v649_v25, 0.0  ;;  %v718_v47 = vmax.f32 %v660_v32, 0.0  ;;  %v716_v48 = vmax.f32 %v652_v30, 0.0  ;;  %7794 = vmatmul.mubr.msk.bf16.gmra.mrb[12].mxu1 %vm481_vm1, %v8463_v31 }
 0x120   : > { %7680 = vmatmul.mubr.msk.bf16.vlgmr.msra.gmra.mrb[32].mxu0 %vm481_vm1, %v6978_v35  ;;  %v1478_v46 = vor.u32 %v1477_v36, %v8868_v10  ;;  %v1486_v49 = vshrl.u32 %v1367_v16, 16  ;;  %v1489_v50 = vshll.u32 %v1367_v16, 16  ;;  %v1495_v44 = vshll.u32 %v1368_v17, 16  ;;  %v8900_v40 = vpop.f32.mrb[28].mxu0 }
 0x121   : > { %v738_v52 = vpack.c.bf16 %v718_v47, %v717_v39  ;;  %v737_v53 = vpack.c.bf16 %v716_v48, %v715_v43  ;;  %v1499_v54 = vshrl.u32 %v1368_v17, 16  ;;  %v1505_v55 = vshll.u32 %v1397_v41, 16  ;;  %7712 = vmatpush3.bf16.msra.mxu0 %v8790_v63  ;;  %v8902_v3 = vpop.f32.mrb[29].mxu0 }
 0x122   : > { %v1479_v57 = vrot.slane %v1478_v46, 4  ;;  %v1488_v58 = vrot.slane %v1486_v49, 4  ;;  %v1491_v59 = vrot.slane %v1489_v50, 5  ;;  %v1497_v60 = vrot.slane %v1495_v44, 5  ;;  %v8906_v63 = vpop.f32.mrb[30].mxu0 }
 0x123   : > { %v821_v61 = vshrl.u32 %v738_v52, 16  ;;  %v824_v62 = vshll.u32 %v738_v52, 16  ;;  %v814_v1 = vshrl.u32 %v737_v53, 16  ;;  %v817_v2 = vshll.u32 %v737_v53, 16  ;;  %v8465_v4 = vld [vmem:[#allocation2 + $0x78] sm:$0xff]   ;;  %v8908_v15 = vpop.f32.mrb[31].mxu0 }
 0x124   : > { %v1484_v5 = vsel %vm8713_vm6, %v1479_v57, %v1483_v37  ;;  %v1492_v6 = vor.u32 %v1491_v59, %v1488_v58  ;;  %v1501_v7 = vrot.slane %v1499_v54, 4  ;;  %v1507_v8 = vrot.slane %v1505_v55, 5  ;;  %v8464_v9 = vld [vmem:[#allocation2 + $0x6c] sm:$0xff]   ;;  %v1398_v37 = vld [vmem:[#allocation2 + $0x38] sm:$0x1] }
 0x125   : > { %v6979_v10 = vcombine.low %v1474_v42, %v1484_v5  ;;  %v823_v12 = vrot.slane %v821_v61, 7  ;;  %v816_v13 = vrot.slane %v814_v1, 7  ;;  %v1510_v14 = vshrl.u32 %v1369_v56, 16  ;;  %7797 = vmatprep.mubr.msk.bf16.mxu1 %vm481_vm1, %v8464_v9  ;;  %v1371_v52 = vld [vmem:[#allocation2 + $0x3c] sm:$0xf] }
 0x126   : > { %v1493_v16 = vrot.slane %v1492_v6, 4  ;;  %v1502_v17 = vor.u32 %v1501_v7, %v1497_v60  ;;  %v1513_v19 = vshll.u32 %v1369_v56, 16  ;;  %v1519_v20 = vshll.u32 %v8897_v34, 16  ;;  %v1373_v7 = vld [vmem:[#allocation2 + $0x48] sm:$0xf] }
 0x127   : > { %7683 = vmatprep.mubr.msk.bf16.mxu0 %vm481_vm1, %v6979_v10  ;;  %v826_v24 = vor.u32 %v824_v62, %v823_v12  ;;  %v917_v25 = vsel %vm8741_vm9, %v823_v12, 0  ;;  %v819_v27 = vor.u32 %v817_v2, %v816_v13  ;;  %v916_v28 = vsel %vm8741_vm9, %v816_v13, 0  ;;  %7798 = vmatmul.mubr.msk.bf16.gmra.mrb[16].mxu1 %vm481_vm1, %v8465_v4  ;;  %v1399_v2 = vld [vmem:[#allocation2 + $0x44] sm:$0x1] }
 0x128   : > { %v6947_v29 = vcombine.low %v917_v25, %v917_v25  ;;  %v6944_v32 = vcombine.low %v916_v28, %v916_v28  ;;  %v1498_v30 = vsel %vm8713_vm6, %v1493_v16, %v1497_v60  ;;  %v1503_v31 = vrot.slane %v1502_v17, 4  ;;  %v8941_v60 = vld [vmem:[#allocation2 + $0x40] sm:$0xf] }
 0x129   : > { %v901_v35 = vsel %vm8741_vm9, 0, %v826_v24  ;;  %v900_v36 = vsel %vm8741_vm9, 0, %v819_v27  ;;  %v1512_v39 = vrot.slane %v1510_v14, 4  ;;  %v1515_v41 = vrot.slane %v1513_v19, 5 }
 0x12a   : > { %v6945_v42 = vcombine.low %v901_v35, %v901_v35  ;;  %v6946_v43 = vcombine.high %v901_v35, %v901_v35  ;;  %1136 = vst.msk [vmem:[#allocation2 + $0x98] sm:$0x1] %vm1102_vm3, %v6947_v29  ;;  %v6942_v47 = vcombine.low %v900_v36, %v900_v36  ;;  %v6943_v48 = vcombine.high %v900_v36, %v900_v36 }
 0x12b   : > { %1133 = vst.msk [vmem:[#allocation2 + $0x8c] sm:$0x1] %vm1102_vm3, %v6944_v32  ;;  %v1508_v46 = vsel %vm8713_vm6, %v1503_v31, %v1507_v8  ;;  %v1516_v49 = vor.u32 %v1515_v41, %v1512_v39  ;;  %v1521_v50 = vrot.slane %v1519_v20, 5  ;;  %v1523_v44 = vshrl.u32 %v8897_v34, 16  ;;  %v8948_v20 = vld [vmem:[#allocation2 + $0x4c] sm:$0xf] }
 0x12c   : > { %1134 = vst.msk [vmem:[#allocation2 + $0x90] sm:$0xf] %vm1099_vm2, %v6945_v42  ;;  %1135 = vst.msk [vmem:[#allocation2 + $0x94] sm:$0xf] %vm1099_vm2, %v6946_v43  ;;  %v6980_v53 = vcombine.low %v1498_v30, %v1508_v46  ;;  %v1529_v54 = vshll.u32 %v1398_v37, 16  ;;  %v673_v55 = vadd.f32 %v8870_v11, %v8734_v45  ;;  %v665_v56 = vadd.f32 %v8734_v45, %v8873_v18 }
 0x12d   : > { %1131 = vst.msk [vmem:[#allocation2 + $0x84] sm:$0xf] %vm1099_vm2, %v6942_v47  ;;  %1132 = vst.msk [vmem:[#allocation2 + $0x88] sm:$0xf] %vm1099_vm2, %v6943_v48  ;;  %v1517_v57 = vrot.slane %v1516_v49, 4  ;;  %v1525_v58 = vrot.slane %v1523_v44, 4  ;;  %v676_v34 = vadd.f32 %v8880_v26, %v8734_v45  ;;  %v668_v59 = vadd.f32 %v8734_v45, %v8888_v33 }
 0x12e   : > { %7684 = vmatmul.mubr.msk.bf16.gmra.mrb[36].mxu0 %vm481_vm1, %v6980_v53  ;;  %v1531_v61 = vrot.slane %v1529_v54, 5  ;;  %v721_v62 = vmax.f32 %v673_v55, 0.0  ;;  %v719_v1 = vmax.f32 %v665_v56, 0.0  ;;  %v1534_v11 = vshrl.u32 %v1371_v52, 16 }
 0x12f   : > { %v1522_v18 = vsel %vm8713_vm6, %v1517_v57, %v1521_v50  ;;  %v1526_v4 = vor.u32 %v1525_v58, %v1521_v50  ;;  %v722_v5 = vmax.f32 %v676_v34, 0.0  ;;  %v720_v6 = vmax.f32 %v668_v59, 0.0  ;;  %v1400_v58 = vld [vmem:[#allocation2 + $0x50] sm:$0x1] }
 0x130   : > { %v1536_v26 = vrot.slane %v1534_v11, 4  ;;  %v1537_v8 = vshll.u32 %v1371_v52, 16  ;;  %v1543_v33 = vshll.u32 %v8941_v60, 16  ;;  %v1547_v9 = vshrl.u32 %v8941_v60, 16 }
 0x131   : > { %v1527_v10 = vrot.slane %v1526_v4, 4  ;;  %v740_v12 = vpack.c.bf16 %v722_v5, %v721_v62  ;;  %v739_v13 = vpack.c.bf16 %v720_v6, %v719_v1  ;;  %v1553_v14 = vshll.u32 %v1399_v2, 16  ;;  %v8970_v4 = vld [vmem:[#allocation2 + $0x54] sm:$0xf] }
 0x132   : > { %v1539_v16 = vrot.slane %v1537_v8, 5  ;;  %v1545_v17 = vrot.slane %v1543_v33, 5  ;;  %v1549_v19 = vrot.slane %v1547_v9, 4  ;;  %v1558_v24 = vshrl.u32 %v1373_v7, 16 }
 0x133   : > { %v1532_v25 = vsel %vm8713_vm6, %v1527_v10, %v1531_v61  ;;  %v835_v27 = vshrl.u32 %v740_v12, 16  ;;  %v838_v28 = vshll.u32 %v740_v12, 16  ;;  %v828_v29 = vshrl.u32 %v739_v13, 16  ;;  %v8467_v37 = vld [vmem:[#allocation2 + $0x90] sm:$0xff]   ;;  %v8986_v12 = vld [vmem:[#allocation2 + $0x58] sm:$0xf] }
 0x134   : > { %v8466_v32 = vld [vmem:[#allocation2 + $0x84] sm:$0xff]   ;;  %v6981_v30 = vcombine.low %v1522_v18, %v1532_v25  ;;  %v831_v31 = vshll.u32 %v739_v13, 16  ;;  %v1540_v35 = vor.u32 %v1539_v16, %v1536_v26  ;;  %v1550_v36 = vor.u32 %v1549_v19, %v1545_v17 }
 0x135   : > { %v837_v39 = vrot.slane %v835_v27, 7  ;;  %v830_v41 = vrot.slane %v828_v29, 7  ;;  %v1555_v42 = vrot.slane %v1553_v14, 5  ;;  %v1560_v43 = vrot.slane %v1558_v24, 4  ;;  %7801 = vmatprep.mubr.msk.bf16.mxu1 %vm481_vm1, %v8466_v32 }
 0x136   : > { %7687 = vmatprep.mubr.msk.bf16.mxu0 %vm481_vm1, %v6981_v30  ;;  %v1541_v47 = vrot.slane %v1540_v35, 4  ;;  %v1551_v48 = vrot.slane %v1550_v36, 4  ;;  %v1561_v46 = vshll.u32 %v1373_v7, 16  ;;  %v1567_v49 = vshll.u32 %v8948_v20, 16  ;;  %7802 = vmatmul.mubr.msk.bf16.gmra.mrb[20].mxu1 %vm481_vm1, %v8467_v37 }
 0x137   : > { %v840_v50 = vor.u32 %v838_v28, %v837_v39  ;;  %v919_v44 = vsel %vm8741_vm9, %v837_v39, 0  ;;  %v833_v52 = vor.u32 %v831_v31, %v830_v41  ;;  %v918_v53 = vsel %vm8741_vm9, %v830_v41, 0  ;;  %v8989_v28 = vld [vmem:[#allocation2 + $0x60] sm:$0xf] }
 0x138   : > { %v6953_v54 = vcombine.low %v919_v44, %v919_v44  ;;  %v6950_v55 = vcombine.low %v918_v53, %v918_v53  ;;  %v1546_v56 = vsel %vm8713_vm6, %v1541_v47, %v1545_v17  ;;  %v1556_v57 = vsel %vm8713_vm6, %v1551_v48, %v1555_v42  ;;  %v1401_v17 = vld [vmem:[#allocation2 + $0x5c] sm:$0x1]  ;;  %v8999_v44 = vld [vmem:[#allocation2 + $0x64] sm:$0xf] }
 0x139   : > { %v903_v34 = vsel %vm8741_vm9, 0, %v840_v50  ;;  %v902_v59 = vsel %vm8741_vm9, 0, %v833_v52  ;;  %v6982_v61 = vcombine.low %v1546_v56, %v1556_v57  ;;  %v1563_v62 = vrot.slane %v1561_v46, 5 }
 0x13a   : > { %v6951_v1 = vcombine.low %v903_v34, %v903_v34  ;;  %v6952_v2 = vcombine.high %v903_v34, %v903_v34  ;;  %1142 = vst.msk [vmem:[#allocation2 + $0xb0] sm:$0x1] %vm1102_vm3, %v6953_v54  ;;  %v6948_v11 = vcombine.low %v902_v59, %v902_v59  ;;  %v6949_v18 = vcombine.high %v902_v59, %v902_v59 }
 0x13b   : > { %1139 = vst.msk [vmem:[#allocation2 + $0xa4] sm:$0x1] %vm1102_vm3, %v6950_v55  ;;  %7688 = vmatmul.mubr.msk.bf16.gmra.mrb[40].mxu0 %vm481_vm1, %v6982_v61  ;;  %v1564_v5 = vor.u32 %v1563_v62, %v1560_v43  ;;  %v1569_v6 = vrot.slane %v1567_v49, 5  ;;  %v1571_v7 = vshrl.u32 %v8948_v20, 16  ;;  %v1577_v26 = vshll.u32 %v1400_v58, 16 }
 0x13c   : > { %1140 = vst.msk [vmem:[#allocation2 + $0xa8] sm:$0xf] %vm1099_vm2, %v6951_v1  ;;  %1141 = vst.msk [vmem:[#allocation2 + $0xac] sm:$0xf] %vm1099_vm2, %v6952_v2  ;;  %v689_v8 = vadd.f32 %v8900_v40, %v8734_v45  ;;  %v681_v33 = vadd.f32 %v8734_v45, %v8902_v3  ;;  %v692_v9 = vadd.f32 %v8906_v63, %v8734_v45  ;;  %v1582_v19 = vshrl.u32 %v8970_v4, 16 }
 0x13d   : > { %1137 = vst.msk [vmem:[#allocation2 + $0x9c] sm:$0xf] %vm1099_vm2, %v6948_v11  ;;  %1138 = vst.msk [vmem:[#allocation2 + $0xa0] sm:$0xf] %vm1099_vm2, %v6949_v18  ;;  %v684_v10 = vadd.f32 %v8734_v45, %v8908_v15  ;;  %v1565_v13 = vrot.slane %v1564_v5, 4  ;;  %v1573_v14 = vrot.slane %v1571_v7, 4 }
 0x13e   : > { %v1579_v16 = vrot.slane %v1577_v26, 5  ;;  %v725_v24 = vmax.f32 %v689_v8, 0.0  ;;  %v723_v25 = vmax.f32 %v681_v33, 0.0  ;;  %v726_v40 = vmax.f32 %v692_v9, 0.0  ;;  %v1402_v26 = vld [vmem:[#allocation2 + $0x68] sm:$0x1] }
 0x13f   : > { %v724_v27 = vmax.f32 %v684_v10, 0.0  ;;  %v1570_v3 = vsel %vm8713_vm6, %v1565_v13, %v1569_v6  ;;  %v1574_v63 = vor.u32 %v1573_v14, %v1569_v6  ;;  %v1584_v29 = vrot.slane %v1582_v19, 4  ;;  %v9016_v13 = vld [vmem:[#allocation2 + $0x6c] sm:$0xf] }
 0x140   : > { %v1585_v45 = vshll.u32 %v8970_v4, 16  ;;  %v742_v15 = vpack.c.bf16 %v726_v40, %v725_v24  ;;  %v1591_v30 = vshll.u32 %v8986_v12, 16  ;;  %v1595_v31 = vshrl.u32 %v8986_v12, 16  ;;  %v9020_v24 = vld [vmem:[#allocation2 + $0x70] sm:$0xf] }
 0x141   : > { %v741_v32 = vpack.c.bf16 %v724_v27, %v723_v25  ;;  %v1575_v35 = vrot.slane %v1574_v63, 4  ;;  %v1601_v37 = vshll.u32 %v1401_v17, 16  ;;  %v1606_v39 = vshrl.u32 %v8989_v28, 16 }
 0x142   : > { %v1587_v36 = vrot.slane %v1585_v45, 5  ;;  %v849_v41 = vshrl.u32 %v742_v15, 16  ;;  %v852_v42 = vshll.u32 %v742_v15, 16  ;;  %v1593_v49 = vrot.slane %v1591_v30, 5 }
 0x143   : > { %v842_v43 = vshrl.u32 %v741_v32, 16  ;;  %v845_v47 = vshll.u32 %v741_v32, 16  ;;  %v1580_v48 = vsel %vm8713_vm6, %v1575_v35, %v1579_v16  ;;  %v1597_v50 = vrot.slane %v1595_v31, 4  ;;  %v8469_v61 = vld [vmem:[#allocation2 + $0xa8] sm:$0xff]  }
 0x144   : > { %v1588_v46 = vor.u32 %v1587_v36, %v1584_v29  ;;  %v6983_v52 = vcombine.low %v1570_v3, %v1580_v48  ;;  %v851_v53 = vrot.slane %v849_v41, 7  ;;  %v1603_v55 = vrot.slane %v1601_v37, 5  ;;  %v8468_v56 = vld [vmem:[#allocation2 + $0x9c] sm:$0xff]   ;;  %v1403_v3 = vld [vmem:[#allocation2 + $0x74] sm:$0x1] }
 0x145   : > { %v844_v54 = vrot.slane %v842_v43, 7  ;;  %v1598_v58 = vor.u32 %v1597_v50, %v1593_v49  ;;  %v1608_v34 = vrot.slane %v1606_v39, 4  ;;  %v1609_v59 = vshll.u32 %v8989_v28, 16  ;;  %7805 = vmatprep.mubr.msk.bf16.mxu1 %vm481_vm1, %v8468_v56  ;;  %v9033_v36 = vld [vmem:[#allocation2 + $0x78] sm:$0xf] }
 0x146   : > { %v1589_v57 = vrot.slane %v1588_v46, 4  ;;  %7691 = vmatprep.mubr.msk.bf16.mxu0 %vm481_vm1, %v6983_v52  ;;  %v854_v62 = vor.u32 %v852_v42, %v851_v53  ;;  %v921_v1 = vsel %vm8741_vm9, %v851_v53, 0  ;;  %7806 = vmatmul.mubr.msk.bf16.gmra.mrb[24].mxu1 %vm481_vm1, %v8469_v61  ;;  %v1615_v10 = vshll.u32 %v8999_v44, 16  ;;  %v9036_v43 = vld [vmem:[#allocation2 + $0x7c] sm:$0xf] }
 0x147   : > { %v847_v2 = vor.u32 %v845_v47, %v844_v54  ;;  %v920_v11 = vsel %vm8741_vm9, %v844_v54, 0  ;;  %v6959_v18 = vcombine.low %v921_v1, %v921_v1  ;;  %v1599_v7 = vrot.slane %v1598_v58, 4  ;;  %v1404_v50 = vld [vmem:[#allocation2 + $0x80] sm:$0x1] }
 0x148   : > { %v6956_v5 = vcombine.low %v920_v11, %v920_v11  ;;  %v1594_v6 = vsel %vm8713_vm6, %v1589_v57, %v1593_v49  ;;  %v905_v8 = vsel %vm8741_vm9, 0, %v854_v62  ;;  %v1611_v9 = vrot.slane %v1609_v59, 5  ;;  %v9044_v59 = vld [vmem:[#allocation2 + $0x84] sm:$0xf]  ;;  %v9046_v11 = vld [vmem:[#allocation2 + $0x88] sm:$0xf] }
 0x149   : > { %v904_v33 = vsel %vm8741_vm9, 0, %v847_v2  ;;  %v6957_v14 = vcombine.low %v905_v8, %v905_v8  ;;  %v6958_v16 = vcombine.high %v905_v8, %v905_v8  ;;  %1148 = vst.msk [vmem:[#allocation2 + $0xc8] sm:$0x1] %vm1102_vm3, %v6959_v18  ;;  %v1604_v25 = vsel %vm8713_vm6, %v1599_v7, %v1603_v55  ;;  %v1405_v18 = vld [vmem:[#allocation2 + $0x8c] sm:$0x1] }
 0x14a   : > { %v6954_v17 = vcombine.low %v904_v33, %v904_v33  ;;  %v6955_v19 = vcombine.high %v904_v33, %v904_v33  ;;  %1145 = vst.msk [vmem:[#allocation2 + $0xbc] sm:$0x1] %vm1102_vm3, %v6956_v5  ;;  %v1612_v0 = vor.u32 %v1611_v9, %v1608_v34  ;;  %v1617_v40 = vrot.slane %v1615_v10, 5 }
 0x14b   : > { %v1619_v27 = vshrl.u32 %v8999_v44, 16  ;;  %1146 = vst.msk [vmem:[#allocation2 + $0xc0] sm:$0xf] %vm1099_vm2, %v6957_v14  ;;  %1147 = vst.msk [vmem:[#allocation2 + $0xc4] sm:$0xf] %vm1099_vm2, %v6958_v16  ;;  %v6984_v63 = vcombine.low %v1594_v6, %v1604_v25  ;;  %v1625_v29 = vshll.u32 %v1402_v26, 16 }
 0x14c   : > { %1143 = vst.msk [vmem:[#allocation2 + $0xb4] sm:$0xf] %vm1099_vm2, %v6954_v17  ;;  %1144 = vst.msk [vmem:[#allocation2 + $0xb8] sm:$0xf] %vm1099_vm2, %v6955_v19  ;;  %v1630_v45 = vshrl.u32 %v9016_v13, 16  ;;  %v1633_v15 = vshll.u32 %v9016_v13, 16 }
 0x14d   : > { %v1613_v32 = vrot.slane %v1612_v0, 4  ;;  %v1621_v30 = vrot.slane %v1619_v27, 4  ;;  %v1639_v31 = vshll.u32 %v9020_v24, 16  ;;  %v1643_v35 = vshrl.u32 %v9020_v24, 16  ;;  %7692 = vmatmul.mubr.msk.bf16.gmra.mrb[44].mxu0 %vm481_vm1, %v6984_v63 }
 0x14e   : > { %v1627_v37 = vrot.slane %v1625_v29, 5  ;;  %v1632_v39 = vrot.slane %v1630_v45, 4  ;;  %v1635_v41 = vrot.slane %v1633_v15, 5  ;;  %v1649_v42 = vshll.u32 %v1403_v3, 16 }
 0x14f   : > { %v1618_v47 = vsel %vm8713_vm6, %v1613_v32, %v1617_v40  ;;  %v1622_v48 = vor.u32 %v1621_v30, %v1617_v40  ;;  %v1641_v46 = vrot.slane %v1639_v31, 5  ;;  %v1645_v49 = vrot.slane %v1643_v35, 4  ;;  %v9056_v40 = vld [vmem:[#allocation2 + $0x90] sm:$0xf]  ;;  %v9063_v31 = vld [vmem:[#allocation2 + $0x94] sm:$0xf] }
 0x150   : > { %v1636_v52 = vor.u32 %v1635_v41, %v1632_v39  ;;  %v1651_v53 = vrot.slane %v1649_v42, 5  ;;  %v1654_v54 = vshrl.u32 %v9033_v36, 16  ;;  %v1657_v55 = vshll.u32 %v9033_v36, 16  ;;  %v1406_v41 = vld [vmem:[#allocation2 + $0x98] sm:$0x1] }
 0x151   : > { %v1623_v56 = vrot.slane %v1622_v48, 4  ;;  %v1646_v57 = vor.u32 %v1645_v49, %v1641_v46  ;;  %v1663_v58 = vshll.u32 %v9036_v43, 16  ;;  %v1667_v34 = vshrl.u32 %v9036_v43, 16 }
 0x152   : > { %v1637_v61 = vrot.slane %v1636_v52, 4  ;;  %v1656_v62 = vrot.slane %v1654_v54, 4  ;;  %v1659_v1 = vrot.slane %v1657_v55, 5  ;;  %v1673_v2 = vshll.u32 %v1404_v50, 16  ;;  %v8471_v16 = vld [vmem:[#allocation2 + $0xc0] sm:$0xff]  }
 0x153   : > { %v1628_v5 = vsel %vm8713_vm6, %v1623_v56, %v1627_v37  ;;  %v1647_v6 = vrot.slane %v1646_v57, 4  ;;  %v1665_v7 = vrot.slane %v1663_v58, 5  ;;  %v1669_v26 = vrot.slane %v1667_v34, 4  ;;  %v8470_v8 = vld [vmem:[#allocation2 + $0xb4] sm:$0xff]   ;;  %v9072_v50 = vld [vmem:[#allocation2 + $0x9c] sm:$0xf] }
 0x154   : > { %v6985_v33 = vcombine.low %v1618_v47, %v1628_v5  ;;  %v1642_v9 = vsel %vm8713_vm6, %v1637_v61, %v1641_v46  ;;  %v1660_v10 = vor.u32 %v1659_v1, %v1656_v62  ;;  %v1675_v14 = vrot.slane %v1673_v2, 5  ;;  %7809 = vmatprep.mubr.msk.bf16.mxu1 %vm481_vm1, %v8470_v8  ;;  %v9076_v61 = vld [vmem:[#allocation2 + $0xa0] sm:$0xf]  ;;  %v9084_v5 = vld [vmem:[%s10526_s3 + $0x4] sm:$0x3] }
 0x155   : > { %v1652_v17 = vsel %vm8713_vm6, %v1647_v6, %v1651_v53  ;;  %v1670_v19 = vor.u32 %v1669_v26, %v1665_v7  ;;  %v1678_v25 = vshrl.u32 %v9044_v59, 16  ;;  %v1681_v0 = vshll.u32 %v9044_v59, 16  ;;  %7810 = vmatmul.mubr.msk.bf16.gmra.mrb[28].mxu1 %vm481_vm1, %v8471_v16  ;;  %8406 = vmatprep.subr.msk.bf16.mxu0 %vm530_vm0, %v9084_v5 }
 0x156   : > { %7695 = vmatprep.mubr.msk.bf16.mxu0 %vm481_vm1, %v6985_v33  ;;  %v6986_v27 = vcombine.low %v1642_v9, %v1652_v17  ;;  %v1661_v3 = vrot.slane %v1660_v10, 4  ;;  %v1687_v63 = vshll.u32 %v9046_v11, 16  ;;  %v1691_v29 = vshrl.u32 %v9046_v11, 16  ;;  %v1407_v33 = vld [vmem:[#allocation2 + $0xa4] sm:$0x1] }
 0x157   : > { %v1671_v45 = vrot.slane %v1670_v19, 4  ;;  %v1680_v15 = vrot.slane %v1678_v25, 4  ;;  %v1683_v32 = vrot.slane %v1681_v0, 5  ;;  %v1697_v30 = vshll.u32 %v1405_v18, 16  ;;  %v9088_v9 = vld [vmem:[#allocation2 + $0xa8] sm:$0xf] }
 0x158   : > { %7696 = vmatmul.mubr.msk.bf16.gmra.mrb[48].mxu0 %vm481_vm1, %v6986_v27  ;;  %v1666_v35 = vsel %vm8713_vm6, %v1661_v3, %v1665_v7  ;;  %v1689_v37 = vrot.slane %v1687_v63, 5  ;;  %v1693_v39 = vrot.slane %v1691_v29, 4  ;;  %v1702_v42 = vshrl.u32 %v9056_v40, 16  ;;  %v9096_v3 = vld [vmem:[#allocation2 + $0xac] sm:$0xf] }
 0x159   : > { %v1676_v47 = vsel %vm8713_vm6, %v1671_v45, %v1675_v14  ;;  %v1684_v48 = vor.u32 %v1683_v32, %v1680_v15  ;;  %v1699_v46 = vrot.slane %v1697_v30, 5  ;;  %v1705_v49 = vshll.u32 %v9056_v40, 16 }
 0x15a   : > { %v6987_v52 = vcombine.low %v1666_v35, %v1676_v47  ;;  %v1694_v53 = vor.u32 %v1693_v39, %v1689_v37  ;;  %v1704_v54 = vrot.slane %v1702_v42, 4  ;;  %v1711_v55 = vshll.u32 %v9063_v31, 16 }
 0x15b   : > { %v1685_v56 = vrot.slane %v1684_v48, 4  ;;  %v1707_v57 = vrot.slane %v1705_v49, 5  ;;  %v1715_v58 = vshrl.u32 %v9063_v31, 16  ;;  %v1721_v34 = vshll.u32 %v1406_v41, 16 }
 0x15c   : > { %7699 = vmatprep.mubr.msk.bf16.mxu0 %vm481_vm1, %v6987_v52  ;;  %v1695_v62 = vrot.slane %v1694_v53, 4  ;;  %v1713_v1 = vrot.slane %v1711_v55, 5  ;;  %v1726_v2 = vshrl.u32 %v9072_v50, 16  ;;  %v1729_v18 = vshll.u32 %v9072_v50, 16  ;;  %v9107_v55 = vld [vmem:[#allocation2 + $0x10] sm:$0xf] }
 0x15d   : > { %v1690_v6 = vsel %vm8713_vm6, %v1685_v56, %v1689_v37  ;;  %v1708_v7 = vor.u32 %v1707_v57, %v1704_v54  ;;  %v1717_v26 = vrot.slane %v1715_v58, 4  ;;  %v1723_v8 = vrot.slane %v1721_v34, 5  ;;  %v1408_v37 = vld [vmem:[#allocation2 + $0xb0] sm:$0x1] }
 0x15e   : > { %v1700_v10 = vsel %vm8713_vm6, %v1695_v62, %v1699_v46  ;;  %v1728_v14 = vrot.slane %v1726_v2, 4  ;;  %v1731_v16 = vrot.slane %v1729_v18, 5  ;;  %v1735_v17 = vshll.u32 %v9076_v61, 16  ;;  %v3166_v46 = vld [vmem:[#allocation2 + $0xc] sm:$0xf] }
 0x15f   : > { %v6988_v19 = vcombine.low %v1690_v6, %v1700_v10  ;;  %v1709_v25 = vrot.slane %v1708_v7, 4  ;;  %v1718_v0 = vor.u32 %v1717_v26, %v1713_v1  ;;  %v1739_v27 = vshrl.u32 %v9076_v61, 16  ;;  %v9111_v18 = vld [vmem:[#allocation2 + $0x14] sm:$0x1] }
 0x160   : > { %v1732_v63 = vor.u32 %v1731_v16, %v1728_v14  ;;  %v1737_v29 = vrot.slane %v1735_v17, 5  ;;  %v1745_v45 = vshll.u32 %v1407_v33, 16  ;;  %v1750_v15 = vshrl.u32 %v9088_v9, 16  ;;  %v9116_v10 = vld [vmem:[#allocation2 + $0xb4] sm:$0xf] }
 0x161   : > { %7700 = vmatmul.mubr.msk.bf16.gmra.mrb[52].mxu0 %vm481_vm1, %v6988_v19  ;;  %v1714_v32 = vsel %vm8713_vm6, %v1709_v25, %v1713_v1  ;;  %v1719_v30 = vrot.slane %v1718_v0, 4  ;;  %v1741_v35 = vrot.slane %v1739_v27, 4  ;;  %v1753_v39 = vshll.u32 %v9088_v9, 16  ;;  %v9120_v25 = vld [vmem:[#allocation2 + $0xb8] sm:$0xf] }
 0x162   : > { %v1733_v41 = vrot.slane %v1732_v63, 4  ;;  %v1747_v42 = vrot.slane %v1745_v45, 5  ;;  %v1752_v47 = vrot.slane %v1750_v15, 4  ;;  %v1759_v48 = vshll.u32 %v9096_v3, 16 }
 0x163   : > { %v1724_v49 = vsel %vm8713_vm6, %v1719_v30, %v1723_v8  ;;  %v1742_v52 = vor.u32 %v1741_v35, %v1737_v29  ;;  %v1755_v53 = vrot.slane %v1753_v39, 5  ;;  %v1763_v54 = vshrl.u32 %v9096_v3, 16  ;;  %v1409_v39 = vld [vmem:[#allocation2 + $0xbc] sm:$0x1] }
 0x164   : > { %v6989_v56 = vcombine.low %v1714_v32, %v1724_v49  ;;  %v1738_v57 = vsel %vm8713_vm6, %v1733_v41, %v1737_v29  ;;  %v1761_v58 = vrot.slane %v1759_v48, 5  ;;  %v1769_v34 = vshll.u32 %v1408_v37, 16 }
 0x165   : > { %v1743_v62 = vrot.slane %v1742_v52, 4  ;;  %v1756_v1 = vor.u32 %v1755_v53, %v1752_v47  ;;  %v1765_v2 = vrot.slane %v1763_v54, 4  ;;  %v3215_v6 = vshrl.u32 %v3166_v46, 16  ;;  %v3169_v47 = vld [vmem:[#allocation2 + $0x18] sm:$0xf] }
 0x166   : > { %7703 = vmatprep.mubr.msk.bf16.mxu0 %vm481_vm1, %v6989_v56  ;;  %v1771_v7 = vrot.slane %v1769_v34, 5  ;;  %v3218_v26 = vshll.u32 %v3166_v46, 16  ;;  %v3224_v8 = vshll.u32 %v9107_v55, 16  ;;  %v3228_v33 = vshrl.u32 %v9107_v55, 16 }
 0x167   : > { %v1748_v14 = vsel %vm8713_vm6, %v1743_v62, %v1747_v42  ;;  %v1757_v16 = vrot.slane %v1756_v1, 4  ;;  %v1766_v17 = vor.u32 %v1765_v2, %v1761_v58  ;;  %v3217_v19 = vrot.slane %v3215_v6, 4  ;;  %v9134_v2 = vld [vmem:[#allocation2 + $0x1c] sm:$0xf] }
 0x168   : > { %v6990_v0 = vcombine.low %v1738_v57, %v1748_v14  ;;  %v3220_v27 = vrot.slane %v3218_v26, 5  ;;  %v3226_v63 = vrot.slane %v3224_v8, 5  ;;  %v3230_v29 = vrot.slane %v3228_v33, 4  ;;  %v3172_v14 = vld [vmem:[#allocation2 + $0x24] sm:$0xf] }
 0x169   : > { %v1762_v45 = vsel %vm8713_vm6, %v1757_v16, %v1761_v58  ;;  %v1767_v15 = vrot.slane %v1766_v17, 4  ;;  %v3234_v32 = vshll.u32 %v9111_v18, 16  ;;  %v1774_v30 = vshrl.u32 %v9116_v10, 16  ;;  %v9132_v58 = vld [vmem:[#allocation2 + $0x20] sm:$0x1] }
 0x16a   : > { %7704 = vmatmul.mubr.msk.bf16.gmra.mrb[56].mxu0 %vm481_vm1, %v6990_v0  ;;  %v3221_v35 = vor.u32 %v3220_v27, %v3217_v19  ;;  %v3231_v37 = vor.u32 %v3230_v29, %v3226_v63  ;;  %v1777_v41 = vshll.u32 %v9116_v10, 16  ;;  %v1783_v42 = vshll.u32 %v9120_v25, 16  ;;  %v9141_v27 = vld [vmem:[#allocation2 + $0x28] sm:$0xf] }
 0x16b   : > { %v1772_v48 = vsel %vm8713_vm6, %v1767_v15, %v1771_v7  ;;  %v3236_v46 = vrot.slane %v3234_v32, 5  ;;  %v1776_v49 = vrot.slane %v1774_v30, 4  ;;  %v1787_v52 = vshrl.u32 %v9120_v25, 16  ;;  %v9145_v30 = vld [vmem:[#allocation2 + $0x2c] sm:$0x1] }
 0x16c   : > { %v6991_v53 = vcombine.low %v1762_v45, %v1772_v48  ;;  %v3222_v54 = vrot.slane %v3221_v35, 4  ;;  %v3232_v56 = vrot.slane %v3231_v37, 4  ;;  %v1779_v57 = vrot.slane %v1777_v41, 5  ;;  %v3175_v41 = vld [vmem:[#allocation2 + $0x30] sm:$0xf] }
 0x16d   : > { %v1785_v34 = vrot.slane %v1783_v42, 5  ;;  %v1789_v62 = vrot.slane %v1787_v52, 4  ;;  %v1793_v1 = vshll.u32 %v1409_v39, 16  ;;  %v3239_v6 = vshrl.u32 %v3169_v47, 16 }
 0x16e   : > { %7707 = vmatprep.mubr.msk.bf16.mxu0 %vm481_vm1, %v6991_v53  ;;  %v3227_v7 = vsel %vm8713_vm6, %v3222_v54, %v3226_v63  ;;  %v3237_v26 = vsel %vm8713_vm6, %v3232_v56, %v3236_v46  ;;  %v1780_v8 = vor.u32 %v1779_v57, %v1776_v49  ;;  %v3242_v33 = vshll.u32 %v3169_v47, 16  ;;  %v9153_v56 = vld [vmem:[#allocation2 + $0x34] sm:$0xf] }
 0x16f   : > { %v7124_v16 = vcombine.low %v3227_v7, %v3237_v26  ;;  %v1790_v17 = vor.u32 %v1789_v62, %v1785_v34  ;;  %v1795_v19 = vrot.slane %v1793_v1, 5  ;;  %v3241_v0 = vrot.slane %v3239_v6, 4 }
 0x170   : > { %v1781_v29 = vrot.slane %v1780_v8, 4  ;;  %v3244_v45 = vrot.slane %v3242_v33, 5  ;;  %v3248_v15 = vshll.u32 %v9134_v2, 16  ;;  %v3252_v32 = vshrl.u32 %v9134_v2, 16  ;;  %v8513_v8 = vld [vmem:[#allocation2 + $0xc] sm:$0xf] }
 0x171   : > { %7815 = vmatprep.mubr.msk.bf16.mxu1 %vm481_vm1, %v7124_v16  ;;  %v1791_v63 = vrot.slane %v1790_v17, 4  ;;  %v3258_v35 = vshll.u32 %v9132_v58, 16  ;;  %v3263_v37 = vshrl.u32 %v3172_v14, 16  ;;  %v3266_v39 = vshll.u32 %v3172_v14, 16  ;;  %v9158_v33 = vld [vmem:[#allocation2 + $0x10] sm:$0xf] }
 0x172   : > { %v1786_v42 = vsel %vm8713_vm6, %v1781_v29, %v1785_v34  ;;  %v3245_v47 = vor.u32 %v3244_v45, %v3241_v0  ;;  %v3250_v48 = vrot.slane %v3248_v15, 5  ;;  %v3254_v46 = vrot.slane %v3252_v32, 4  ;;  %v9161_v16 = vld [vmem:[#allocation2 + $0x38] sm:$0x1]  ;;  %v3178_v45 = vld [vmem:[#allocation2 + $0x3c] sm:$0xf] }
 0x173   : > { %v1796_v49 = vsel %vm8713_vm6, %v1791_v63, %v1795_v19  ;;  %v3260_v52 = vrot.slane %v3258_v35, 5  ;;  %v3265_v53 = vrot.slane %v3263_v37, 4  ;;  %v3268_v54 = vrot.slane %v3266_v39, 5 }
 0x174   : > { %v6992_v57 = vcombine.low %v1786_v42, %v1796_v49  ;;  %v3246_v62 = vrot.slane %v3245_v47, 4  ;;  %v3255_v1 = vor.u32 %v3254_v46, %v3250_v48  ;;  %v3272_v6 = vshll.u32 %v9141_v27, 16 }
 0x175   : > { %v3269_v7 = vor.u32 %v3268_v54, %v3265_v53  ;;  %v3276_v26 = vshrl.u32 %v9141_v27, 16  ;;  %v3282_v34 = vshll.u32 %v9145_v30, 16  ;;  %v7010_v14 = vcombine.low %v8513_v8, %v9158_v33  ;;  %v3181_v8 = vld [vmem:[#allocation2 + $0x48] sm:$0xf] }
 0x176   : > { %7708 = vmatmul.mubr.msk.bf16.gmra.mrb[60].mxu0 %vm481_vm1, %v6992_v57  ;;  %v3251_v17 = vsel %vm8713_vm6, %v3246_v62, %v3250_v48  ;;  %v3256_v19 = vrot.slane %v3255_v1, 4  ;;  %v3274_v0 = vrot.slane %v3272_v6, 5  ;;  %v3287_v29 = vshrl.u32 %v3175_v41, 16  ;;  %v9174_v48 = vld [vmem:[#allocation2 + $0x40] sm:$0xf] }
 0x177   : > { %v3270_v15 = vrot.slane %v3269_v7, 4  ;;  %v3278_v32 = vrot.slane %v3276_v26, 4  ;;  %v3284_v63 = vrot.slane %v3282_v34, 5  ;;  %7713 = vmatprep.mubr.msk.bf16.mxu0 %vm481_vm1, %v7009_v23  ;;  %v3290_v35 = vshll.u32 %v3175_v41, 16  ;;  %v8515_v41 = vld [vmem:[#allocation2 + $0x18] sm:$0xf] }
 0x178   : > { %v3261_v37 = vsel %vm8713_vm6, %v3256_v19, %v3260_v52  ;;  %v3289_v39 = vrot.slane %v3287_v29, 4  ;;  %v3296_v42 = vshll.u32 %v9153_v56, 16  ;;  %v3300_v47 = vshrl.u32 %v9153_v56, 16  ;;  %v9179_v57 = vld [vmem:[#allocation2 + $0x1c] sm:$0xf] }
 0x179   : > { %v7125_v46 = vcombine.low %v3251_v17, %v3261_v37  ;;  %v3275_v49 = vsel %vm8713_vm6, %v3270_v15, %v3274_v0  ;;  %v3279_v53 = vor.u32 %v3278_v32, %v3274_v0  ;;  %v3292_v54 = vrot.slane %v3290_v35, 5  ;;  %v9182_v62 = vld [vmem:[#allocation2 + $0x44] sm:$0x1]  ;;  %v9187_v1 = vld [vmem:[%s10526_s3 + $0xc] sm:$0x3] }
 0x17a   : > { %v3298_v21 = vrot.slane %v3296_v42, 5  ;;  %v3302_v22 = vrot.slane %v3300_v47, 4  ;;  %v3306_v23 = vshll.u32 %v9161_v16, 16  ;;  %v7011_v52 = vcombine.low %v8515_v41, %v9179_v57  ;;  %10559 = vst [vmem:[#allocation3_spill] sm:$0xff] %v9182_v62  ;;  %v9193_v15 = vld [vmem:[#allocation2 + $0x4c] sm:$0xf] }
 0x17b   : > { %7816 = vmatmul.mubr.msk.bf16.vlgmr.msra.gmra.mrb[0].mxu1 %vm481_vm1, %v7125_v46  ;;  %v3280_v6 = vrot.slane %v3279_v53, 4  ;;  %v3293_v7 = vor.u32 %v3292_v54, %v3289_v39  ;;  %v3311_v26 = vshrl.u32 %v3178_v45, 16  ;;  %v3314_v34 = vshll.u32 %v3178_v45, 16  ;;  %v9200_v46 = vld [vmem:[#allocation2 + $0x50] sm:$0x1] }
 0x17c   : > { %7848 = vmatpush3.bf16.msra.mxu1 %v8777_v51  ;;  %v3303_v17 = vor.u32 %v3302_v22, %v3298_v21  ;;  %v3308_v19 = vrot.slane %v3306_v23, 5  ;;  %v3320_v0 = vshll.u32 %v9174_v48, 16  ;;  %v3324_v29 = vshrl.u32 %v9174_v48, 16  ;;  %10560 = vst [vmem:[#allocation4_spill] sm:$0xff] %v9200_v46  ;;  %v8517_v22 = vld [vmem:[#allocation2 + $0x24] sm:$0xf] }
 0x17d   : > { %v3285_v32 = vsel %vm8713_vm6, %v3280_v6, %v3284_v63  ;;  %v3294_v35 = vrot.slane %v3293_v7, 4  ;;  %v3313_v37 = vrot.slane %v3311_v26, 4  ;;  %v3316_v42 = vrot.slane %v3314_v34, 5  ;;  %8410 = vmatprep.subr.msk.bf16.mxu1 %vm530_vm0, %v9187_v1  ;;  %v9206_v23 = vld [vmem:[#allocation2 + $0x28] sm:$0xf] }
 0x17e   : > { %v7126_v45 = vcombine.low %v3275_v49, %v3285_v32  ;;  %7714 = vmatmul.mubr.msk.bf16.vlgmr.msra.gmra.mrb[32].mxu0 %vm481_vm1, %v7010_v14  ;;  %v3304_v51 = vrot.slane %v3303_v17, 4  ;;  %v3322_v39 = vrot.slane %v3320_v0, 5  ;;  %v3326_v47 = vrot.slane %v3324_v29, 4  ;;  %v3184_v41 = vld [vmem:[#allocation2 + $0x54] sm:$0xf] }
 0x17f   : > { %v3299_v53 = vsel %vm8713_vm6, %v3294_v35, %v3298_v21  ;;  %7717 = vmatprep.mubr.msk.bf16.mxu0 %vm481_vm1, %v7011_v52  ;;  %v3317_v63 = vor.u32 %v3316_v42, %v3313_v37  ;;  %v3330_v54 = vshll.u32 %v9182_v62, 16  ;;  %v7012_v49 = vcombine.low %v8517_v22, %v9206_v23  ;;  %v9212_v21 = vld [vmem:[#allocation2 + $0x58] sm:$0xf]  ;;  %v9216_v42 = vld [vmem:[#allocation2 + $0x5c] sm:$0x1] }
 0x180   : > { %7819 = vmatprep.mubr.msk.bf16.mxu1 %vm481_vm1, %v7126_v45  ;;  %v3309_v14 = vsel %vm8713_vm6, %v3304_v51, %v3308_v19  ;;  %v3327_v6 = vor.u32 %v3326_v47, %v3322_v39  ;;  %v3335_v7 = vshrl.u32 %v3181_v8, 16  ;;  %v3338_v26 = vshll.u32 %v3181_v8, 16  ;;  %10561 = vst [vmem:[#allocation5_spill] sm:$0xff] %v9212_v21  ;;  %10562 = vst [vmem:[#allocation6_spill] sm:$0xff] %v9216_v42  ;;  %v8519_v51 = vld [vmem:[#allocation2 + $0x30] sm:$0xf] }
 0x181   : > { %v7127_v52 = vcombine.low %v3299_v53, %v3309_v14  ;;  %v3318_v34 = vrot.slane %v3317_v63, 4  ;;  %v3332_v17 = vrot.slane %v3330_v54, 5  ;;  %v3344_v0 = vshll.u32 %v9193_v15, 16  ;;  %v9222_v47 = vld [vmem:[#allocation2 + $0x34] sm:$0xf] }
 0x182   : > { %v3328_v29 = vrot.slane %v3327_v6, 4  ;;  %v3337_v32 = vrot.slane %v3335_v7, 4  ;;  %v3340_v35 = vrot.slane %v3338_v26, 5  ;;  %v3348_v37 = vshrl.u32 %v9193_v15, 16  ;;  %v3187_v63 = vld [vmem:[#allocation2 + $0x60] sm:$0xf] }
 0x183   : > { %7820 = vmatmul.mubr.msk.bf16.gmra.mrb[4].mxu1 %vm481_vm1, %v7127_v52  ;;  %v3323_v19 = vsel %vm8713_vm6, %v3318_v34, %v3322_v39  ;;  %v3346_v8 = vrot.slane %v3344_v0, 5  ;;  %v3354_v45 = vshll.u32 %v9200_v46, 16  ;;  %v7013_v53 = vcombine.low %v8519_v51, %v9222_v47  ;;  %v9227_v7 = vld [vmem:[#allocation2 + $0x64] sm:$0xf] }
 0x184   : > { %v3333_v54 = vsel %vm8713_vm6, %v3328_v29, %v3332_v17  ;;  %v3341_v22 = vor.u32 %v3340_v35, %v3337_v32  ;;  %v3350_v14 = vrot.slane %v3348_v37, 4  ;;  %v3359_v6 = vshrl.u32 %v3184_v41, 16  ;;  %v8521_v35 = vld [vmem:[#allocation2 + $0x3c] sm:$0xf] }
 0x185   : > { %v7128_v26 = vcombine.low %v3323_v19, %v3333_v54  ;;  %v3356_v52 = vrot.slane %v3354_v45, 5  ;;  %v3362_v39 = vshll.u32 %v3184_v41, 16  ;;  %v3368_v34 = vshll.u32 %v9212_v21, 16 }
 0x186   : > { %7718 = vmatmul.mubr.msk.bf16.gmra.mrb[36].mxu0 %vm481_vm1, %v7012_v49  ;;  %v3342_v0 = vrot.slane %v3341_v22, 4  ;;  %v3351_v46 = vor.u32 %v3350_v14, %v3346_v8  ;;  %v3361_v62 = vrot.slane %v3359_v6, 4  ;;  %v3372_v51 = vshrl.u32 %v9212_v21, 16  ;;  %v9238_v14 = vld [vmem:[#allocation2 + $0x68] sm:$0x1] }
 0x187   : > { %7823 = vmatprep.mubr.msk.bf16.mxu1 %vm481_vm1, %v7128_v26  ;;  %7721 = vmatprep.mubr.msk.bf16.mxu0 %vm481_vm1, %v7013_v53  ;;  %v3364_v17 = vrot.slane %v3362_v39, 5  ;;  %v3370_v29 = vrot.slane %v3368_v34, 5  ;;  %v3378_v32 = vshll.u32 %v9216_v42, 16  ;;  %v7014_v41 = vcombine.low %v8521_v35, %v8941_v60  ;;  %v3190_v35 = vld [vmem:[#allocation2 + $0x6c] sm:$0xf] }
 0x188   : > { %v3347_v37 = vsel %vm8713_vm6, %v3342_v0, %v3346_v8  ;;  %v3352_v49 = vrot.slane %v3351_v46, 4  ;;  %v3374_v19 = vrot.slane %v3372_v51, 4  ;;  %v3383_v45 = vshrl.u32 %v3187_v63, 16  ;;  %v9244_v51 = vld [vmem:[#allocation2 + $0x70] sm:$0xf] }
 0x189   : > { %v3365_v54 = vor.u32 %v3364_v17, %v3361_v62  ;;  %v3380_v22 = vrot.slane %v3378_v32, 5  ;;  %v3386_v6 = vshll.u32 %v3187_v63, 16  ;;  %v3392_v53 = vshll.u32 %v9227_v7, 16  ;;  %v8522_v32 = vld [vmem:[#allocation2 + $0x48] sm:$0xf] }
 0x18a   : > { %v3357_v26 = vsel %vm8713_vm6, %v3352_v49, %v3356_v52  ;;  %v3375_v39 = vor.u32 %v3374_v19, %v3370_v29  ;;  %v3385_v34 = vrot.slane %v3383_v45, 4  ;;  %v3396_v60 = vshrl.u32 %v9227_v7, 16  ;;  %v9251_v19 = vld [vmem:[#allocation2 + $0x74] sm:$0x1] }
 0x18b   : > { %v7129_v42 = vcombine.low %v3347_v37, %v3357_v26  ;;  %v3366_v8 = vrot.slane %v3365_v54, 4  ;;  %v3388_v46 = vrot.slane %v3386_v6, 5  ;;  %v3394_v0 = vrot.slane %v3392_v53, 5 }
 0x18c   : > { %v3376_v62 = vrot.slane %v3375_v39, 4  ;;  %v3398_v17 = vrot.slane %v3396_v60, 4  ;;  %v3402_v63 = vshll.u32 %v9238_v14, 16  ;;  %v7015_v21 = vcombine.low %v8522_v32, %v8948_v20  ;;  %v3193_v20 = vld [vmem:[#allocation2 + $0x78] sm:$0xf] }
 0x18d   : > { %7824 = vmatmul.mubr.msk.bf16.gmra.mrb[8].mxu1 %vm481_vm1, %v7129_v42  ;;  %v3371_v52 = vsel %vm8713_vm6, %v3366_v8, %v3370_v29  ;;  %v3389_v49 = vor.u32 %v3388_v46, %v3385_v34  ;;  %v3407_v37 = vshrl.u32 %v3190_v35, 16  ;;  %v3410_v45 = vshll.u32 %v3190_v35, 16 }
 0x18e   : > { %v3381_v54 = vsel %vm8713_vm6, %v3376_v62, %v3380_v22  ;;  %7722 = vmatmul.mubr.msk.bf16.gmra.mrb[40].mxu0 %vm481_vm1, %v7014_v41  ;;  %v3399_v6 = vor.u32 %v3398_v17, %v3394_v0  ;;  %v3404_v53 = vrot.slane %v3402_v63, 5  ;;  %v3416_v26 = vshll.u32 %v9244_v51, 16  ;;  %v9260_v22 = vld [vmem:[#allocation2 + $0x7c] sm:$0xf] }
 0x18f   : > { %v7130_v39 = vcombine.low %v3371_v52, %v3381_v54  ;;  %v3390_v42 = vrot.slane %v3389_v49, 4  ;;  %7725 = vmatprep.mubr.msk.bf16.mxu0 %vm481_vm1, %v7015_v21  ;;  %v3409_v29 = vrot.slane %v3407_v37, 4  ;;  %v3412_v34 = vrot.slane %v3410_v45, 5  ;;  %v9267_v21 = vld [vmem:[#allocation2 + $0x80] sm:$0x1] }
 0x190   : > { %v3400_v60 = vrot.slane %v3399_v6, 4  ;;  %v3418_v8 = vrot.slane %v3416_v26, 5  ;;  %v3420_v35 = vshrl.u32 %v9244_v51, 16  ;;  %v3426_v46 = vshll.u32 %v9251_v19, 16  ;;  %v3196_v45 = vld [vmem:[#allocation2 + $0x84] sm:$0xf] }
 0x191   : > { %7827 = vmatprep.mubr.msk.bf16.mxu1 %vm481_vm1, %v7130_v39  ;;  %v3395_v41 = vsel %vm8713_vm6, %v3390_v42, %v3394_v0  ;;  %v3413_v62 = vor.u32 %v3412_v34, %v3409_v29  ;;  %v7016_v17 = vcombine.low %v8970_v4, %v8986_v12  ;;  %v3431_v63 = vshrl.u32 %v3193_v20, 16  ;;  %v9274_v12 = vld [vmem:[#allocation2 + $0x88] sm:$0xf] }
 0x192   : > { %v3405_v32 = vsel %vm8713_vm6, %v3400_v60, %v3404_v53  ;;  %v3422_v52 = vrot.slane %v3420_v35, 4  ;;  %v3428_v49 = vrot.slane %v3426_v46, 5  ;;  %v3434_v37 = vshll.u32 %v3193_v20, 16  ;;  %v9281_v60 = vld [vmem:[#allocation2 + $0x8c] sm:$0x1] }
 0x193   : > { %v7131_v54 = vcombine.low %v3395_v41, %v3405_v32  ;;  %v3414_v6 = vrot.slane %v3413_v62, 4  ;;  %v3433_v26 = vrot.slane %v3431_v63, 4  ;;  %v3440_v39 = vshll.u32 %v9260_v22, 16  ;;  %10563 = vst [vmem:[#allocation7_spill] sm:$0xff] %v9281_v60 }
 0x194   : > { %v3423_v0 = vor.u32 %v3422_v52, %v3418_v8  ;;  %v3436_v42 = vrot.slane %v3434_v37, 5  ;;  %v3444_v29 = vshrl.u32 %v9260_v22, 16  ;;  %v3450_v4 = vshll.u32 %v9267_v21, 16 }
 0x195   : > { %7828 = vmatmul.mubr.msk.bf16.gmra.mrb[12].mxu1 %vm481_vm1, %v7131_v54  ;;  %v3419_v53 = vsel %vm8713_vm6, %v3414_v6, %v3418_v8  ;;  %v3442_v20 = vrot.slane %v3440_v39, 5  ;;  %v7017_v34 = vcombine.low %v8989_v28, %v8999_v44  ;;  %v3455_v35 = vshrl.u32 %v3196_v45, 16  ;;  %v3199_v39 = vld [vmem:[#allocation2 + $0x90] sm:$0xf] }
 0x196   : > { %v3424_v46 = vrot.slane %v3423_v0, 4  ;;  %7726 = vmatmul.mubr.msk.bf16.gmra.mrb[44].mxu0 %vm481_vm1, %v7016_v17  ;;  %v3437_v41 = vor.u32 %v3436_v42, %v3433_v26  ;;  %v3446_v62 = vrot.slane %v3444_v29, 4  ;;  %v3452_v63 = vrot.slane %v3450_v4, 5  ;;  %v9290_v17 = vld [vmem:[#allocation2 + $0x94] sm:$0xf] }
 0x197   : > { %7729 = vmatprep.mubr.msk.bf16.mxu0 %vm481_vm1, %v7017_v34  ;;  %v3457_v32 = vrot.slane %v3455_v35, 4  ;;  %v3458_v52 = vshll.u32 %v3196_v45, 16  ;;  %v3464_v37 = vshll.u32 %v9274_v12, 16  ;;  %v3468_v8 = vshrl.u32 %v9274_v12, 16  ;;  %v9292_v4 = vld [vmem:[#allocation2 + $0x98] sm:$0x1] }
 0x198   : > { %v3429_v28 = vsel %vm8713_vm6, %v3424_v46, %v3428_v49  ;;  %v3438_v44 = vrot.slane %v3437_v41, 4  ;;  %v3447_v54 = vor.u32 %v3446_v62, %v3442_v20  ;;  %v3474_v6 = vshll.u32 %v9281_v60, 16 }
 0x199   : > { %v7132_v26 = vcombine.low %v3419_v53, %v3429_v28  ;;  %v3460_v0 = vrot.slane %v3458_v52, 5  ;;  %v3466_v42 = vrot.slane %v3464_v37, 5  ;;  %v3470_v29 = vrot.slane %v3468_v8, 4  ;;  %v3202_v8 = vld [vmem:[#allocation2 + $0x9c] sm:$0xf] }
 0x19a   : > { %v3443_v45 = vsel %vm8713_vm6, %v3438_v44, %v3442_v20  ;;  %v3448_v34 = vrot.slane %v3447_v54, 4  ;;  %v3476_v35 = vrot.slane %v3474_v6, 5  ;;  %v7018_v49 = vcombine.low %v9016_v13, %v9020_v24  ;;  %v9304_v24 = vld [vmem:[#allocation2 + $0xa0] sm:$0xf] }
 0x19b   : > { %7831 = vmatprep.mubr.msk.bf16.mxu1 %vm481_vm1, %v7132_v26  ;;  %v3461_v46 = vor.u32 %v3460_v0, %v3457_v32  ;;  %v3471_v41 = vor.u32 %v3470_v29, %v3466_v42  ;;  %v3479_v62 = vshrl.u32 %v3199_v39, 16  ;;  %v3482_v60 = vshll.u32 %v3199_v39, 16 }
 0x19c   : > { %v3453_v53 = vsel %vm8713_vm6, %v3448_v34, %v3452_v63  ;;  %v3488_v52 = vshll.u32 %v9290_v17, 16  ;;  %v3492_v37 = vshrl.u32 %v9290_v17, 16  ;;  %v3498_v20 = vshll.u32 %v9292_v4, 16  ;;  %v9307_v63 = vld [vmem:[#allocation2 + $0xa4] sm:$0x1] }
 0x19d   : > { %v7133_v28 = vcombine.low %v3443_v45, %v3453_v53  ;;  %v3462_v44 = vrot.slane %v3461_v46, 4  ;;  %v3472_v54 = vrot.slane %v3471_v41, 4  ;;  %v3481_v13 = vrot.slane %v3479_v62, 4  ;;  %v3205_v62 = vld [vmem:[#allocation2 + $0xa8] sm:$0xf] }
 0x19e   : > { %7730 = vmatmul.mubr.msk.bf16.gmra.mrb[48].mxu0 %vm481_vm1, %v7018_v49  ;;  %v3484_v32 = vrot.slane %v3482_v60, 5  ;;  %v3490_v6 = vrot.slane %v3488_v52, 5  ;;  %v3494_v39 = vrot.slane %v3492_v37, 4  ;;  %v3500_v26 = vrot.slane %v3498_v20, 5 }
 0x19f   : > { %7832 = vmatmul.mubr.msk.bf16.gmra.mrb[16].mxu1 %vm481_vm1, %v7133_v28  ;;  %v3467_v0 = vsel %vm8713_vm6, %v3462_v44, %v3466_v42  ;;  %v3477_v29 = vsel %vm8713_vm6, %v3472_v54, %v3476_v35  ;;  %v7019_v45 = vcombine.low %v9033_v36, %v9036_v43  ;;  %v3503_v34 = vshrl.u32 %v3202_v8, 16  ;;  %v9323_v28 = vld [vmem:[#allocation2 + $0xac] sm:$0xf] }
 0x1a0   : > { %v7134_v46 = vcombine.low %v3467_v0, %v3477_v29  ;;  %v3485_v49 = vor.u32 %v3484_v32, %v3481_v13  ;;  %v3495_v60 = vor.u32 %v3494_v39, %v3490_v6  ;;  %v3506_v41 = vshll.u32 %v3202_v8, 16  ;;  %v9325_v13 = vld [vmem:[#allocation2 + $0xb0] sm:$0x1] }
 0x1a1   : > { %7733 = vmatprep.mubr.msk.bf16.mxu0 %vm481_vm1, %v7019_v45  ;;  %v3505_v53 = vrot.slane %v3503_v34, 4  ;;  %v3512_v52 = vshll.u32 %v9304_v24, 16  ;;  %v3516_v37 = vshrl.u32 %v9304_v24, 16  ;;  %v3522_v42 = vshll.u32 %v9307_v63, 16  ;;  %v3208_v34 = vld [vmem:[#allocation2 + $0xb4] sm:$0xf] }
 0x1a2   : > { %7835 = vmatprep.mubr.msk.bf16.mxu1 %vm481_vm1, %v7134_v46  ;;  %v3486_v35 = vrot.slane %v3485_v49, 4  ;;  %v3496_v20 = vrot.slane %v3495_v60, 4  ;;  %v3508_v36 = vrot.slane %v3506_v41, 5  ;;  %v7020_v43 = vcombine.low %v9044_v59, %v9046_v11 }
 0x1a3   : > { %v3514_v8 = vrot.slane %v3512_v52, 5  ;;  %v3518_v44 = vrot.slane %v3516_v37, 4  ;;  %v3524_v54 = vrot.slane %v3522_v42, 5  ;;  %v3527_v32 = vshrl.u32 %v3205_v62, 16 }
 0x1a4   : > { %v3491_v39 = vsel %vm8713_vm6, %v3486_v35, %v3490_v6  ;;  %v3501_v0 = vsel %vm8713_vm6, %v3496_v20, %v3500_v26  ;;  %v3509_v29 = vor.u32 %v3508_v36, %v3505_v53  ;;  %v3530_v45 = vshll.u32 %v3205_v62, 16  ;;  %v9335_v6 = vld [vmem:[#allocation2 + $0xb8] sm:$0xf] }
 0x1a5   : > { %v7135_v46 = vcombine.low %v3491_v39, %v3501_v0  ;;  %v3519_v49 = vor.u32 %v3518_v44, %v3514_v8  ;;  %v3529_v59 = vrot.slane %v3527_v32, 4  ;;  %v3536_v11 = vshll.u32 %v9323_v28, 16  ;;  %v9342_v44 = vld [vmem:[#allocation2 + $0xbc] sm:$0x1] }
 0x1a6   : > { %v3510_v60 = vrot.slane %v3509_v29, 4  ;;  %7734 = vmatmul.mubr.msk.bf16.gmra.mrb[52].mxu0 %vm481_vm1, %v7020_v43  ;;  %v3532_v41 = vrot.slane %v3530_v45, 5  ;;  %v3540_v52 = vshrl.u32 %v9323_v28, 16  ;;  %v3546_v37 = vshll.u32 %v9325_v13, 16  ;;  %v3211_v45 = vld [vmem:[#allocation2 + $0xc0] sm:$0xf] }
 0x1a7   : > { %7836 = vmatmul.mubr.msk.bf16.gmra.mrb[20].mxu1 %vm481_vm1, %v7135_v46  ;;  %v3520_v26 = vrot.slane %v3519_v49, 4  ;;  %v3538_v62 = vrot.slane %v3536_v11, 5  ;;  %v7021_v53 = vcombine.low %v9056_v40, %v9063_v31  ;;  %v3551_v42 = vshrl.u32 %v3208_v34, 16  ;;  %v9349_v49 = vld [vmem:[#allocation2 + $0xc4] sm:$0xf] }
 0x1a8   : > { %v3515_v35 = vsel %vm8713_vm6, %v3510_v60, %v3514_v8  ;;  %v3533_v20 = vor.u32 %v3532_v41, %v3529_v59  ;;  %v3542_v36 = vrot.slane %v3540_v52, 4  ;;  %v3548_v43 = vrot.slane %v3546_v37, 5 }
 0x1a9   : > { %v3525_v32 = vsel %vm8713_vm6, %v3520_v26, %v3524_v54  ;;  %7737 = vmatprep.mubr.msk.bf16.mxu0 %vm481_vm1, %v7021_v53  ;;  %v3553_v39 = vrot.slane %v3551_v42, 4  ;;  %v3554_v0 = vshll.u32 %v3208_v34, 16  ;;  %v3560_v29 = vshll.u32 %v9335_v6, 16  ;;  %v9357_v42 = vld [vmem:[#allocation2 + $0xc8] sm:$0x1] }
 0x1aa   : > { %v7136_v40 = vcombine.low %v3515_v35, %v3525_v32  ;;  %v3534_v31 = vrot.slane %v3533_v20, 4  ;;  %v3543_v46 = vor.u32 %v3542_v36, %v3538_v62  ;;  %v3564_v8 = vshrl.u32 %v9335_v6, 16 }
 0x1ab   : > { %v3556_v59 = vrot.slane %v3554_v0, 5  ;;  %v3562_v11 = vrot.slane %v3560_v29, 5  ;;  %v3570_v60 = vshll.u32 %v9342_v44, 16  ;;  %v7022_v54 = vcombine.low %v9072_v50, %v9076_v61 }
 0x1ac   : > { %7839 = vmatprep.mubr.msk.bf16.mxu1 %vm481_vm1, %v7136_v40  ;;  %v3539_v34 = vsel %vm8713_vm6, %v3534_v31, %v3538_v62  ;;  %v3544_v41 = vrot.slane %v3543_v46, 4  ;;  %v3566_v52 = vrot.slane %v3564_v8, 4  ;;  %v3575_v37 = vshrl.u32 %v3211_v45, 16  ;;  %v3892_v8 = vld [vmem:[#allocation2 + $0xc] sm:$0xe] }
 0x1ad   : > { %v3557_v26 = vor.u32 %v3556_v59, %v3553_v39  ;;  %v3572_v53 = vrot.slane %v3570_v60, 5  ;;  %v3578_v35 = vshll.u32 %v3211_v45, 16  ;;  %v3584_v20 = vshll.u32 %v9349_v49, 16 }
 0x1ae   : > { %v3549_v36 = vsel %vm8713_vm6, %v3544_v41, %v3548_v43  ;;  %v3567_v32 = vor.u32 %v3566_v52, %v3562_v11  ;;  %7738 = vmatmul.mubr.msk.bf16.gmra.mrb[56].mxu0 %vm481_vm1, %v7022_v54  ;;  %v3577_v50 = vrot.slane %v3575_v37, 4  ;;  %v3588_v61 = vshrl.u32 %v9349_v49, 16 }
 0x1af   : > { %v7137_v62 = vcombine.low %v3539_v34, %v3549_v36  ;;  %v3558_v0 = vrot.slane %v3557_v26, 4  ;;  %v3580_v29 = vrot.slane %v3578_v35, 5  ;;  %v3586_v40 = vrot.slane %v3584_v20, 5  ;;  %v3893_v34 = vld [vmem:[#allocation2 + $0x18] sm:$0xe] }
 0x1b0   : > { %v3568_v39 = vrot.slane %v3567_v32, 4  ;;  %v3590_v31 = vrot.slane %v3588_v61, 4  ;;  %v3594_v46 = vshll.u32 %v9357_v42, 16  ;;  %v7023_v45 = vcombine.low %v9088_v9, %v9096_v3 }
 0x1b1   : > { %7840 = vmatmul.mubr.msk.bf16.gmra.mrb[24].mxu1 %vm481_vm1, %v7137_v62  ;;  %v3563_v43 = vsel %vm8713_vm6, %v3558_v0, %v3562_v11  ;;  %v3581_v59 = vor.u32 %v3580_v29, %v3577_v50  ;;  %v7156_v37 = vrot.slane %v3892_v8, 9  ;;  %v3958_v9 = vrot.slane %v9107_v55, 5  ;;  %v3894_v50 = vld [vmem:[#allocation2 + $0x24] sm:$0xe] }
 0x1b2   : > { %v3573_v60 = vsel %vm8713_vm6, %v3568_v39, %v3572_v53  ;;  %v3591_v54 = vor.u32 %v3590_v31, %v3586_v40  ;;  %7741 = vmatprep.mubr.msk.bf16.mxu0 %vm481_vm1, %v7023_v45  ;;  %v3596_v26 = vrot.slane %v3594_v46, 5  ;;  %v7024_v11 = vcombine.low %v9116_v10, %v9120_v25  ;;  %v2351_v25 = vld [vmem:[#allocation2] sm:$0xe]  ;;  %v2352_v45 = vld [vmem:[#allocation2 + $0xc] sm:$0xe] }
 0x1b3   : > { %v7138_v41 = vcombine.low %v3563_v43, %v3573_v60  ;;  %v3582_v52 = vrot.slane %v3581_v59, 4  ;;  %v3965_v53 = vrot.slane %v9134_v2, 5  ;;  %v3960_v36 = vrot.slane %v3958_v9, 4  ;;  %v8523_v59 = vld [vmem:[#allocation2 + $0x4] sm:$0xf] }
 0x1b4   : > { %v3592_v3 = vrot.slane %v3591_v54, 4  ;;  %v3961_v32 = vrot.slane %v9111_v18, 5  ;;  %v7157_v55 = vrot.slane %v3893_v34, 9  ;;  %v3968_v10 = vrot.slane %v9132_v58, 5  ;;  %v8524_v54 = vld [vmem:[#allocation2 + $0x8] sm:$0x1] }
 0x1b5   : > { %7843 = vmatprep.mubr.msk.bf16.mxu1 %vm481_vm1, %v7138_v41  ;;  %v3587_v20 = vsel %vm8713_vm6, %v3582_v52, %v3586_v40  ;;  %v3967_v62 = vrot.slane %v3965_v53, 4  ;;  %v3959_v0 = vsel %vm9374_vm12, %v7156_v37, %v3958_v9  ;;  %v3972_v18 = vrot.slane %v9141_v27, 5 }
 0x1b6   : > { %v3597_v61 = vsel %vm8713_vm6, %v3592_v3, %v3596_v26  ;;  %7742 = vmatmul.mubr.msk.bf16.gmra.mrb[60].mxu0 %vm481_vm1, %v7024_v11  ;;  %v3962_v29 = vsel %vm9374_vm12, %v3960_v36, %v3961_v32  ;;  %v7158_v31 = vrot.slane %v3894_v50, 9  ;;  %v2613_v46 = vsel %vm530_vm0, %v9084_v5, 0  ;;  %v3895_v5 = vld [vmem:[#allocation2 + $0x30] sm:$0xe]  ;;  %v2353_v26 = vld [vmem:[#allocation2 + $0x18] sm:$0xe] }
 0x1b7   : > { %v7139_v2 = vcombine.low %v3587_v20, %v3597_v61  ;;  %v7173_v40 = vcombine.low %v3959_v0, %v3962_v29  ;;  %v3969_v39 = vsel %vm9374_vm12, %v3967_v62, %v3968_v10  ;;  %v3966_v58 = vsel %vm9374_vm12, %v7157_v55, %v3965_v53  ;;  %7746 = vmatpush3.bf16.msra.mxu0 %v2613_v46  ;;  %v8525_v36 = vld [vmem:[#allocation2 + $0x14] sm:$0x1]  ;;  %v8526_v46 = vld [vmem:[#allocation2 + $0x20] sm:$0x1] }
 0x1b8   : > { %v3974_v8 = vrot.slane %v3972_v18, 4  ;;  %v7041_v43 = vrot.slane %v2351_v25, 9  ;;  %v3975_v27 = vrot.slane %v9145_v30, 5  ;;  %v2404_v60 = vrot.slane %v8523_v59, 5 }
 0x1b9   : > { %7844 = vmatmul.mubr.msk.bf16.gmra.mrb[28].mxu1 %vm481_vm1, %v7139_v2  ;;  %v2407_v34 = vrot.slane %v8524_v54, 5  ;;  %v2411_v41 = vrot.slane %v9158_v33, 5  ;;  %v7174_v52 = vcombine.low %v3966_v58, %v3969_v39  ;;  %v4526_v37 = vsel %vm530_vm0, %v9187_v1, 0  ;;  %v3896_v1 = vld [vmem:[#allocation2 + $0x3c] sm:$0xe] }
 0x1ba   : > { %7849 = vmatprep.mubr.msk.bf16.mxu1 %vm481_vm1, %v7173_v40  ;;  %v7042_v9 = vrot.slane %v2352_v45, 9  ;;  %v3979_v3 = vrot.slane %v9153_v56, 5  ;;  %v3973_v11 = vsel %vm9374_vm12, %v7158_v31, %v3972_v18  ;;  %v3976_v30 = vsel %vm9374_vm12, %v3974_v8, %v3975_v27  ;;  %v2354_v18 = vld [vmem:[#allocation2 + $0x24] sm:$0xe]  ;;  %v3897_v40 = vld [vmem:[#allocation2 + $0x48] sm:$0xe] }
 0x1bb   : > { %v2405_v53 = vsel %vm9374_vm12, %v7041_v43, %v2404_v60  ;;  %v2406_v20 = vrot.slane %v2404_v60, 4  ;;  %v2413_v33 = vrot.slane %v2411_v41, 4  ;;  %v2414_v32 = vrot.slane %v8525_v36, 5 }
 0x1bc   : > { %v7159_v55 = vrot.slane %v3895_v5, 9  ;;  %v3981_v50 = vrot.slane %v3979_v3, 4  ;;  %v3982_v61 = vrot.slane %v9161_v16, 5  ;;  %v7043_v62 = vrot.slane %v2353_v26, 9 }
 0x1bd   : > { %v2408_v56 = vsel %vm9374_vm12, %v2406_v20, %v2407_v34  ;;  %v2418_v10 = vrot.slane %v9179_v57, 5  ;;  %v7175_v25 = vcombine.low %v3973_v11, %v3976_v30  ;;  %v2412_v0 = vsel %vm9374_vm12, %v7042_v9, %v2411_v41  ;;  %v9426_v57 = vld [vmem:[%s10526_s3 + $0xe] sm:$0x3]  ;;  %v2355_v41 = vld [vmem:[#allocation2 + $0x30] sm:$0xe]  ;;  %v10566_v9 = vld [vmem:[#allocation3_spill] sm:$0xff] }
 0x1be   : > { %v7058_v2 = vcombine.low %v2405_v53, %v2408_v56  ;;  %v2415_v29 = vsel %vm9374_vm12, %v2413_v33, %v2414_v32  ;;  %v3983_v39 = vsel %vm9374_vm12, %v3981_v50, %v3982_v61  ;;  %v2421_v45 = vrot.slane %v8526_v46, 5  ;;  %v8527_v11 = vld [vmem:[#allocation2 + $0x2c] sm:$0x1]  ;;  %v10567_v20 = vld [vmem:[#allocation4_spill] sm:$0xff]  ;;  %v3898_v32 = vld [vmem:[#allocation2 + $0x54] sm:$0xe] }
 0x1bf   : > { %v2420_v31 = vrot.slane %v2418_v10, 4  ;;  %v7160_v16 = vrot.slane %v3896_v1, 9  ;;  %v7059_v58 = vcombine.low %v2412_v0, %v2415_v29  ;;  %v2419_v8 = vsel %vm9374_vm12, %v7043_v62, %v2418_v10  ;;  %v3899_v61 = vld [vmem:[#allocation2 + $0x60] sm:$0xe]  ;;  %v2356_v0 = vld [vmem:[#allocation2 + $0x3c] sm:$0xe] }
 0x1c0   : > { %7747 = vmatprep.mubr.msk.bf16.mxu0 %vm481_vm1, %v7058_v2  ;;  %v3986_v43 = vrot.slane %v9174_v48, 5  ;;  %v2425_v27 = vrot.slane %v9206_v23, 5  ;;  %v7044_v60 = vrot.slane %v2354_v18, 9  ;;  %v7161_v54 = vrot.slane %v3897_v40, 9  ;;  %v10568_v40 = vld [vmem:[#allocation5_spill] sm:$0xff] }
 0x1c1   : > { %7850 = vmatmul.mubr.msk.bf16.vlgmr.msra.gmra.mrb[0].mxu1 %vm481_vm1, %v7174_v52  ;;  %v2422_v59 = vsel %vm9374_vm12, %v2420_v31, %v2421_v45  ;;  %v3993_v34 = vrot.slane %v9193_v15, 5  ;;  %7748 = vmatmul.mubr.msk.bf16.vlgmr.msra.gmra.mrb[32].mxu0 %vm481_vm1, %v7059_v58  ;;  %v3980_v5 = vsel %vm9374_vm12, %v7159_v55, %v3979_v3  ;;  %v3989_v23 = vrot.slane %v10566_v9, 5  ;;  %v8529_v31 = vld [vmem:[#allocation2 + $0x40] sm:$0xf] }
 0x1c2   : > { %7882 = vmatpush3.bf16.msra.mxu1 %v4526_v37  ;;  %7853 = vmatprep.mubr.msk.bf16.mxu1 %vm481_vm1, %v7175_v25  ;;  %v7060_v52 = vcombine.low %v2419_v8, %v2422_v59  ;;  %v3988_v48 = vrot.slane %v3986_v43, 4  ;;  %v7176_v37 = vcombine.low %v3980_v5, %v3983_v39  ;;  %v2427_v26 = vrot.slane %v2425_v27, 4  ;;  %v10569_v59 = vld [vmem:[#allocation6_spill] sm:$0xff]  ;;  %v8530_v5 = vld [vmem:[#allocation2 + $0x44] sm:$0x1] }
 0x1c3   : > { %8411 = vmatprep.subr.msk.bf16.mxu1 %vm530_vm0, %v9426_v57  ;;  %v2428_v30 = vrot.slane %v8527_v11, 5  ;;  %v3995_v53 = vrot.slane %v3993_v34, 4  ;;  %v3996_v33 = vrot.slane %v10567_v20, 5  ;;  %v7045_v3 = vrot.slane %v2355_v41, 9 }
 0x1c4   : > { %7751 = vmatprep.mubr.msk.bf16.mxu0 %vm481_vm1, %v7060_v52  ;;  %v3990_v15 = vsel %vm9374_vm12, %v3988_v48, %v3989_v23  ;;  %v2432_v36 = vrot.slane %v9222_v47, 5  ;;  %v3987_v55 = vsel %vm9374_vm12, %v7160_v16, %v3986_v43  ;;  %v2426_v50 = vsel %vm9374_vm12, %v7044_v60, %v2425_v27  ;;  %v8528_v47 = vld [vmem:[#allocation2 + $0x38] sm:$0x1] }
 0x1c5   : > { %v2429_v1 = vsel %vm9374_vm12, %v2427_v26, %v2428_v30  ;;  %v3994_v56 = vsel %vm9374_vm12, %v7161_v54, %v3993_v34  ;;  %v7177_v62 = vcombine.low %v3987_v55, %v3990_v15  ;;  %v3997_v10 = vsel %vm9374_vm12, %v3995_v53, %v3996_v33  ;;  %v2357_v34 = vld [vmem:[#allocation2 + $0x48] sm:$0xe]  ;;  %v8531_v26 = vld [vmem:[#allocation2 + $0x4c] sm:$0xf]  ;;  %v3901_v33 = vld [vmem:[#allocation2 + $0x78] sm:$0xe] }
 0x1c6   : > { %v2434_v25 = vrot.slane %v2432_v36, 4  ;;  %v2435_v2 = vrot.slane %v8528_v47, 5  ;;  %v7061_v29 = vcombine.low %v2426_v50, %v2429_v1  ;;  %v7162_v18 = vrot.slane %v3898_v32, 9  ;;  %v3900_v30 = vld [vmem:[#allocation2 + $0x6c] sm:$0xe] }
 0x1c7   : > { %v4000_v39 = vrot.slane %v10568_v40, 5  ;;  %v2439_v46 = vrot.slane %v8529_v31, 5  ;;  %v2433_v45 = vsel %vm9374_vm12, %v7045_v3, %v2432_v36  ;;  %v7163_v58 = vrot.slane %v3899_v61, 9  ;;  %v8532_v55 = vld [vmem:[#allocation2 + $0x50] sm:$0x1] }
 0x1c8   : > { %v2436_v16 = vsel %vm9374_vm12, %v2434_v25, %v2435_v2  ;;  %v4007_v8 = vrot.slane %v9227_v7, 5  ;;  %v4003_v60 = vrot.slane %v10569_v59, 5  ;;  %v7046_v54 = vrot.slane %v2356_v0, 9  ;;  %v2358_v1 = vld [vmem:[#allocation2 + $0x54] sm:$0xe] }
 0x1c9   : > { %7854 = vmatmul.mubr.msk.bf16.gmra.mrb[4].mxu1 %vm481_vm1, %v7176_v37  ;;  %v7062_v43 = vcombine.low %v2433_v45, %v2436_v16  ;;  %v4002_v27 = vrot.slane %v4000_v39, 4  ;;  %7752 = vmatmul.mubr.msk.bf16.gmra.mrb[36].mxu0 %vm481_vm1, %v7061_v29  ;;  %v2441_v41 = vrot.slane %v2439_v46, 4  ;;  %v2442_v52 = vrot.slane %v8530_v5, 5 }
 0x1ca   : > { %7857 = vmatprep.mubr.msk.bf16.mxu1 %vm481_vm1, %v7177_v62  ;;  %v4009_v48 = vrot.slane %v4007_v8, 4  ;;  %v4010_v9 = vrot.slane %v9238_v14, 5  ;;  %v7178_v23 = vcombine.low %v3994_v56, %v3997_v10  ;;  %v4001_v7 = vsel %vm9374_vm12, %v7162_v18, %v4000_v39  ;;  %v8533_v10 = vld [vmem:[#allocation2 + $0x58] sm:$0xf] }
 0x1cb   : > { %7755 = vmatprep.mubr.msk.bf16.mxu0 %vm481_vm1, %v7062_v43  ;;  %v4004_v37 = vsel %vm9374_vm12, %v4002_v27, %v4003_v60  ;;  %v2446_v11 = vrot.slane %v8531_v26, 5  ;;  %v2443_v53 = vsel %vm9374_vm12, %v2441_v41, %v2442_v52  ;;  %v9479_v15 = vsel %vm9374_vm12, %v7163_v58, %v4007_v8  ;;  %v8534_v8 = vld [vmem:[#allocation2 + $0x5c] sm:$0x1]  ;;  %v8535_v27 = vld [vmem:[#allocation2 + $0x64] sm:$0xf] }
 0x1cc   : > { %v4011_v14 = vsel %vm9374_vm12, %v4009_v48, %v4010_v9  ;;  %v7047_v20 = vrot.slane %v2357_v34, 9  ;;  %v2440_v3 = vsel %vm9374_vm12, %v7046_v54, %v2439_v46  ;;  %v2449_v50 = vrot.slane %v8532_v55, 5  ;;  %v2359_v46 = vld [vmem:[#allocation2 + $0x60] sm:$0xe]  ;;  %v3902_v60 = vld [vmem:[#allocation2 + $0x84] sm:$0xe] }
 0x1cd   : > { %v7180_v36 = vcombine.low %v9479_v15, %v4011_v14  ;;  %v2448_v32 = vrot.slane %v2446_v11, 4  ;;  %v7179_v56 = vcombine.low %v4001_v7, %v4004_v37  ;;  %v7164_v61 = vrot.slane %v3900_v30, 9  ;;  %v3903_v41 = vld [vmem:[#allocation2 + $0x90] sm:$0xe]  ;;  %v8536_v9 = vld [vmem:[#allocation2 + $0x68] sm:$0x1] }
 0x1ce   : > { %v4014_v62 = vrot.slane %v9244_v51, 5  ;;  %v2453_v25 = vrot.slane %v8533_v10, 5  ;;  %v7063_v47 = vcombine.low %v2440_v3, %v2443_v53  ;;  %v7165_v0 = vrot.slane %v3901_v33, 9  ;;  %v8537_v30 = vld [vmem:[#allocation2 + $0x70] sm:$0xf] }
 0x1cf   : > { %v2450_v2 = vsel %vm9374_vm12, %v2448_v32, %v2449_v50  ;;  %v4021_v29 = vrot.slane %v9260_v22, 5  ;;  %v2447_v18 = vsel %vm9374_vm12, %v7047_v20, %v2446_v11  ;;  %v4017_v39 = vrot.slane %v9251_v19, 5  ;;  %v2360_v11 = vld [vmem:[#allocation2 + $0x6c] sm:$0xe]  ;;  %v10570_v50 = vld [vmem:[#allocation7_spill] sm:$0xff] }
 0x1d0   : > { %v4016_v40 = vrot.slane %v4014_v62, 4  ;;  %v7048_v31 = vrot.slane %v2358_v1, 9  ;;  %v7064_v51 = vcombine.low %v2447_v18, %v2450_v2  ;;  %v2455_v45 = vrot.slane %v2453_v25, 4  ;;  %v2361_v10 = vld [vmem:[#allocation2 + $0x78] sm:$0xe] }
 0x1d1   : > { %7858 = vmatmul.mubr.msk.bf16.gmra.mrb[8].mxu1 %vm481_vm1, %v7178_v23  ;;  %v4023_v16 = vrot.slane %v4021_v29, 4  ;;  %v4024_v58 = vrot.slane %v9267_v21, 5  ;;  %7756 = vmatmul.mubr.msk.bf16.gmra.mrb[40].mxu0 %vm481_vm1, %v7063_v47  ;;  %v4015_v22 = vsel %vm9374_vm12, %v7164_v61, %v4014_v62  ;;  %v2456_v43 = vrot.slane %v8534_v8, 5  ;;  %v8538_v2 = vld [vmem:[#allocation2 + $0x7c] sm:$0xf] }
 0x1d2   : > { %7861 = vmatprep.mubr.msk.bf16.mxu1 %vm481_vm1, %v7179_v56  ;;  %v2460_v59 = vrot.slane %v8535_v27, 5  ;;  %7759 = vmatprep.mubr.msk.bf16.mxu0 %vm481_vm1, %v7064_v51  ;;  %v4018_v19 = vsel %vm9374_vm12, %v4016_v40, %v4017_v39  ;;  %v9504_v54 = vsel %vm9374_vm12, %v7165_v0, %v4021_v29  ;;  %v7049_v34 = vrot.slane %v2359_v46, 9  ;;  %v3904_v29 = vld [vmem:[#allocation2 + $0x9c] sm:$0xe]  ;;  %v8539_v18 = vld [vmem:[#allocation2 + $0x74] sm:$0x1] }
 0x1d3   : > { %v9508_v21 = vsel %vm9374_vm12, %v4023_v16, %v4024_v58  ;;  %v2457_v5 = vsel %vm9374_vm12, %v2455_v45, %v2456_v43  ;;  %v2463_v23 = vrot.slane %v8536_v9, 5  ;;  %v2454_v7 = vsel %vm9374_vm12, %v7048_v31, %v2453_v25  ;;  %v3905_v31 = vld [vmem:[#allocation2 + $0xa8] sm:$0xe]  ;;  %v8540_v16 = vld [vmem:[#allocation2 + $0x80] sm:$0x1] }
 0x1d4   : > { %v7182_v52 = vcombine.low %v9504_v54, %v9508_v21  ;;  %v2462_v48 = vrot.slane %v2460_v59, 4  ;;  %v7166_v37 = vrot.slane %v3902_v60, 9  ;;  %v4028_v26 = vrot.slane %v9274_v12, 5  ;;  %v8541_v27 = vld [vmem:[#allocation2 + $0x88] sm:$0xf] }
 0x1d5   : > { %v2467_v53 = vrot.slane %v8537_v30, 5  ;;  %v7181_v15 = vcombine.low %v4015_v22, %v4018_v19  ;;  %v7167_v20 = vrot.slane %v3903_v41, 9  ;;  %v4035_v33 = vrot.slane %v9290_v17, 5  ;;  %v2362_v9 = vld [vmem:[#allocation2 + $0x84] sm:$0xe] }
 0x1d6   : > { %v2464_v14 = vsel %vm9374_vm12, %v2462_v48, %v2463_v23  ;;  %v7065_v3 = vcombine.low %v2454_v7, %v2457_v5  ;;  %v2461_v32 = vsel %vm9374_vm12, %v7049_v34, %v2460_v59  ;;  %v4030_v55 = vrot.slane %v4028_v26, 4 }
 0x1d7   : > { %v4031_v1 = vrot.slane %v10570_v50, 5  ;;  %v7050_v12 = vrot.slane %v2360_v11, 9  ;;  %v2469_v56 = vrot.slane %v2467_v53, 4  ;;  %v4037_v61 = vrot.slane %v4035_v33, 4  ;;  %v8542_v11 = vld [vmem:[#allocation2 + $0x94] sm:$0xf] }
 0x1d8   : > { %v4038_v62 = vrot.slane %v9292_v4, 5  ;;  %v7066_v25 = vcombine.low %v2461_v32, %v2464_v14  ;;  %v4029_v17 = vsel %vm9374_vm12, %v7166_v37, %v4028_v26  ;;  %v2474_v0 = vrot.slane %v8538_v2, 5  ;;  %v2363_v26 = vld [vmem:[#allocation2 + $0x90] sm:$0xe]  ;;  %v8544_v50 = vld [vmem:[#allocation2 + $0x98] sm:$0x1] }
 0x1d9   : > { %7862 = vmatmul.mubr.msk.bf16.gmra.mrb[12].mxu1 %vm481_vm1, %v7180_v36  ;;  %v4032_v47 = vsel %vm9374_vm12, %v4030_v55, %v4031_v1  ;;  %7760 = vmatmul.mubr.msk.bf16.gmra.mrb[44].mxu0 %vm481_vm1, %v7065_v3  ;;  %v2470_v40 = vrot.slane %v8539_v18, 5  ;;  %v9533_v4 = vsel %vm9374_vm12, %v7167_v20, %v4035_v33  ;;  %v7051_v51 = vrot.slane %v2361_v10, 9  ;;  %v8543_v20 = vld [vmem:[#allocation2 + $0x8c] sm:$0x1]  ;;  %v8545_v10 = vld [vmem:[#allocation2 + $0xa0] sm:$0xf] }
 0x1da   : > { %7865 = vmatprep.mubr.msk.bf16.mxu1 %vm481_vm1, %v7181_v15  ;;  %v7183_v36 = vcombine.low %v4029_v17, %v4032_v47  ;;  %v4039_v39 = vsel %vm9374_vm12, %v4037_v61, %v4038_v62  ;;  %7763 = vmatprep.mubr.msk.bf16.mxu0 %vm481_vm1, %v7066_v25  ;;  %v2476_v45 = vrot.slane %v2474_v0, 4  ;;  %v2477_v58 = vrot.slane %v8540_v16, 5  ;;  %v8546_v18 = vld [vmem:[#allocation2 + $0xac] sm:$0xf]  ;;  %v2365_v16 = vld [vmem:[#allocation2 + $0xa8] sm:$0xe] }
 0x1db   : > { %v7184_v46 = vcombine.low %v9533_v4, %v4039_v39  ;;  %v2471_v22 = vsel %vm9374_vm12, %v2469_v56, %v2470_v40  ;;  %v7168_v8 = vrot.slane %v3904_v29, 9  ;;  %v4042_v43 = vrot.slane %v9304_v24, 5  ;;  %v2364_v4 = vld [vmem:[#allocation2 + $0x9c] sm:$0xe] }
 0x1dc   : > { %v2481_v59 = vrot.slane %v8541_v27, 5  ;;  %v7169_v60 = vrot.slane %v3905_v31, 9  ;;  %v4049_v19 = vrot.slane %v9323_v28, 5  ;;  %v2468_v54 = vsel %vm9374_vm12, %v7050_v12, %v2467_v53 }
 0x1dd   : > { %v2478_v21 = vsel %vm9374_vm12, %v2476_v45, %v2477_v58  ;;  %v4044_v34 = vrot.slane %v4042_v43, 4  ;;  %v4045_v41 = vrot.slane %v9307_v63, 5  ;;  %v7067_v5 = vcombine.low %v2468_v54, %v2471_v22 }
 0x1de   : > { %v2475_v48 = vsel %vm9374_vm12, %v7051_v51, %v2474_v0  ;;  %v4051_v24 = vrot.slane %v4049_v19, 4  ;;  %v4052_v23 = vrot.slane %v9325_v13, 5  ;;  %v4043_v28 = vsel %vm9374_vm12, %v7168_v8, %v4042_v43  ;;  %v8547_v43 = vld [vmem:[#allocation2 + $0xa4] sm:$0x1] }
 0x1df   : > { %v4046_v7 = vsel %vm9374_vm12, %v4044_v34, %v4045_v41  ;;  %v2483_v37 = vrot.slane %v2481_v59, 4  ;;  %v2488_v63 = vrot.slane %v8542_v11, 5  ;;  %v7068_v30 = vcombine.low %v2475_v48, %v2478_v21  ;;  %v8549_v34 = vld [vmem:[#allocation2 + $0xb8] sm:$0xf]  ;;  %v8550_v11 = vld [vmem:[#allocation2 + $0xbc] sm:$0x1] }
 0x1e0   : > { %v7185_v53 = vcombine.low %v4043_v28, %v4046_v7  ;;  %v4050_v15 = vsel %vm9374_vm12, %v7169_v60, %v4049_v19  ;;  %v4053_v13 = vsel %vm9374_vm12, %v4051_v24, %v4052_v23  ;;  %v7052_v14 = vrot.slane %v2362_v9, 9  ;;  %v8548_v19 = vld [vmem:[#allocation2 + $0xb0] sm:$0x1]  ;;  %v2366_v28 = vld [vmem:[#allocation2 + $0xb4] sm:$0xe] }
 0x1e1   : > { %7866 = vmatmul.mubr.msk.bf16.gmra.mrb[16].mxu1 %vm481_vm1, %v7182_v52  ;;  %v3907_v52 = vld [vmem:[#allocation2 + $0xc0] sm:$0xe]  ;;  %7764 = vmatmul.mubr.msk.bf16.gmra.mrb[48].mxu0 %vm481_vm1, %v7067_v5  ;;  %v2484_v33 = vrot.slane %v8543_v20, 5  ;;  %v7186_v3 = vcombine.low %v4050_v15, %v4053_v13  ;;  %v2490_v32 = vrot.slane %v2488_v63, 4  ;;  %v7053_v55 = vrot.slane %v2363_v26, 9  ;;  %v8483_v20 = vld [vmem:[#allocation2 + $0x30] sm:$0xff]  }
 0x1e2   : > { %7869 = vmatprep.mubr.msk.bf16.mxu1 %vm481_vm1, %v7183_v36  ;;  %7767 = vmatprep.mubr.msk.bf16.mxu0 %vm481_vm1, %v7068_v30  ;;  %v2491_v1 = vrot.slane %v8544_v50, 5  ;;  %v4056_v56 = vrot.slane %v9335_v6, 5  ;;  %v7171_v61 = vrot.slane %v3907_v52, 9  ;;  %v4063_v62 = vrot.slane %v9349_v49, 5  ;;  %v3906_v36 = vld [vmem:[#allocation2 + $0xb4] sm:$0xe] }
 0x1e3   : > { %v2485_v12 = vsel %vm9374_vm12, %v2483_v37, %v2484_v33  ;;  %v2495_v25 = vrot.slane %v8545_v10, 5  ;;  %v2482_v17 = vsel %vm9374_vm12, %v7052_v14, %v2481_v59  ;;  %v4066_v0 = vrot.slane %v9357_v42, 5  ;;  %v8482_v52 = vld [vmem:[#allocation2 + $0x24] sm:$0xff]   ;;  %v9611_v33 = vld [vmem:[%s10526_s3 + $0x10] sm:$0x3] }
 0x1e4   : > { %v2492_v47 = vsel %vm9374_vm12, %v2490_v32, %v2491_v1  ;;  %v4065_v2 = vrot.slane %v4063_v62, 4  ;;  %v7069_v29 = vcombine.low %v2482_v17, %v2485_v12  ;;  %v2502_v40 = vrot.slane %v8546_v18, 5  ;;  %v9617_v32 = vld [vmem:[#allocation2 + $0x1c] sm:$0xf] }
 0x1e5   : > { %v2489_v6 = vsel %vm9374_vm12, %v7053_v55, %v2488_v63  ;;  %v4058_v49 = vrot.slane %v4056_v56, 4  ;;  %v4064_v39 = vsel %vm9374_vm12, %v7171_v61, %v4063_v62  ;;  %v2497_v51 = vrot.slane %v2495_v25, 4  ;;  %v8484_v55 = vld [vmem:[#allocation2 + $0x3c] sm:$0xff]   ;;  %v4724_v61 = vld [vmem:[#allocation2 + $0x24] sm:$0xf] }
 0x1e6   : > { %v4067_v31 = vsel %vm9374_vm12, %v4065_v2, %v4066_v0  ;;  %v7070_v42 = vcombine.low %v2489_v6, %v2492_v47  ;;  %v4059_v58 = vrot.slane %v9342_v44, 5  ;;  %v2504_v22 = vrot.slane %v2502_v40, 4  ;;  %v9622_v62 = vld [vmem:[#allocation2 + $0x28] sm:$0xf]  ;;  %v4727_v2 = vld [vmem:[#allocation2 + $0x30] sm:$0xf] }
 0x1e7   : > { %v7188_v45 = vcombine.low %v4064_v39, %v4067_v31  ;;  %v7054_v8 = vrot.slane %v2364_v4, 9  ;;  %v2498_v27 = vrot.slane %v8547_v43, 5  ;;  %v7055_v60 = vrot.slane %v2365_v16, 9  ;;  %v8486_v4 = vld [vmem:[#allocation2 + $0x54] sm:$0xff]  }
 0x1e8   : > { %v4060_v59 = vsel %vm9374_vm12, %v4058_v49, %v4059_v58  ;;  %v2505_v54 = vrot.slane %v8548_v19, 5  ;;  %v2509_v41 = vrot.slane %v8549_v34, 5  ;;  %v7056_v26 = vrot.slane %v2366_v28, 9 }
 0x1e9   : > { %7870 = vmatmul.mubr.msk.bf16.gmra.mrb[20].mxu1 %vm481_vm1, %v7184_v46  ;;  %7768 = vmatmul.mubr.msk.bf16.gmra.mrb[52].mxu0 %vm481_vm1, %v7069_v29  ;;  %v7170_v46 = vrot.slane %v3906_v36, 9  ;;  %v2499_v21 = vsel %vm9374_vm12, %v2497_v51, %v2498_v27  ;;  %v2496_v9 = vsel %vm9374_vm12, %v7054_v8, %v2495_v25  ;;  %v2503_v23 = vsel %vm9374_vm12, %v7055_v60, %v2502_v40  ;;  %v9629_v40 = vld [vmem:[#allocation2 + $0x20] sm:$0x1]  ;;  %v4730_v60 = vld [vmem:[#allocation2 + $0x3c] sm:$0xf] }
 0x1ea   : > { %7873 = vmatprep.mubr.msk.bf16.mxu1 %vm481_vm1, %v7185_v53  ;;  %7771 = vmatprep.mubr.msk.bf16.mxu0 %vm481_vm1, %v7070_v42  ;;  %v2506_v5 = vsel %vm9374_vm12, %v2504_v22, %v2505_v54  ;;  %v7071_v24 = vcombine.low %v2496_v9, %v2499_v21  ;;  %v2511_v37 = vrot.slane %v2509_v41, 4  ;;  %v2512_v63 = vrot.slane %v8550_v11, 5  ;;  %v8481_v53 = vld [vmem:[#allocation2 + $0x18] sm:$0xff]   ;;  %v9632_v42 = vld [vmem:[#allocation2 + $0x34] sm:$0xf]  ;;  %v8487_v51 = vld [vmem:[#allocation2 + $0x60] sm:$0xff]  }
 0x1eb   : > { %v4057_v44 = vsel %vm9374_vm12, %v7170_v46, %v4056_v56  ;;  %v7072_v7 = vcombine.low %v2503_v23, %v2506_v5  ;;  %v2510_v15 = vsel %vm9374_vm12, %v7056_v26, %v2509_v41  ;;  %v5252_v14 = vsel %vm530_vm0, %v9426_v57, 0  ;;  %v8485_v56 = vld [vmem:[#allocation2 + $0x48] sm:$0xff]  }
 0x1ec   : > { %v7187_v48 = vcombine.low %v4057_v44, %v4060_v59  ;;  %v2513_v30 = vsel %vm9374_vm12, %v2511_v37, %v2512_v63  ;;  %v4779_v1 = vshll.u32 %v9617_v32, 16  ;;  %v4783_v12 = vshrl.u32 %v9617_v32, 16  ;;  %v9641_v21 = vld [vmem:[#allocation2 + $0x2c] sm:$0x1]  ;;  %v9644_v44 = vld [vmem:[#allocation2 + $0x38] sm:$0x1] }
 0x1ed   : > { %v7073_v13 = vcombine.low %v2510_v15, %v2513_v30  ;;  %v4794_v0 = vshrl.u32 %v4724_v61, 16  ;;  %v4797_v29 = vshll.u32 %v4724_v61, 16  ;;  %v4803_v36 = vshll.u32 %v9622_v62, 16  ;;  %v8488_v37 = vld [vmem:[#allocation2 + $0x6c] sm:$0xff]   ;;  %v4733_v63 = vld [vmem:[#allocation2 + $0x48] sm:$0xf] }
 0x1ee   : > { %v9625_v17 = vrot.slane %v4779_v1, 5  ;;  %v4785_v47 = vrot.slane %v4783_v12, 4  ;;  %v4807_v18 = vshrl.u32 %v9622_v62, 16  ;;  %v4818_v6 = vshrl.u32 %v4727_v2, 16  ;;  %v8489_v30 = vld [vmem:[#allocation2 + $0x78] sm:$0xff]  }
 0x1ef   : > { %v4821_v49 = vshll.u32 %v4727_v2, 16  ;;  %v4799_v16 = vrot.slane %v4797_v29, 5  ;;  %v9634_v46 = vrot.slane %v4803_v36, 5  ;;  %v4789_v22 = vshll.u32 %v9629_v40, 16  ;;  %v9670_v61 = vld [vmem:[#allocation2 + $0x44] sm:$0x1] }
 0x1f0   : > { %v4786_v31 = vor.u32 %v4785_v47, %v9625_v17  ;;  %v4809_v58 = vrot.slane %v4807_v18, 4  ;;  %v4820_v8 = vrot.slane %v4818_v6, 4  ;;  %v4827_v27 = vshll.u32 %v9632_v42, 16  ;;  %v4736_v36 = vld [vmem:[#allocation2 + $0x54] sm:$0xf]  ;;  %v8490_v18 = vld [vmem:[#allocation2 + $0x84] sm:$0xff]  }
 0x1f1   : > { %7874 = vmatmul.mubr.msk.bf16.gmra.mrb[24].mxu1 %vm481_vm1, %v7186_v3  ;;  %7772 = vmatmul.mubr.msk.bf16.gmra.mrb[56].mxu0 %vm481_vm1, %v7071_v24  ;;  %v4721_v3 = vld [vmem:[#allocation2 + $0x18] sm:$0xf]  ;;  %v4823_v43 = vrot.slane %v4821_v49, 5  ;;  %v4831_v59 = vshrl.u32 %v9632_v42, 16  ;;  %v4842_v5 = vshrl.u32 %v4730_v60, 16  ;;  %v4791_v9 = vrot.slane %v4789_v22, 5 }
 0x1f2   : > { %7877 = vmatprep.mubr.msk.bf16.mxu1 %vm481_vm1, %v7187_v48  ;;  %7775 = vmatprep.mubr.msk.bf16.mxu0 %vm481_vm1, %v7072_v7  ;;  %v4770_v50 = vshrl.u32 %v4721_v3, 16  ;;  %v4773_v57 = vshll.u32 %v4721_v3, 16  ;;  %v4787_v54 = vrot.slane %v4786_v31, 4  ;;  %v4810_v41 = vor.u32 %v4809_v58, %v9634_v46  ;;  %v9648_v7 = vld [vmem:[#allocation2 + $0x40] sm:$0xf] }
 0x1f3   : > { %v4845_v48 = vshll.u32 %v4730_v60, 16  ;;  %v4824_v24 = vor.u32 %v4823_v43, %v4820_v8  ;;  %v9646_v23 = vrot.slane %v4827_v27, 5  ;;  %v4833_v28 = vrot.slane %v4831_v59, 4  ;;  %v9689_v31 = vld [vmem:[#allocation2 + $0x58] sm:$0xf] }
 0x1f4   : > { %v4772_v10 = vrot.slane %v4770_v50, 4  ;;  %v4775_v25 = vrot.slane %v4773_v57, 5  ;;  %v4813_v11 = vshll.u32 %v9641_v21, 16  ;;  %v4855_v50 = vshrl.u32 %v9648_v7, 16  ;;  %v9696_v22 = vld [vmem:[#allocation2 + $0x64] sm:$0xf] }
 0x1f5   : > { %v4847_v3 = vrot.slane %v4845_v48, 5  ;;  %v9667_v57 = vrot.slane %v4824_v24, 4  ;;  %v4834_v1 = vor.u32 %v4833_v28, %v9646_v23  ;;  %v4866_v12 = vshrl.u32 %v4733_v63, 16  ;;  %v4742_v60 = vld [vmem:[#allocation2 + $0x6c] sm:$0xf] }
 0x1f6   : > { %v4776_v39 = vor.u32 %v4775_v25, %v4772_v10  ;;  %v4869_v10 = vshll.u32 %v4733_v63, 16  ;;  %v4890_v59 = vshrl.u32 %v4736_v36, 16  ;;  %v4923_v24 = vshll.u32 %v9696_v22, 16 }
 0x1f7   : > { %v4868_v58 = vrot.slane %v4866_v12, 4  ;;  %v4941_v63 = vshll.u32 %v4742_v60, 16 }
 0x1f8   : > { %v4777_v19 = vrot.slane %v4776_v39, 4  ;;  %v4857_v39 = vrot.slane %v4855_v50, 4  ;;  %v4871_v8 = vrot.slane %v4869_v10, 5 }
 0x1f9   : > { %7878 = vmatmul.mubr.msk.bf16.gmra.mrb[28].mxu1 %vm481_vm1, %v7188_v45  ;;  %7776 = vmatmul.mubr.msk.bf16.gmra.mrb[60].mxu0 %vm481_vm1, %v7073_v13  ;;  %v4796_v45 = vrot.slane %v4794_v0, 4  ;;  %v9658_v13 = vrot.slane %v4810_v41, 4  ;;  %v9682_v0 = vsel %vm530_vm0, %v9611_v33, 0  ;;  %v4903_v41 = vshrl.u32 %v9689_v31, 16 }
 0x1fa   : > { %7883 = vmatprep.mubr.msk.bf16.mxu1 %vm481_vm1, %v8481_v53  ;;  %v4782_v26 = vsel %vm8713_vm6, %v4777_v19, %v9625_v17  ;;  %v4792_v53 = vsel %vm8713_vm6, %v4787_v54, %v4791_v9  ;;  %v9700_v19 = vld [vmem:[#allocation2 + $0x50] sm:$0x1]  ;;  %v4893_v54 = vshll.u32 %v4736_v36, 16 }
 0x1fb   : > { %v4800_v34 = vor.u32 %v4799_v16, %v4796_v45  ;;  %v9674_v47 = vcombine.low %v4782_v26, %v4792_v53  ;;  %v8491_v45 = vld [vmem:[#allocation2 + $0x90] sm:$0xff]   ;;  %v4835_v16 = vrot.slane %v4834_v1, 4 }
 0x1fc   : > { %v9713_v26 = vld [vmem:[#allocation2 + $0x70] sm:$0xf] }
 0x1fd   : > { %v9656_v15 = vrot.slane %v4800_v34, 4  ;;  %v4899_v34 = vshll.u32 %v9689_v31, 16  ;;  %v4947_v12 = vshll.u32 %v9713_v26, 16  ;;  %v4951_v36 = vshrl.u32 %v9713_v26, 16 }
 0x1ff   : > { %v4806_v2 = vsel %vm8713_vm6, %v9656_v15, %v9634_v46  ;;  %v4861_v46 = vshll.u32 %v9670_v61, 16  ;;  %v4885_v15 = vshll.u32 %v9700_v19, 16 }
 0x201   : > { %7884 = vmatmul.mubr.msk.bf16.vlgmr.msra.gmra.mrb[0].mxu1 %vm481_vm1, %v8482_v52  ;;  %v4837_v52 = vshll.u32 %v9644_v44, 16 }
 0x202   : > { %7916 = vmatpush3.bf16.msra.mxu1 %v5252_v14  ;;  %7887 = vmatprep.mubr.msk.bf16.mxu1 %vm481_vm1, %v8483_v20  ;;  %v9661_v14 = vld [vmem:[#allocation2 + $0x4c] sm:$0xf]  ;;  %v4844_v20 = vrot.slane %v4842_v5, 4 }
 0x203   : > { %8412 = vmatprep.subr.msk.bf16.mxu1 %vm530_vm0, %v9611_v33  ;;  %v4875_v25 = vshll.u32 %v9661_v14, 16  ;;  %v4879_v17 = vshrl.u32 %v9661_v14, 16  ;;  %v4839_v29 = vrot.slane %v4837_v52, 5  ;;  %v4830_v33 = vsel %vm8713_vm6, %v9667_v57, %v9646_v23 }
 0x204   : > { %v4848_v49 = vor.u32 %v4847_v3, %v4844_v20  ;;  %v4927_v23 = vshrl.u32 %v9696_v22, 16  ;;  %v4895_v52 = vrot.slane %v4893_v54, 5  ;;  %v9717_v20 = vrot.slane %v4899_v34, 5 }
 0x205   : > { %v9698_v43 = vrot.slane %v4875_v25, 5  ;;  %v4881_v27 = vrot.slane %v4879_v17, 4  ;;  %v4840_v28 = vsel %vm8713_vm6, %v4835_v16, %v4839_v29  ;;  %v4905_v3 = vrot.slane %v4903_v41, 4  ;;  %v9724_v25 = vld [vmem:[#allocation2 + $0x5c] sm:$0x1] }
 0x206   : > { %v9705_v48 = vrot.slane %v4848_v49, 4  ;;  %v9719_v57 = vrot.slane %v4923_v24, 5  ;;  %v4929_v1 = vrot.slane %v4927_v23, 4  ;;  %v4943_v29 = vrot.slane %v4941_v63, 5  ;;  %v4745_v16 = vld [vmem:[#allocation2 + $0x78] sm:$0xf] }
 0x207   : > { %v4882_v53 = vor.u32 %v4881_v27, %v9698_v43  ;;  %v4953_v41 = vrot.slane %v4951_v36, 4 }
 0x208   : > { %v4930_v54 = vor.u32 %v4929_v1, %v9719_v57 }
 0x209   : > { %7888 = vmatmul.mubr.msk.bf16.gmra.mrb[4].mxu1 %vm481_vm1, %v8484_v55  ;;  %v4851_v55 = vshll.u32 %v9648_v7, 16 }
 0x20a   : > { %7891 = vmatprep.mubr.msk.bf16.mxu1 %vm481_vm1, %v8485_v56  ;;  %v4815_v56 = vrot.slane %v4813_v11, 5  ;;  %v4938_v11 = vshrl.u32 %v4742_v60, 16 }
 0x20c   : > { %v4816_v6 = vsel %vm8713_vm6, %v9658_v13, %v4815_v56  ;;  %v4892_v13 = vrot.slane %v4890_v59, 4  ;;  %v8492_v56 = vld [vmem:[#allocation2 + $0x9c] sm:$0xff]   ;;  %v4940_v17 = vrot.slane %v4938_v11, 4 }
 0x20d   : > { %v9722_v10 = vcombine.low %v4806_v2, %v4816_v6  ;;  %v8493_v2 = vld [vmem:[#allocation2 + $0xa8] sm:$0xff]   ;;  %v9735_v59 = vld [vmem:[#allocation2 + $0x7c] sm:$0xf] }
 0x20e   : > { %v4896_v27 = vor.u32 %v4895_v52, %v4892_v13  ;;  %v4944_v34 = vor.u32 %v4943_v29, %v4940_v17  ;;  %v4971_v23 = vshll.u32 %v9735_v59, 16  ;;  %v9762_v13 = vrot.slane %v4930_v54, 4  ;;  %v9778_v29 = vld [vmem:[#allocation2 + $0x80] sm:$0x1]  ;;  %v9808_v54 = vld [vmem:[#allocation2 + $0x88] sm:$0xf] }
 0x210   : > { %v9780_v36 = vrot.slane %v4971_v23, 5  ;;  %v5450_v23 = vld [vmem:[#allocation2 + $0x3c] sm:$0xe] }
 0x211   : > { %7892 = vmatmul.mubr.msk.bf16.gmra.mrb[8].mxu1 %vm481_vm1, %v8486_v4  ;;  %v9687_v4 = vrot.slane %v4851_v55, 5 }
 0x212   : > { %7895 = vmatprep.mubr.msk.bf16.mxu1 %vm481_vm1, %v8487_v51  ;;  %v4739_v51 = vld [vmem:[#allocation2 + $0x60] sm:$0xf] }
 0x213   : > { %v4914_v5 = vshrl.u32 %v4739_v51, 16  ;;  %v4917_v9 = vshll.u32 %v4739_v51, 16  ;;  %v4854_v49 = vsel %vm8713_vm6, %v9705_v48, %v9687_v4  ;;  %v4863_v51 = vrot.slane %v4861_v46, 5  ;;  %v9743_v46 = vld [vmem:[#allocation2 + $0x74] sm:$0x1] }
 0x214   : > { %v4965_v48 = vshll.u32 %v4745_v16, 16  ;;  %v4957_v52 = vshll.u32 %v9743_v46, 16 }
 0x215   : > { %v4916_v55 = vrot.slane %v4914_v5, 4  ;;  %v4919_v50 = vrot.slane %v4917_v9, 5  ;;  %v4962_v5 = vshrl.u32 %v4745_v16, 16  ;;  %v4909_v9 = vshll.u32 %v9724_v25, 16 }
 0x217   : > { %v4920_v60 = vor.u32 %v4919_v50, %v4916_v55  ;;  %v8494_v55 = vld [vmem:[#allocation2 + $0xb4] sm:$0xff]   ;;  %v9767_v50 = vrot.slane %v4944_v34, 4  ;;  %v9770_v1 = vrot.slane %v4962_v5, 4  ;;  %v9810_v34 = vld [vmem:[#allocation2 + $0x90] sm:$0xf] }
 0x219   : > { %7896 = vmatmul.mubr.msk.bf16.gmra.mrb[12].mxu1 %vm481_vm1, %v8488_v37  ;;  %v4858_v37 = vor.u32 %v4857_v39, %v9687_v4  ;;  %v9740_v4 = vrot.slane %v4947_v12, 5  ;;  %v9772_v12 = vrot.slane %v4965_v48, 5  ;;  %v5452_v48 = vld [vmem:[#allocation2 + $0x54] sm:$0xe] }
 0x21a   : > { %7899 = vmatprep.mubr.msk.bf16.mxu1 %vm481_vm1, %v8489_v30  ;;  %v4872_v30 = vor.u32 %v4871_v8, %v4868_v58  ;;  %v4883_v58 = vrot.slane %v4882_v53, 4  ;;  %v4887_v8 = vrot.slane %v4885_v15, 5  ;;  %v9760_v15 = vrot.slane %v4920_v60, 4 }
 0x21b   : > { %v4859_v39 = vrot.slane %v4858_v37, 4  ;;  %v9806_v60 = vrot.slane %v4957_v52, 5  ;;  %v5451_v52 = vld [vmem:[#allocation2 + $0x48] sm:$0xe] }
 0x21c   : > { %v4873_v6 = vrot.slane %v4872_v30, 4  ;;  %v4888_v63 = vsel %vm8713_vm6, %v4883_v58, %v4887_v8  ;;  %v9756_v30 = vrot.slane %v4896_v27, 4  ;;  %v5449_v8 = vld [vmem:[#allocation2 + $0x30] sm:$0xe]  ;;  %v5534_v27 = vrot.slane %v9648_v7, 5 }
 0x21d   : > { %v4864_v37 = vsel %vm8713_vm6, %v4859_v39, %v4863_v51  ;;  %v8495_v51 = vld [vmem:[#allocation2 + $0xc0] sm:$0xff]  }
 0x21e   : > { %v4878_v11 = vsel %vm8713_vm6, %v4873_v6, %v9698_v43  ;;  %v4954_v43 = vor.u32 %v4953_v41, %v9740_v4  ;;  %v9784_v16 = vcombine.low %v4854_v49, %v4864_v37  ;;  %v8496_v41 = vld [vmem:[#allocation2 + $0xcc] sm:$0xff]   ;;  %v5530_v6 = vrot.slane %v9644_v44, 5  ;;  %v5453_v37 = vld [vmem:[#allocation2 + $0x60] sm:$0xe]  ;;  %v5459_v44 = vld [vmem:[#allocation2 + $0xa8] sm:$0xe] }
 0x21f   : > { %v7276_v49 = vrot.slane %v5452_v48, 9  ;;  %v7277_v48 = vrot.slane %v5453_v37, 9 }
 0x220   : > { %v9817_v5 = vrot.slane %v4954_v43, 4  ;;  %v5541_v43 = vrot.slane %v9661_v14, 5 }
 0x221   : > { %7900 = vmatmul.mubr.msk.bf16.gmra.mrb[16].mxu1 %vm481_vm1, %v8490_v18  ;;  %v9727_v18 = vcombine.low %v4830_v33, %v4840_v28  ;;  %v4906_v33 = vor.u32 %v4905_v3, %v9717_v20  ;;  %v4975_v28 = vshrl.u32 %v9735_v59, 16  ;;  %v9765_v3 = vld [vmem:[#allocation2 + $0x84] sm:$0xf] }
 0x222   : > { %7903 = vmatprep.mubr.msk.bf16.mxu1 %vm481_vm1, %v8491_v45  ;;  %v9733_v45 = vld [vmem:[#allocation2 + $0x68] sm:$0x1]  ;;  %v4986_v58 = vshrl.u32 %v9765_v3, 16 }
 0x223   : > { %v4933_v24 = vshll.u32 %v9733_v45, 16  ;;  %v9758_v53 = vrot.slane %v4906_v33, 4  ;;  %v9782_v39 = vrot.slane %v4975_v28, 4  ;;  %v9942_v28 = vld [vmem:[#allocation2 + $0xb8] sm:$0xf] }
 0x225   : > { %v9776_v17 = vrot.slane %v4933_v24, 5  ;;  %v9822_v24 = vld [vmem:[#allocation2 + $0x94] sm:$0xf] }
 0x229   : > { %7904 = vmatmul.mubr.msk.bf16.gmra.mrb[20].mxu1 %vm481_vm1, %v8492_v56  ;;  %v9774_v56 = vrot.slane %v4909_v9, 5  ;;  %v5537_v9 = vrot.slane %v9670_v61, 5  ;;  %v5543_v61 = vrot.slane %v5541_v43, 4 }
 0x22a   : > { %7907 = vmatprep.mubr.msk.bf16.mxu1 %vm481_vm1, %v8493_v2  ;;  %v9786_v2 = vcombine.low %v4878_v11, %v4888_v63  ;;  %v7273_v11 = vrot.slane %v5449_v8, 9  ;;  %v5527_v63 = vrot.slane %v9632_v42, 5  ;;  %v7274_v8 = vrot.slane %v5450_v23, 9 }
 0x22b   : > { %v5536_v23 = vrot.slane %v5534_v27, 4 }
 0x22c   : > { %v9838_v42 = vsel %vm9374_vm12, %v7273_v11, %v5527_v63  ;;  %v5544_v11 = vrot.slane %v9700_v19, 5  ;;  %v9855_v7 = vsel %vm9374_vm12, %v7274_v8, %v5534_v27  ;;  %v5562_v8 = vrot.slane %v9713_v26, 5 }
 0x231   : > { %7908 = vmatmul.mubr.msk.bf16.gmra.mrb[24].mxu1 %vm481_vm1, %v8494_v55  ;;  %v9828_v55 = vrot.slane %v4986_v58, 4  ;;  %v5529_v58 = vrot.slane %v5527_v63, 4  ;;  %v5548_v63 = vrot.slane %v9689_v31, 5  ;;  %v9865_v31 = vsel %vm9374_vm12, %v5536_v23, %v5537_v9  ;;  %v9906_v9 = vld [vmem:[#allocation2 + $0xa0] sm:$0xf] }
 0x232   : > { %7911 = vmatprep.mubr.msk.bf16.mxu1 %vm481_vm1, %v8495_v51  ;;  %v7275_v51 = vrot.slane %v5451_v52, 9  ;;  %v9872_v52 = vsel %vm9374_vm12, %v5543_v61, %v5544_v11  ;;  %v5558_v11 = vrot.slane %v9733_v45, 5  ;;  %v5564_v61 = vrot.slane %v5562_v8, 4  ;;  %v5457_v45 = vld [vmem:[#allocation2 + $0x90] sm:$0xe] }
 0x233   : > { %v9846_v33 = vsel %vm9374_vm12, %v5529_v58, %v5530_v6  ;;  %v5454_v6 = vld [vmem:[#allocation2 + $0x6c] sm:$0xe]  ;;  %v5550_v19 = vrot.slane %v5548_v63, 4  ;;  %v5456_v58 = vld [vmem:[#allocation2 + $0x84] sm:$0xe] }
 0x234   : > { %v9859_v14 = vsel %vm9374_vm12, %v7275_v51, %v5541_v43  ;;  %v9876_v43 = vsel %vm9374_vm12, %v7276_v49, %v5548_v63  ;;  %v5455_v51 = vld [vmem:[#allocation2 + $0x78] sm:$0xe]  ;;  %v7278_v37 = vrot.slane %v5454_v6, 9  ;;  %v9893_v63 = vld [vmem:[#allocation2 + $0x8c] sm:$0x1]  ;;  %v5569_v6 = vrot.slane %v9735_v59, 5 }
 0x235   : > { %10571 = vst [vmem:[#allocation3_spill] sm:$0xff] %v9876_v43 }
 0x236   : > { %v9903_v23 = vsel %vm9374_vm12, %v7278_v37, %v5562_v8  ;;  %v9917_v37 = vld [vmem:[#allocation2 + $0x98] sm:$0x1]  ;;  %v9919_v8 = vld [vmem:[#allocation2 + $0xa4] sm:$0x1] }
 0x237   : > { %10575 = vst [vmem:[#allocation7_spill] sm:$0xff] %v9903_v23  ;;  %v9951_v23 = vld [vmem:[#allocation2 + $0xb0] sm:$0x1] }
 0x238   : > { %v5600_v43 = vrot.slane %v9951_v23, 5 }
 0x239   : > { %7912 = vmatmul.mubr.msk.bf16.gmra.mrb[28].mxu1 %vm481_vm1, %v8496_v41  ;;  %v5551_v41 = vrot.slane %v9724_v25, 5 }
 0x23a   : > { %7917 = vmatprep.mubr.msk.bf16.mxu1 %vm481_vm1, %v9674_v47  ;;  %v5555_v47 = vrot.slane %v9696_v22, 5 }
 0x23b   : > { %v9883_v25 = vsel %vm9374_vm12, %v5550_v19, %v5551_v41  ;;  %v5565_v19 = vrot.slane %v9743_v46, 5  ;;  %v7279_v41 = vrot.slane %v5455_v51, 9  ;;  %v5571_v51 = vrot.slane %v5569_v6, 4 }
 0x23c   : > { %10572 = vst [vmem:[#allocation4_spill] sm:$0xff] %v9883_v25  ;;  %v9890_v49 = vsel %vm9374_vm12, %v7277_v48, %v5555_v47  ;;  %v5557_v22 = vrot.slane %v5555_v47, 4  ;;  %v7280_v48 = vrot.slane %v5456_v58, 9  ;;  %v5576_v47 = vrot.slane %v9808_v54, 5  ;;  %v10606_v35 = vld [vmem:[#allocation3_spill] sm:$0xff] }
 0x23d   : > { %10573 = vst [vmem:[#allocation5_spill] sm:$0xff] %v9890_v49  ;;  %v9912_v59 = vsel %vm9374_vm12, %v5564_v61, %v5565_v19  ;;  %v9925_v46 = vsel %vm9374_vm12, %v7279_v41, %v5569_v6  ;;  %v5579_v19 = vrot.slane %v9893_v63, 5  ;;  %v7281_v41 = vrot.slane %v5457_v45, 9 }
 0x23e   : > { %v9899_v26 = vsel %vm9374_vm12, %v5557_v22, %v5558_v11  ;;  %10576 = vst [vmem:[#allocation8_spill] sm:$0xff] %v9912_v59  ;;  %v5572_v22 = vrot.slane %v9778_v29, 5  ;;  %v5458_v11 = vld [vmem:[#allocation2 + $0x9c] sm:$0xe]  ;;  %10577 = vst [vmem:[#allocation9_spill] sm:$0xff] %v9925_v46  ;;  %v5578_v61 = vrot.slane %v5576_v47, 4  ;;  %v9939_v58 = vsel %vm9374_vm12, %v7280_v48, %v5576_v47 }
 0x23f   : > { %10574 = vst [vmem:[#allocation6_spill] sm:$0xff] %v9899_v26  ;;  %10579 = vst [vmem:[#allocation11_spill] sm:$0xff] %v9939_v58  ;;  %v5583_v6 = vrot.slane %v9822_v24, 5  ;;  %v7282_v59 = vrot.slane %v5458_v11, 9  ;;  %v5593_v11 = vrot.slane %v9919_v8, 5 }
 0x240   : > { %v9935_v27 = vsel %vm9374_vm12, %v5571_v51, %v5572_v22  ;;  %v5590_v51 = vrot.slane %v9906_v9, 5  ;;  %v5460_v22 = vld [vmem:[#allocation2 + $0xb4] sm:$0xe]  ;;  %v9964_v26 = vld [vmem:[#allocation2 + $0xc4] sm:$0xf] }
 0x241   : > { %7918 = vmatmul.mubr.msk.bf16.vlgmr.msra.gmra.mrb[0].mxu1 %vm481_vm1, %v9722_v10  ;;  %v9931_v10 = vld [vmem:[#allocation2 + $0xac] sm:$0xf]  ;;  %10578 = vst [vmem:[#allocation10_spill] sm:$0xff] %v9935_v27  ;;  %v9957_v47 = vsel %vm9374_vm12, %v7281_v41, %v5583_v6  ;;  %v5585_v45 = vrot.slane %v5583_v6, 4  ;;  %v9960_v27 = vld [vmem:[#allocation2 + $0xbc] sm:$0x1] }
 0x242   : > { %7950 = vmatpush3.bf16.msra.mxu1 %v9682_v0  ;;  %7921 = vmatprep.mubr.msk.bf16.mxu1 %vm481_vm1, %v9727_v18  ;;  %v9948_v18 = vsel %vm9374_vm12, %v5578_v61, %v5579_v19  ;;  %v5586_v0 = vrot.slane %v9917_v37, 5  ;;  %v5592_v61 = vrot.slane %v5590_v51, 4  ;;  %v7283_v19 = vrot.slane %v5459_v44, 9  ;;  %v5461_v58 = vld [vmem:[#allocation2 + $0xc0] sm:$0xe] }
 0x243   : > { %10580 = vst [vmem:[#allocation12_spill] sm:$0xff] %v9948_v18  ;;  %v5597_v46 = vrot.slane %v9931_v10, 5  ;;  %v9972_v41 = vsel %vm9374_vm12, %v7282_v59, %v5590_v51  ;;  %v7284_v6 = vrot.slane %v5460_v22, 9  ;;  %v5604_v18 = vrot.slane %v9942_v28, 5 }
 0x244   : > { %v9968_v48 = vsel %vm9374_vm12, %v5585_v45, %v5586_v0  ;;  %10582 = vst [vmem:[#allocation14_spill] sm:$0xff] %v9972_v41  ;;  %v9979_v44 = vsel %vm9374_vm12, %v5592_v61, %v5593_v11  ;;  %v5462_v0 = vld [vmem:[#allocation2 + $0xcc] sm:$0xe]  ;;  %v9982_v45 = vld [vmem:[#allocation2 + $0xc8] sm:$0x1]  ;;  %v5607_v49 = vrot.slane %v9960_v27, 5 }
 0x245   : > { %10581 = vst [vmem:[#allocation13_spill] sm:$0xff] %v9968_v48  ;;  %10583 = vst [vmem:[#allocation15_spill] sm:$0xff] %v9979_v44  ;;  %v5599_v25 = vrot.slane %v5597_v46, 4  ;;  %v9988_v51 = vsel %vm9374_vm12, %v7283_v19, %v5597_v46  ;;  %v5606_v22 = vrot.slane %v5604_v18, 4  ;;  %v9993_v61 = vld [vmem:[#allocation2 + $0xd0] sm:$0xf]  ;;  %v10001_v48 = vsel %vm9374_vm12, %v7284_v6, %v5604_v18 }
 0x246   : > { %10584 = vst [vmem:[#allocation16_spill] sm:$0xff] %v9988_v51  ;;  %10586 = vst [vmem:[#allocation18_spill] sm:$0xff] %v10001_v48  ;;  %v7285_v59 = vrot.slane %v5461_v58, 9  ;;  %v5611_v46 = vrot.slane %v9964_v26, 5  ;;  %v10006_v19 = vld [vmem:[#allocation2 + $0xd4] sm:$0x1] }
 0x247   : > { %v9997_v11 = vsel %vm9374_vm12, %v5599_v25, %v5600_v43  ;;  %v10012_v44 = vsel %vm9374_vm12, %v5606_v22, %v5607_v49  ;;  %v7286_v43 = vrot.slane %v5462_v0, 9  ;;  %v5618_v25 = vrot.slane %v9993_v61, 5 }
 0x248   : > { %10585 = vst [vmem:[#allocation17_spill] sm:$0xff] %v9997_v11  ;;  %10587 = vst [vmem:[#allocation19_spill] sm:$0xff] %v10012_v44  ;;  %v5613_v18 = vrot.slane %v5611_v46, 4  ;;  %v5614_v6 = vrot.slane %v9982_v45, 5  ;;  %v10588_v11 = vshll.u32 %v9765_v3, 16  ;;  %v10589_v58 = vshll.u32 %v9808_v54, 16 }
 0x249   : > { %7922 = vmatmul.mubr.msk.bf16.gmra.mrb[4].mxu1 %vm481_vm1, %v9784_v16  ;;  %v4960_v16 = vsel %vm8713_vm6, %v9817_v5, %v9806_v60  ;;  %v10027_v0 = vsel %vm9374_vm12, %v7286_v43, %v5618_v25  ;;  %v5620_v22 = vrot.slane %v5618_v25, 4  ;;  %v10590_v48 = vshrl.u32 %v9808_v54, 16  ;;  %v4754_v25 = vld [vmem:[#allocation2 + $0x9c] sm:$0xf] }
 0x24a   : > { %7925 = vmatprep.mubr.msk.bf16.mxu1 %vm481_vm1, %v9786_v2  ;;  %v5621_v2 = vrot.slane %v10006_v19, 5  ;;  %v4991_v49 = vrot.slane %v10588_v11, 5  ;;  %v10031_v44 = vrot.slane %v10589_v58, 5  ;;  %v10037_v41 = vsel %vm9374_vm12, %v7285_v59, %v5611_v46 }
 0x24b   : > { %v5001_v51 = vrot.slane %v10590_v48, 4  ;;  %v10041_v3 = vsel %vm9374_vm12, %v5613_v18, %v5614_v6  ;;  %v10591_v60 = vshrl.u32 %v9810_v34, 16  ;;  %v10592_v11 = vshll.u32 %v9810_v34, 16 }
 0x24c   : > { %v7302_v58 = vcombine.low %v10037_v41, %v10041_v3  ;;  %v10051_v54 = vsel %vm9374_vm12, %v5620_v22, %v5621_v2  ;;  %v10593_v48 = vsel %vm8713_vm6, %v9758_v53, %v9774_v56  ;;  %v10594_v59 = vsel %vm8713_vm6, %v9756_v30, %v9717_v20 }
 0x24d   : > { %v5012_v5 = vrot.slane %v10591_v60, 4  ;;  %v5015_v43 = vrot.slane %v10592_v11, 5  ;;  %v7244_v34 = vcombine.low %v10594_v59, %v10593_v48  ;;  %v10595_v46 = vshll.u32 %v9822_v24, 16 }
 0x24e   : > { %v10596_v6 = vshrl.u32 %v9822_v24, 16  ;;  %v7303_v2 = vcombine.low %v10027_v0, %v10051_v54  ;;  %v10597_v53 = vsel %vm8713_vm6, %v9762_v13, %v9776_v17  ;;  %v10598_v20 = vsel %vm8713_vm6, %v9760_v15, %v9719_v57  ;;  %v4757_v13 = vld [vmem:[#allocation2 + $0xa8] sm:$0xf] }
 0x24f   : > { %v10065_v18 = vrot.slane %v10595_v46, 5  ;;  %v7245_v30 = vcombine.low %v10598_v20, %v10597_v53  ;;  %v10599_v56 = vsel %vm8713_vm6, %v9767_v50, %v9740_v4  ;;  %v10600_v22 = vor.u32 %v9772_v12, %v9770_v1  ;;  %v6004_v50 = vld [vmem:[%s10528_s5] sm:$0x3] }
 0x250   : > { %v5025_v60 = vrot.slane %v10596_v6, 4  ;;  %v7246_v24 = vcombine.low %v10599_v56, %v4960_v16  ;;  %v10601_v48 = vshll.u32 %v9778_v29, 16  ;;  %v10602_v57 = vor.u32 %v9782_v39, %v9780_v36  ;;  %8413 = vmatprep.subr.msk.bf16.mxu0 %vm530_vm0, %v6004_v50 }
 0x251   : > { %v4969_v11 = vrot.slane %v10600_v22, 4  ;;  %7926 = vmatmul.mubr.msk.bf16.gmra.mrb[8].mxu1 %vm481_vm1, %v7244_v34  ;;  %v4992_v17 = vor.u32 %v4991_v49, %v9828_v55  ;;  %v5002_v46 = vor.u32 %v5001_v51, %v10031_v44  ;;  %v5034_v4 = vshrl.u32 %v4754_v25, 16 }
 0x252   : > { %v4983_v59 = vrot.slane %v10601_v48, 5  ;;  %v4979_v15 = vrot.slane %v10602_v57, 4  ;;  %7929 = vmatprep.mubr.msk.bf16.mxu1 %vm481_vm1, %v7245_v30  ;;  %v5016_v1 = vor.u32 %v5015_v43, %v5012_v5  ;;  %v5037_v12 = vshll.u32 %v4754_v25, 16 }
 0x253   : > { %v5043_v29 = vshll.u32 %v9906_v9, 16  ;;  %v6061_v39 = vsel %vm530_vm0, %v6004_v50, 0  ;;  %v5026_v16 = vor.u32 %v5025_v60, %v10065_v18  ;;  %v5047_v55 = vshrl.u32 %v9906_v9, 16 }
 0x254   : > { %v5058_v51 = vshrl.u32 %v4757_v13, 16  ;;  %v5061_v49 = vshll.u32 %v4757_v13, 16  ;;  %7984 = vmatpush3.bf16.msra.mxu0 %v6061_v39  ;;  %v4974_v34 = vsel %vm8713_vm6, %v4969_v11, %v9780_v36  ;;  %v5005_v5 = vshll.u32 %v9893_v63, 16  ;;  %v4760_v39 = vld [vmem:[#allocation2 + $0xb4] sm:$0xf] }
 0x255   : > { %v5067_v43 = vshll.u32 %v9931_v10, 16  ;;  %v5071_v25 = vshrl.u32 %v9931_v10, 16  ;;  %v4984_v6 = vsel %vm8713_vm6, %v4979_v15, %v4983_v59  ;;  %v4993_v53 = vrot.slane %v4992_v17, 4 }
 0x256   : > { %v5003_v60 = vrot.slane %v5002_v46, 4  ;;  %v5029_v9 = vshll.u32 %v9917_v37, 16  ;;  %v5017_v20 = vrot.slane %v5016_v1, 4  ;;  %v5036_v30 = vrot.slane %v5034_v4, 4  ;;  %v4763_v1 = vld [vmem:[#allocation2 + $0xc0] sm:$0xf] }
 0x257   : > { %v5039_v56 = vrot.slane %v5037_v12, 5  ;;  %v10115_v22 = vrot.slane %v5043_v29, 5  ;;  %v5027_v48 = vrot.slane %v5026_v16, 4  ;;  %v5049_v36 = vrot.slane %v5047_v55, 4 }
 0x258   : > { %v5060_v11 = vrot.slane %v5058_v51, 4  ;;  %v5063_v63 = vrot.slane %v5061_v49, 5  ;;  %v7247_v13 = vcombine.low %v4974_v34, %v4984_v6  ;;  %v5007_v57 = vrot.slane %v5005_v5, 5 }
 0x259   : > { %v10117_v50 = vrot.slane %v5067_v43, 5  ;;  %v5073_v10 = vrot.slane %v5071_v25, 4  ;;  %7930 = vmatmul.mubr.msk.bf16.gmra.mrb[12].mxu1 %vm481_vm1, %v7246_v24  ;;  %v4998_v37 = vsel %vm8713_vm6, %v4993_v53, %v10031_v44  ;;  %v5031_v59 = vrot.slane %v5029_v9, 5 }
 0x25a   : > { %7933 = vmatprep.mubr.msk.bf16.mxu1 %vm481_vm1, %v7247_v13  ;;  %v5008_v15 = vsel %vm8713_vm6, %v5003_v60, %v5007_v57  ;;  %v5022_v17 = vsel %vm8713_vm6, %v5017_v20, %v10065_v18  ;;  %v5040_v46 = vor.u32 %v5039_v56, %v5036_v30  ;;  %v5053_v4 = vshll.u32 %v9919_v8, 16  ;;  %v4766_v56 = vld [vmem:[#allocation2 + $0xcc] sm:$0xf] }
 0x25b   : > { %v5032_v24 = vsel %vm8713_vm6, %v5027_v48, %v5031_v59  ;;  %v5050_v12 = vor.u32 %v5049_v36, %v10115_v22  ;;  %v5064_v44 = vor.u32 %v5063_v63, %v5060_v11  ;;  %v5082_v29 = vshrl.u32 %v4760_v39, 16 }
 0x25c   : > { %v5074_v16 = vor.u32 %v5073_v10, %v10117_v50  ;;  %v5085_v55 = vshll.u32 %v4760_v39, 16  ;;  %v5091_v51 = vshll.u32 %v9942_v28, 16  ;;  %v5095_v49 = vshrl.u32 %v9942_v28, 16 }
 0x25d   : > { %v5106_v34 = vshrl.u32 %v4763_v1, 16  ;;  %v5109_v18 = vshll.u32 %v4763_v1, 16  ;;  %v5115_v5 = vshll.u32 %v9964_v26, 16  ;;  %v5119_v8 = vshrl.u32 %v9964_v26, 16 }
 0x25e   : > { %v7248_v43 = vcombine.low %v4998_v37, %v5008_v15  ;;  %v7249_v25 = vcombine.low %v5022_v17, %v5032_v24  ;;  %v5041_v6 = vrot.slane %v5040_v46, 4  ;;  %v5055_v53 = vrot.slane %v5053_v4, 5 }
 0x25f   : > { %v5051_v60 = vrot.slane %v5050_v12, 4  ;;  %v5065_v9 = vrot.slane %v5064_v44, 4  ;;  %v5077_v20 = vshll.u32 %v9951_v23, 16  ;;  %v5084_v30 = vrot.slane %v5082_v29, 4 }
 0x260   : > { %v5075_v48 = vrot.slane %v5074_v16, 4  ;;  %v5087_v36 = vrot.slane %v5085_v55, 5  ;;  %v5093_v11 = vrot.slane %v5091_v51, 5  ;;  %v5097_v28 = vrot.slane %v5095_v49, 4 }
 0x261   : > { %7934 = vmatmul.mubr.msk.bf16.gmra.mrb[16].mxu1 %vm481_vm1, %v7248_v43  ;;  %v5108_v63 = vrot.slane %v5106_v34, 4  ;;  %v5111_v13 = vrot.slane %v5109_v18, 5  ;;  %v5117_v57 = vrot.slane %v5115_v5, 5  ;;  %v5121_v26 = vrot.slane %v5119_v8, 4 }
 0x262   : > { %7937 = vmatprep.mubr.msk.bf16.mxu1 %vm481_vm1, %v7249_v25  ;;  %v5130_v10 = vshrl.u32 %v4766_v56, 16  ;;  %v5133_v39 = vshll.u32 %v4766_v56, 16  ;;  %v5139_v37 = vshll.u32 %v9993_v61, 16  ;;  %v5143_v23 = vshrl.u32 %v9993_v61, 16 }
 0x263   : > { %v5046_v59 = vsel %vm8713_vm6, %v5041_v6, %v10115_v22  ;;  %v5079_v15 = vrot.slane %v5077_v20, 5  ;;  %v5056_v17 = vsel %vm8713_vm6, %v5051_v60, %v5055_v53  ;;  %v5088_v46 = vor.u32 %v5087_v36, %v5084_v30 }
 0x264   : > { %v5098_v4 = vor.u32 %v5097_v28, %v5093_v11  ;;  %v5101_v1 = vshll.u32 %v9960_v27, 16  ;;  %v5070_v24 = vsel %vm8713_vm6, %v5065_v9, %v10117_v50  ;;  %v5112_v61 = vor.u32 %v5111_v13, %v5108_v63  ;;  %v5447_v63 = vld [vmem:[#allocation2 + $0x18] sm:$0xe] }
 0x265   : > { %v5080_v12 = vsel %vm8713_vm6, %v5075_v48, %v5079_v15  ;;  %v5122_v44 = vor.u32 %v5121_v26, %v5117_v57  ;;  %v5132_v29 = vrot.slane %v5130_v10, 4  ;;  %v5135_v16 = vrot.slane %v5133_v39, 5 }
 0x266   : > { %v5141_v22 = vrot.slane %v5139_v37, 5  ;;  %v5145_v55 = vrot.slane %v5143_v23, 4  ;;  %v7250_v51 = vcombine.low %v5046_v59, %v5056_v17  ;;  %v5125_v49 = vshll.u32 %v9982_v45, 16  ;;  %v5448_v59 = vld [vmem:[#allocation2 + $0x24] sm:$0xe] }
 0x267   : > { %v7251_v34 = vcombine.low %v5070_v24, %v5080_v12  ;;  %v5089_v18 = vrot.slane %v5088_v46, 4  ;;  %v5099_v5 = vrot.slane %v5098_v4, 4  ;;  %v5113_v27 = vrot.slane %v5112_v61, 4  ;;  %v10607_v12 = vld [vmem:[#allocation4_spill] sm:$0xff] }
 0x268   : > { %v5123_v8 = vrot.slane %v5122_v44, 4  ;;  %v5103_v50 = vrot.slane %v5101_v1, 5  ;;  %v5136_v43 = vor.u32 %v5135_v16, %v5132_v29  ;;  %v5146_v25 = vor.u32 %v5145_v55, %v5141_v22  ;;  %v10609_v44 = vld [vmem:[#allocation5_spill] sm:$0xff]  ;;  %v10610_v29 = vld [vmem:[#allocation6_spill] sm:$0xff] }
 0x269   : > { %7938 = vmatmul.mubr.msk.bf16.gmra.mrb[20].mxu1 %vm481_vm1, %v7250_v51  ;;  %v5149_v6 = vshll.u32 %v10006_v19, 16  ;;  %v5127_v53 = vrot.slane %v5125_v49, 5  ;;  %v5094_v60 = vsel %vm8713_vm6, %v5089_v18, %v5093_v11  ;;  %v5118_v9 = vsel %vm8713_vm6, %v5113_v27, %v5117_v57  ;;  %v10616_v51 = vld [vmem:[#allocation10_spill] sm:$0xff]  ;;  %v10618_v27 = vld [vmem:[#allocation11_spill] sm:$0xff] }
 0x26a   : > { %7941 = vmatprep.mubr.msk.bf16.mxu1 %vm481_vm1, %v7251_v34  ;;  %v5104_v45 = vsel %vm8713_vm6, %v5099_v5, %v5103_v50  ;;  %v5513_v30 = vrot.slane %v9617_v32, 5  ;;  %v5137_v56 = vrot.slane %v5136_v43, 4  ;;  %v5147_v48 = vrot.slane %v5146_v25, 4  ;;  %v10621_v25 = vld [vmem:[#allocation13_spill] sm:$0xff] }
 0x26b   : > { %v5128_v20 = vsel %vm8713_vm6, %v5123_v8, %v5127_v53  ;;  %v5151_v36 = vrot.slane %v5149_v6, 5  ;;  %v7252_v28 = vcombine.low %v5094_v60, %v5104_v45  ;;  %v7271_v26 = vrot.slane %v5447_v63, 9  ;;  %v10619_v8 = vld [vmem:[#allocation12_spill] sm:$0xff] }
 0x26c   : > { %v7253_v19 = vcombine.low %v5118_v9, %v5128_v20  ;;  %v5515_v11 = vrot.slane %v5513_v30, 4  ;;  %v5142_v13 = vsel %vm8713_vm6, %v5137_v56, %v5141_v22  ;;  %v5516_v32 = vrot.slane %v9629_v40, 5  ;;  %v10613_v22 = vld [vmem:[#allocation8_spill] sm:$0xff]  ;;  %v10623_v9 = vld [vmem:[#allocation14_spill] sm:$0xff]  ;;  %v10624_v20 = vld [vmem:[#allocation15_spill] sm:$0xff] }
 0x26d   : > { %v5152_v57 = vsel %vm8713_vm6, %v5147_v48, %v5151_v36  ;;  %v5520_v10 = vrot.slane %v9622_v62, 5  ;;  %v5514_v23 = vsel %vm9374_vm12, %v7271_v26, %v5513_v30  ;;  %v7272_v38 = vrot.slane %v5448_v59, 9  ;;  %v10626_v48 = vld [vmem:[#allocation16_spill] sm:$0xff]  ;;  %v10627_v36 = vld [vmem:[#allocation17_spill] sm:$0xff] }
 0x26e   : > { %v7254_v39 = vcombine.low %v5142_v13, %v5152_v57  ;;  %v5517_v37 = vsel %vm9374_vm12, %v5515_v11, %v5516_v32  ;;  %v5523_v46 = vrot.slane %v9641_v21, 5  ;;  %v10603_v1 = vcombine.low %v9838_v42, %v9846_v33  ;;  %v10629_v11 = vld [vmem:[#allocation18_spill] sm:$0xff]  ;;  %v10630_v13 = vld [vmem:[#allocation19_spill] sm:$0xff] }
 0x26f   : > { %v7288_v15 = vcombine.low %v5514_v23, %v5517_v37  ;;  %v5522_v17 = vrot.slane %v5520_v10, 4  ;;  %v5521_v40 = vsel %vm9374_vm12, %v7272_v38, %v5520_v10  ;;  %v10604_v24 = vcombine.low %v9855_v7, %v9865_v31  ;;  %v10612_v31 = vld [vmem:[#allocation7_spill] sm:$0xff] }
 0x270   : > { %v10605_v21 = vcombine.low %v9859_v14, %v9872_v52  ;;  %v10608_v61 = vcombine.low %v10606_v35, %v10607_v12  ;;  %v10611_v33 = vcombine.low %v10609_v44, %v10610_v29  ;;  %v10614_v55 = vcombine.low %v10612_v31, %v10613_v22  ;;  %v10615_v52 = vld [vmem:[#allocation9_spill] sm:$0xff] }
 0x271   : > { %7942 = vmatmul.mubr.msk.bf16.gmra.mrb[24].mxu1 %vm481_vm1, %v7252_v28  ;;  %v5524_v62 = vsel %vm9374_vm12, %v5522_v17, %v5523_v46  ;;  %v10617_v49 = vcombine.low %v10615_v52, %v10616_v51  ;;  %v10620_v50 = vcombine.low %v10618_v27, %v10619_v8  ;;  %v10622_v6 = vcombine.low %v9957_v47, %v10621_v25 }
 0x272   : > { %7945 = vmatprep.mubr.msk.bf16.mxu1 %vm481_vm1, %v7253_v19  ;;  %v7289_v4 = vcombine.low %v5521_v40, %v5524_v62  ;;  %v10625_v30 = vcombine.low %v10623_v9, %v10624_v20  ;;  %v10628_v28 = vcombine.low %v10626_v48, %v10627_v36  ;;  %v10631_v57 = vcombine.low %v10629_v11, %v10630_v13  ;;  %v6256_v62 = vld [vmem:[%s10530_s7] sm:$0x3] }
 0x273   : > { %8414 = vmatprep.subr.msk.bf16.mxu0 %vm530_vm0, %v6256_v62 }
 0x279   : > { %7946 = vmatmul.mubr.msk.bf16.gmra.mrb[28].mxu1 %vm481_vm1, %v7254_v39 }
 0x27a   : > { %7951 = vmatprep.mubr.msk.bf16.mxu1 %vm481_vm1, %v7288_v15 }
 0x281   : > { %7952 = vmatmul.mubr.msk.bf16.vlgmr.msra.gmra.mrb[0].mxu1 %vm481_vm1, %v7289_v4  ;;  %v10298_v4 = vld [vmem:[%s10527_s4] ss:$0 sm:$0xff] }
 0x282   : > { %7955 = vmatprep.mubr.msk.bf16.mxu1 %vm481_vm1, %v10603_v1 }
 0x289   : > { %7956 = vmatmul.mubr.msk.bf16.gmra.mrb[4].mxu1 %vm481_vm1, %v10604_v24 }
 0x28a   : > { %7959 = vmatprep.mubr.msk.bf16.mxu1 %vm481_vm1, %v10605_v21 }
 0x291   : > { %7960 = vmatmul.mubr.msk.bf16.gmra.mrb[8].mxu1 %vm481_vm1, %v10608_v61 }
 0x292   : > { %7963 = vmatprep.mubr.msk.bf16.mxu1 %vm481_vm1, %v10611_v33 }
 0x294   : > { %v7749_v42 = vpop.f32.mrb[32].mxu0 }
 0x295   : > { %v2649_v16 = vpop.f32.mrb[33].mxu0 }
 0x296   : > { %v7750_v7 = vpop.f32.mrb[34].mxu0 }
 0x297   : > { %v2652_v14 = vpop.f32.mrb[35].mxu0 }
 0x299   : > { %7964 = vmatmul.mubr.msk.bf16.gmra.mrb[12].mxu1 %vm481_vm1, %v10614_v55 }
 0x29a   : > { %7967 = vmatprep.mubr.msk.bf16.mxu1 %vm481_vm1, %v10617_v49 }
 0x29c   : > { %v7753_v34 = vpop.f32.mrb[36].mxu0 }
 0x29d   : > { %v2665_v18 = vpop.f32.mrb[37].mxu0 }
 0x29e   : > { %v7754_v5 = vpop.f32.mrb[38].mxu0 }
 0x29f   : > { %v2668_v43 = vpop.f32.mrb[39].mxu0 }
 0x2a1   : > { %7968 = vmatmul.mubr.msk.bf16.gmra.mrb[16].mxu1 %vm481_vm1, %v10620_v50 }
 0x2a2   : > { %7971 = vmatprep.mubr.msk.bf16.mxu1 %vm481_vm1, %v10622_v6 }
 0x2a4   : > { %v10223_v53 = vpop.f32.mrb[40].mxu0 }
 0x2a5   : > { %v10225_v60 = vpop.f32.mrb[41].mxu0 }
 0x2a6   : > { %v10227_v45 = vpop.f32.mrb[42].mxu0 }
 0x2a7   : > { %v10233_v56 = vpop.f32.mrb[43].mxu0 }
 0x2a9   : > { %7972 = vmatmul.mubr.msk.bf16.gmra.mrb[20].mxu1 %vm481_vm1, %v10625_v30 }
 0x2aa   : > { %7975 = vmatprep.mubr.msk.bf16.mxu1 %vm481_vm1, %v10628_v28 }
 0x2ac   : > { %v10239_v47 = vpop.f32.mrb[44].mxu0 }
 0x2ad   : > { %v10241_v19 = vpop.f32.mrb[45].mxu0 }
 0x2ae   : > { %v10243_v63 = vpop.f32.mrb[46].mxu0 }
 0x2af   : > { %v10249_v26 = vpop.f32.mrb[47].mxu0 }
 0x2b1   : > { %7976 = vmatmul.mubr.msk.bf16.gmra.mrb[24].mxu1 %vm481_vm1, %v10631_v57 }
 0x2b2   : > { %7979 = vmatprep.mubr.msk.bf16.mxu1 %vm481_vm1, %v7302_v58 }
 0x2b4   : > { %v10255_v32 = vpop.f32.mrb[48].mxu0 }
 0x2b5   : > { %v10257_v10 = vpop.f32.mrb[49].mxu0 }
 0x2b6   : > { %v10259_v39 = vpop.f32.mrb[50].mxu0 }
 0x2b7   : > { %v10265_v37 = vpop.f32.mrb[51].mxu0 }
 0x2b9   : > { %7980 = vmatmul.mubr.msk.bf16.gmra.mrb[28].mxu1 %vm481_vm1, %v7303_v2 }
 0x2bc   : > { %v10267_v23 = vpop.f32.mrb[52].mxu0 }
 0x2bd   : > { %v10269_v59 = vpop.f32.mrb[53].mxu0 }
 0x2be   : > { %v10271_v41 = vpop.f32.mrb[54].mxu0 }
 0x2bf   : > { %v10273_v3 = vpop.f32.mrb[55].mxu0 }
 0x2c4   : > { %v10275_v58 = vpop.f32.mrb[56].mxu0 }
 0x2c5   : > { %v10277_v15 = vpop.f32.mrb[57].mxu0 }
 0x2c6   : > { %v10279_v17 = vpop.f32.mrb[58].mxu0 }
 0x2c7   : > { %v10281_v38 = vpop.f32.mrb[59].mxu0 }
 0x2cc   : > { %v10283_v0 = vpop.f32.mrb[60].mxu0 }
 0x2cd   : > { %v10285_v54 = vpop.f32.mrb[61].mxu0 }
 0x2ce   : > { %v10287_v2 = vpop.f32.mrb[62].mxu0 }
 0x2cf   : > { %v10289_v46 = vpop.f32.mrb[63].mxu0 }
 0x354   : > { %v7953_v40 = vpop.f32.mrb[0].mxu1 }
 0x355   : > { %v8051_v1 = vadd.f32 %v7953_v40, %v7749_v42  ;;  %v5758_v24 = vpop.f32.mrb[1].mxu1 }
 0x356   : > { %v8052_v21 = vadd.f32 %v5758_v24, %v2649_v16  ;;  %v7954_v35 = vpop.f32.mrb[2].mxu1 }
 0x357   : > { %v5926_v12 = vadd.f32 %v8051_v1, %v10298_v4  ;;  %v8053_v61 = vadd.f32 %v7954_v35, %v7750_v7  ;;  %v5761_v44 = vpop.f32.mrb[3].mxu1 }
 0x358   : > { %v5924_v29 = vadd.f32 %v8052_v21, %v10298_v4  ;;  %v8054_v33 = vadd.f32 %v5761_v44, %v2652_v14  ;;  %v6393_v14 = vsel %vm530_vm0, %v6256_v62, 0 }
 0x359   : > { %v5927_v31 = vadd.f32 %v8053_v61, %v10298_v4  ;;  %v5958_v55 = vmax.f32 %v5926_v12, 0.0 }
 0x35a   : > { %v5925_v22 = vadd.f32 %v8054_v33, %v10298_v4  ;;  %v5956_v51 = vmax.f32 %v5924_v29, 0.0 }
 0x35b   : > { %v5959_v52 = vmax.f32 %v5927_v31, 0.0 }
 0x35c   : > { %v5957_v49 = vmax.f32 %v5925_v22, 0.0  ;;  %v7957_v27 = vpop.f32.mrb[4].mxu1 }
 0x35d   : > { %v5989_v42 = vpack.c.bf16 %v5959_v52, %v5958_v55  ;;  %v8055_v8 = vadd.f32 %v7957_v27, %v7753_v34  ;;  %v5774_v16 = vpop.f32.mrb[5].mxu1 }
 0x35e   : > { %v5988_v50 = vpack.c.bf16 %v5957_v49, %v5956_v51  ;;  %v8056_v25 = vadd.f32 %v5774_v16, %v2665_v18  ;;  %v7958_v6 = vpop.f32.mrb[6].mxu1 }
 0x35f   : > { %v5930_v7 = vadd.f32 %v8055_v8, %v10298_v4  ;;  %v8057_v9 = vadd.f32 %v7958_v6, %v7754_v5  ;;  %v5777_v20 = vpop.f32.mrb[7].mxu1 }
 0x360   : > { %v5928_v30 = vadd.f32 %v8056_v25, %v10298_v4  ;;  %v8058_v48 = vadd.f32 %v5777_v20, %v2668_v43  ;;  %7985 = vmatprep.mubr.msk.bf16.mxu0 %vm481_vm1, %v5988_v50 }
 0x361   : > { %v5931_v36 = vadd.f32 %v8057_v9, %v10298_v4  ;;  %7986 = vmatmul.mubr.msk.bf16.vlgmr.msra.gmra.mrb[64].mxu0 %vm481_vm1, %v5989_v42  ;;  %v5962_v18 = vmax.f32 %v5930_v7, 0.0 }
 0x362   : > { %v5929_v34 = vadd.f32 %v8058_v48, %v10298_v4  ;;  %8018 = vmatpush3.bf16.msra.mxu0 %v6393_v14  ;;  %v5960_v11 = vmax.f32 %v5928_v30, 0.0 }
 0x363   : > { %v5963_v28 = vmax.f32 %v5931_v36, 0.0 }
 0x364   : > { %v5961_v13 = vmax.f32 %v5929_v34, 0.0  ;;  %v7961_v5 = vpop.f32.mrb[8].mxu1 }
 0x365   : > { %v5991_v57 = vpack.c.bf16 %v5963_v28, %v5962_v18  ;;  %v8059_v62 = vadd.f32 %v7961_v5, %v10223_v53  ;;  %v5790_v40 = vpop.f32.mrb[9].mxu1 }
 0x366   : > { %v5990_v1 = vpack.c.bf16 %v5961_v13, %v5960_v11  ;;  %v8060_v43 = vadd.f32 %v5790_v40, %v10225_v60  ;;  %v7962_v24 = vpop.f32.mrb[10].mxu1 }
 0x367   : > { %v5934_v21 = vadd.f32 %v8059_v62, %v10298_v4  ;;  %v8061_v35 = vadd.f32 %v7962_v24, %v10227_v45  ;;  %v5793_v12 = vpop.f32.mrb[11].mxu1 }
 0x368   : > { %v5932_v61 = vadd.f32 %v8060_v43, %v10298_v4  ;;  %v8062_v44 = vadd.f32 %v5793_v12, %v10233_v56  ;;  %7989 = vmatprep.mubr.msk.bf16.mxu0 %vm481_vm1, %v5990_v1 }
 0x369   : > { %v5935_v29 = vadd.f32 %v8061_v35, %v10298_v4  ;;  %7990 = vmatmul.mubr.msk.bf16.gmra.mrb[68].mxu0 %vm481_vm1, %v5991_v57  ;;  %v5966_v33 = vmax.f32 %v5934_v21, 0.0 }
 0x36a   : > { %v5933_v53 = vadd.f32 %v8062_v44, %v10298_v4  ;;  %v5964_v31 = vmax.f32 %v5932_v61, 0.0 }
 0x36b   : > { %v5967_v60 = vmax.f32 %v5935_v29, 0.0 }
 0x36c   : > { %v5965_v22 = vmax.f32 %v5933_v53, 0.0  ;;  %v7965_v55 = vpop.f32.mrb[12].mxu1 }
 0x36d   : > { %v5993_v52 = vpack.c.bf16 %v5967_v60, %v5966_v33  ;;  %v8063_v45 = vadd.f32 %v7965_v55, %v10239_v47  ;;  %v5806_v51 = vpop.f32.mrb[13].mxu1 }
 0x36e   : > { %v5992_v49 = vpack.c.bf16 %v5965_v22, %v5964_v31  ;;  %v8064_v56 = vadd.f32 %v5806_v51, %v10241_v19  ;;  %v7966_v27 = vpop.f32.mrb[14].mxu1 }
 0x36f   : > { %v5938_v42 = vadd.f32 %v8063_v45, %v10298_v4  ;;  %v8065_v8 = vadd.f32 %v7966_v27, %v10243_v63  ;;  %v5809_v16 = vpop.f32.mrb[15].mxu1 }
 0x370   : > { %v5936_v50 = vadd.f32 %v8064_v56, %v10298_v4  ;;  %v8066_v25 = vadd.f32 %v5809_v16, %v10249_v26  ;;  %7993 = vmatprep.mubr.msk.bf16.mxu0 %vm481_vm1, %v5992_v49 }
 0x371   : > { %v5939_v6 = vadd.f32 %v8065_v8, %v10298_v4  ;;  %7994 = vmatmul.mubr.msk.bf16.gmra.mrb[72].mxu0 %vm481_vm1, %v5993_v52  ;;  %v5970_v7 = vmax.f32 %v5938_v42, 0.0 }
 0x372   : > { %v5937_v47 = vadd.f32 %v8066_v25, %v10298_v4  ;;  %v5968_v9 = vmax.f32 %v5936_v50, 0.0 }
 0x373   : > { %v5971_v19 = vmax.f32 %v5939_v6, 0.0 }
 0x374   : > { %v5969_v20 = vmax.f32 %v5937_v47, 0.0  ;;  %v7969_v14 = vpop.f32.mrb[16].mxu1 }
 0x375   : > { %v5995_v30 = vpack.c.bf16 %v5971_v19, %v5970_v7  ;;  %v8067_v63 = vadd.f32 %v7969_v14, %v10255_v32  ;;  %v5822_v48 = vpop.f32.mrb[17].mxu1 }
 0x376   : > { %v5994_v36 = vpack.c.bf16 %v5969_v20, %v5968_v9  ;;  %v8068_v26 = vadd.f32 %v5822_v48, %v10257_v10  ;;  %v7970_v34 = vpop.f32.mrb[18].mxu1 }
 0x377   : > { %v5942_v18 = vadd.f32 %v8067_v63, %v10298_v4  ;;  %v8069_v28 = vadd.f32 %v7970_v34, %v10259_v39  ;;  %v5825_v11 = vpop.f32.mrb[19].mxu1 }
 0x378   : > { %v5940_v13 = vadd.f32 %v8068_v26, %v10298_v4  ;;  %v8070_v5 = vadd.f32 %v5825_v11, %v10265_v37  ;;  %7997 = vmatprep.mubr.msk.bf16.mxu0 %vm481_vm1, %v5994_v36 }
 0x379   : > { %v5943_v57 = vadd.f32 %v8069_v28, %v10298_v4  ;;  %7998 = vmatmul.mubr.msk.bf16.gmra.mrb[76].mxu0 %vm481_vm1, %v5995_v30  ;;  %v5974_v62 = vmax.f32 %v5942_v18, 0.0 }
 0x37a   : > { %v5941_v32 = vadd.f32 %v8070_v5, %v10298_v4  ;;  %v5972_v40 = vmax.f32 %v5940_v13, 0.0 }
 0x37b   : > { %v5975_v10 = vmax.f32 %v5943_v57, 0.0  ;;  %v8498_v57 = vld [vmem:[%s8657_s18 + $0x8] sm:$0xff]  }
 0x37c   : > { %v5973_v1 = vmax.f32 %v5941_v32, 0.0  ;;  %v7973_v43 = vpop.f32.mrb[20].mxu1  ;;  %v8500_v32 = vld [vmem:[%s8657_s18 + $0x18] sm:$0xff]  }
 0x37d   : > { %v5997_v24 = vpack.c.bf16 %v5975_v10, %v5974_v62  ;;  %v8071_v39 = vadd.f32 %v7973_v43, %v10267_v23  ;;  %v5838_v21 = vpop.f32.mrb[21].mxu1  ;;  %v8501_v62 = vld [vmem:[%s8657_s18 + $0x20] sm:$0xff]   ;;  %v8502_v10 = vld [vmem:[%s8657_s18 + $0x28] sm:$0xff]  }
 0x37e   : > { %v5996_v35 = vpack.c.bf16 %v5973_v1, %v5972_v40  ;;  %v8072_v37 = vadd.f32 %v5838_v21, %v10269_v59  ;;  %v7974_v12 = vpop.f32.mrb[22].mxu1  ;;  %v8503_v40 = vld [vmem:[%s8657_s18 + $0x30] sm:$0xff]   ;;  %v8504_v1 = vld [vmem:[%s8657_s18 + $0x38] sm:$0xff]   ;;  %v8505_v43 = vld [vmem:[%s8657_s18 + $0x40] sm:$0xff]  }
 0x37f   : > { %v5946_v61 = vadd.f32 %v8071_v39, %v10298_v4  ;;  %v8073_v44 = vadd.f32 %v7974_v12, %v10271_v41  ;;  %v5841_v29 = vpop.f32.mrb[23].mxu1  ;;  %v8507_v39 = vld [vmem:[%s8657_s18 + $0x50] sm:$0xff]   ;;  %v8508_v21 = vld [vmem:[%s8657_s18 + $0x58] sm:$0xff]  }
 0x380   : > { %v5944_v53 = vadd.f32 %v8072_v37, %v10298_v4  ;;  %v8074_v33 = vadd.f32 %v5841_v29, %v10273_v3  ;;  %8001 = vmatprep.mubr.msk.bf16.mxu0 %vm481_vm1, %v5996_v35  ;;  %v8509_v35 = vld [vmem:[%s8657_s18 + $0x60] sm:$0xff]   ;;  %v8510_v37 = vld [vmem:[%s8657_s18 + $0x68] sm:$0xff]   ;;  %v8511_v12 = vld [vmem:[%s8657_s18 + $0x70] sm:$0xff]  }
 0x381   : > { %v5947_v60 = vadd.f32 %v8073_v44, %v10298_v4  ;;  %8002 = vmatmul.mubr.msk.bf16.gmra.mrb[80].mxu0 %vm481_vm1, %v5997_v24  ;;  %v5978_v31 = vmax.f32 %v5946_v61, 0.0  ;;  %v8506_v24 = vld [vmem:[%s8657_s18 + $0x48] sm:$0xff]   ;;  %v8512_v61 = vld [vmem:[%s8657_s18 + $0x78] sm:$0xff]   ;;  %v7321_v44 = vld [vmem:[%s10529_s6] ss:$0 sm:$0xff] }
 0x382   : > { %v5945_v23 = vadd.f32 %v8074_v33, %v10298_v4  ;;  %v5976_v22 = vmax.f32 %v5944_v53, 0.0  ;;  %v7338_v29 = vld [vmem:[%s10531_s8] ss:$0 sm:$0xff] }
 0x383   : > { %v5979_v59 = vmax.f32 %v5947_v60, 0.0  ;;  %v10411_v53 = vadd.f32 %v7338_v29, %v7321_v44 }
 0x384   : > { %v5977_v55 = vmax.f32 %v5945_v23, 0.0  ;;  %v7977_v52 = vpop.f32.mrb[24].mxu1 }
 0x385   : > { %v5999_v45 = vpack.c.bf16 %v5979_v59, %v5978_v31  ;;  %v8075_v41 = vadd.f32 %v7977_v52, %v10275_v58  ;;  %v5854_v51 = vpop.f32.mrb[25].mxu1 }
 0x386   : > { %v5998_v49 = vpack.c.bf16 %v5977_v55, %v5976_v22  ;;  %v8076_v3 = vadd.f32 %v5854_v51, %v10277_v15  ;;  %v7978_v56 = vpop.f32.mrb[26].mxu1 }
 0x387   : > { %v5950_v27 = vadd.f32 %v8075_v41, %v10298_v4  ;;  %v8077_v42 = vadd.f32 %v7978_v56, %v10279_v17  ;;  %v5857_v8 = vpop.f32.mrb[27].mxu1 }
 0x388   : > { %v5948_v16 = vadd.f32 %v8076_v3, %v10298_v4  ;;  %v8078_v50 = vadd.f32 %v5857_v8, %v10281_v38  ;;  %8005 = vmatprep.mubr.msk.bf16.mxu0 %vm481_vm1, %v5998_v49 }
 0x389   : > { %v5951_v25 = vadd.f32 %v8077_v42, %v10298_v4  ;;  %8006 = vmatmul.mubr.msk.bf16.gmra.mrb[84].mxu0 %vm481_vm1, %v5999_v45  ;;  %v5982_v6 = vmax.f32 %v5950_v27, 0.0 }
 0x38a   : > { %v5949_v58 = vadd.f32 %v8078_v50, %v10298_v4  ;;  %v5980_v47 = vmax.f32 %v5948_v16, 0.0 }
 0x38b   : > { %v5983_v15 = vmax.f32 %v5951_v25, 0.0 }
 0x38c   : > { %v5981_v7 = vmax.f32 %v5949_v58, 0.0  ;;  %v7981_v19 = vpop.f32.mrb[28].mxu1 }
 0x38d   : > { %v6001_v9 = vpack.c.bf16 %v5983_v15, %v5982_v6  ;;  %v8079_v17 = vadd.f32 %v7981_v19, %v10283_v0  ;;  %v5870_v20 = vpop.f32.mrb[29].mxu1 }
 0x38e   : > { %v6000_v14 = vpack.c.bf16 %v5981_v7, %v5980_v47  ;;  %v8080_v38 = vadd.f32 %v5870_v20, %v10285_v54  ;;  %v7982_v30 = vpop.f32.mrb[30].mxu1 }
 0x38f   : > { %v5954_v63 = vadd.f32 %v8079_v17, %v10298_v4  ;;  %v8081_v48 = vadd.f32 %v7982_v30, %v10287_v2  ;;  %v5873_v36 = vpop.f32.mrb[31].mxu1 }
 0x390   : > { %v5952_v26 = vadd.f32 %v8080_v38, %v10298_v4  ;;  %v8082_v34 = vadd.f32 %v5873_v36, %v10289_v46  ;;  %8009 = vmatprep.mubr.msk.bf16.mxu0 %vm481_vm1, %v6000_v14  ;;  %v8497_v46 = vld [vmem:[%s8657_s18] sm:$0xff]  }
 0x391   : > { %v5955_v0 = vadd.f32 %v8081_v48, %v10298_v4  ;;  %8010 = vmatmul.mubr.msk.bf16.gmra.mrb[88].mxu0 %vm481_vm1, %v6001_v9  ;;  %v5986_v18 = vmax.f32 %v5954_v63, 0.0 }
 0x392   : > { %v5953_v54 = vadd.f32 %v8082_v34, %v10298_v4  ;;  %v5984_v2 = vmax.f32 %v5952_v26, 0.0  ;;  %v8499_v4 = vld [vmem:[%s8657_s18 + $0x10] sm:$0xff]  }
 0x393   : > { %v5987_v28 = vmax.f32 %v5955_v0, 0.0 }
 0x394   : > { %v5985_v11 = vmax.f32 %v5953_v54, 0.0 }
 0x395   : > { %v6003_v13 = vpack.c.bf16 %v5987_v28, %v5986_v18 }
 0x396   : > { %v6002_v5 = vpack.c.bf16 %v5985_v11, %v5984_v2 }
 0x398   : > { %8013 = vmatprep.mubr.msk.bf16.mxu0 %vm481_vm1, %v6002_v5 }
 0x399   : > { %8014 = vmatmul.mubr.msk.bf16.gmra.mrb[92].mxu0 %vm481_vm1, %v6003_v13 }
 0x39a   : > { %8019 = vmatprep.mubr.msk.bf16.mxu0 %vm481_vm1, %v8497_v46 }
 0x3a1   : > { %8020 = vmatmul.mubr.msk.bf16.vlgmr.msra.gmra.mrb[64].mxu0 %vm481_vm1, %v8498_v57 }
 0x3a2   : > { %8023 = vmatprep.mubr.msk.bf16.mxu0 %vm481_vm1, %v8499_v4 }
 0x3a9   : > { %8024 = vmatmul.mubr.msk.bf16.gmra.mrb[68].mxu0 %vm481_vm1, %v8500_v32 }
 0x3aa   : > { %8027 = vmatprep.mubr.msk.bf16.mxu0 %vm481_vm1, %v8501_v62 }
 0x3b1   : > { %8028 = vmatmul.mubr.msk.bf16.gmra.mrb[72].mxu0 %vm481_vm1, %v8502_v10 }
 0x3b2   : > { %8031 = vmatprep.mubr.msk.bf16.mxu0 %vm481_vm1, %v8503_v40 }
 0x3b9   : > { %8032 = vmatmul.mubr.msk.bf16.gmra.mrb[76].mxu0 %vm481_vm1, %v8504_v1 }
 0x3ba   : > { %8035 = vmatprep.mubr.msk.bf16.mxu0 %vm481_vm1, %v8505_v43 }
 0x3c1   : > { %8036 = vmatmul.mubr.msk.bf16.gmra.mrb[80].mxu0 %vm481_vm1, %v8506_v24 }
 0x3c2   : > { %8039 = vmatprep.mubr.msk.bf16.mxu0 %vm481_vm1, %v8507_v39 }
 0x3c9   : > { %8040 = vmatmul.mubr.msk.bf16.gmra.mrb[84].mxu0 %vm481_vm1, %v8508_v21 }
 0x3ca   : > { %8043 = vmatprep.mubr.msk.bf16.mxu0 %vm481_vm1, %v8509_v35 }
 0x3d1   : > { %8044 = vmatmul.mubr.msk.bf16.gmra.mrb[88].mxu0 %vm481_vm1, %v8510_v37 }
 0x3d2   : > { %8047 = vmatprep.mubr.msk.bf16.mxu0 %vm481_vm1, %v8511_v12 }
 0x3d9   : > { %8048 = vmatmul.mubr.msk.bf16.gmra.mrb[92].mxu0 %vm481_vm1, %v8512_v61 }
 0x474   : > { %v8021_v33 = vpop.f32.mrb[64].mxu0 }
 0x475   : > { %v8083_v60 = vadd.f32 %v8021_v33, %v7321_v44  ;;  %v6429_v23 = vpop.f32.mrb[65].mxu0 }
 0x476   : > { %v8085_v31 = vadd.f32 %v7321_v44, %v6429_v23  ;;  %v8022_v59 = vpop.f32.mrb[66].mxu0 }
 0x477   : > { %v8084_v22 = vadd.f32 %v8083_v60, %v7338_v29  ;;  %v8088_v55 = vadd.f32 %v10411_v53, %v8022_v59  ;;  %v6432_v52 = vpop.f32.mrb[67].mxu0 }
 0x478   : > { %v8086_v45 = vadd.f32 %v8085_v31, %v7338_v29  ;;  %v8090_v41 = vadd.f32 %v10411_v53, %v6432_v52 }
 0x479   : > { %v6590_v51 = vmax.f32 %v8084_v22, 0.0  ;;  %v6591_v49 = vmax.f32 %v8088_v55, 0.0 }
 0x47a   : > { %v6588_v3 = vmax.f32 %v8086_v45, 0.0  ;;  %v6589_v56 = vmax.f32 %v8090_v41, 0.0 }
 0x47b   : > { %v7409_v27 = vpack.c.bf16 %v6590_v51, %v6590_v51  ;;  %v7410_v42 = vpack.c.bf16 %v6591_v49, %v6591_v49 }
 0x47c   : > { %v7407_v8 = vpack.c.bf16 %v6588_v3, %v6588_v3  ;;  %v7408_v16 = vpack.c.bf16 %v6589_v56, %v6589_v56  ;;  %v8025_v50 = vpop.f32.mrb[68].mxu0 }
 0x47d   : > { %6751 = vst.msk [vmem:[%s10420_s20 + $0x8] sm:$0xf] %vm6748_vm13, %v7409_v27  ;;  %6752 = vst.msk [vmem:[%s10420_s20 + $0xc] sm:$0xf] %vm6748_vm13, %v7410_v42  ;;  %v8092_v25 = vadd.f32 %v10411_v53, %v8025_v50  ;;  %v6445_v58 = vpop.f32.mrb[69].mxu0 }
 0x47e   : > { %6749 = vst.msk [vmem:[%s10420_s20] sm:$0xf] %vm6748_vm13, %v7407_v8  ;;  %6750 = vst.msk [vmem:[%s10420_s20 + $0x4] sm:$0xf] %vm6748_vm13, %v7408_v16  ;;  %v8094_v6 = vadd.f32 %v10411_v53, %v6445_v58  ;;  %v8026_v15 = vpop.f32.mrb[70].mxu0 }
 0x47f   : > { %v6594_v47 = vmax.f32 %v8092_v25, 0.0  ;;  %v8096_v7 = vadd.f32 %v10411_v53, %v8026_v15  ;;  %v6448_v19 = vpop.f32.mrb[71].mxu0 }
 0x480   : > { %v6592_v9 = vmax.f32 %v8094_v6, 0.0  ;;  %v8098_v17 = vadd.f32 %v10411_v53, %v6448_v19 }
 0x481   : > { %v7413_v20 = vpack.c.bf16 %v6594_v47, %v6594_v47  ;;  %v6595_v14 = vmax.f32 %v8096_v7, 0.0 }
 0x482   : > { %v7411_v38 = vpack.c.bf16 %v6592_v9, %v6592_v9  ;;  %v6593_v30 = vmax.f32 %v8098_v17, 0.0 }
 0x483   : > { %6755 = vst.msk [vmem:[%s10420_s20 + $0x18] sm:$0xf] %vm6748_vm13, %v7413_v20  ;;  %v7414_v63 = vpack.c.bf16 %v6595_v14, %v6595_v14 }
 0x484   : > { %6753 = vst.msk [vmem:[%s10420_s20 + $0x10] sm:$0xf] %vm6748_vm13, %v7411_v38  ;;  %v7412_v48 = vpack.c.bf16 %v6593_v30, %v6593_v30  ;;  %v8029_v36 = vpop.f32.mrb[72].mxu0 }
 0x485   : > { %6756 = vst.msk [vmem:[%s10420_s20 + $0x1c] sm:$0xf] %vm6748_vm13, %v7414_v63  ;;  %v8100_v26 = vadd.f32 %v10411_v53, %v8029_v36  ;;  %v6461_v34 = vpop.f32.mrb[73].mxu0 }
 0x486   : > { %6754 = vst.msk [vmem:[%s10420_s20 + $0x14] sm:$0xf] %vm6748_vm13, %v7412_v48  ;;  %v8102_v0 = vadd.f32 %v10411_v53, %v6461_v34  ;;  %v8030_v54 = vpop.f32.mrb[74].mxu0 }
 0x487   : > { %v6598_v18 = vmax.f32 %v8100_v26, 0.0  ;;  %v8104_v28 = vadd.f32 %v10411_v53, %v8030_v54  ;;  %v6464_v2 = vpop.f32.mrb[75].mxu0 }
 0x488   : > { %v6596_v11 = vmax.f32 %v8102_v0, 0.0  ;;  %v8106_v13 = vadd.f32 %v10411_v53, %v6464_v2 }
 0x489   : > { %v7417_v5 = vpack.c.bf16 %v6598_v18, %v6598_v18  ;;  %v6599_v46 = vmax.f32 %v8104_v28, 0.0 }
 0x48a   : > { %v7415_v57 = vpack.c.bf16 %v6596_v11, %v6596_v11  ;;  %v6597_v4 = vmax.f32 %v8106_v13, 0.0 }
 0x48b   : > { %6759 = vst.msk [vmem:[%s10420_s20 + $0x28] sm:$0xf] %vm6748_vm13, %v7417_v5  ;;  %v7418_v32 = vpack.c.bf16 %v6599_v46, %v6599_v46 }
 0x48c   : > { %6757 = vst.msk [vmem:[%s10420_s20 + $0x20] sm:$0xf] %vm6748_vm13, %v7415_v57  ;;  %v7416_v62 = vpack.c.bf16 %v6597_v4, %v6597_v4  ;;  %v8033_v10 = vpop.f32.mrb[76].mxu0 }
 0x48d   : > { %6760 = vst.msk [vmem:[%s10420_s20 + $0x2c] sm:$0xf] %vm6748_vm13, %v7418_v32  ;;  %v8108_v40 = vadd.f32 %v10411_v53, %v8033_v10  ;;  %v6477_v1 = vpop.f32.mrb[77].mxu0 }
 0x48e   : > { %6758 = vst.msk [vmem:[%s10420_s20 + $0x24] sm:$0xf] %vm6748_vm13, %v7416_v62  ;;  %v8110_v43 = vadd.f32 %v10411_v53, %v6477_v1  ;;  %v8034_v24 = vpop.f32.mrb[78].mxu0 }
 0x48f   : > { %v6602_v39 = vmax.f32 %v8108_v40, 0.0  ;;  %v8112_v21 = vadd.f32 %v10411_v53, %v8034_v24  ;;  %v6480_v35 = vpop.f32.mrb[79].mxu0 }
 0x490   : > { %v6600_v37 = vmax.f32 %v8110_v43, 0.0  ;;  %v8114_v12 = vadd.f32 %v10411_v53, %v6480_v35 }
 0x491   : > { %v7421_v61 = vpack.c.bf16 %v6602_v39, %v6602_v39  ;;  %v6603_v44 = vmax.f32 %v8112_v21, 0.0 }
 0x492   : > { %v7419_v29 = vpack.c.bf16 %v6600_v37, %v6600_v37  ;;  %v6601_v33 = vmax.f32 %v8114_v12, 0.0 }
 0x493   : > { %6763 = vst.msk [vmem:[%s10420_s20 + $0x38] sm:$0xf] %vm6748_vm13, %v7421_v61  ;;  %v7422_v60 = vpack.c.bf16 %v6603_v44, %v6603_v44 }
 0x494   : > { %6761 = vst.msk [vmem:[%s10420_s20 + $0x30] sm:$0xf] %vm6748_vm13, %v7419_v29  ;;  %v7420_v23 = vpack.c.bf16 %v6601_v33, %v6601_v33  ;;  %v8037_v31 = vpop.f32.mrb[80].mxu0 }
 0x495   : > { %6764 = vst.msk [vmem:[%s10420_s20 + $0x3c] sm:$0xf] %vm6748_vm13, %v7422_v60  ;;  %v8116_v59 = vadd.f32 %v10411_v53, %v8037_v31  ;;  %v6493_v22 = vpop.f32.mrb[81].mxu0 }
 0x496   : > { %6762 = vst.msk [vmem:[%s10420_s20 + $0x34] sm:$0xf] %vm6748_vm13, %v7420_v23  ;;  %v8118_v55 = vadd.f32 %v10411_v53, %v6493_v22  ;;  %v8038_v52 = vpop.f32.mrb[82].mxu0 }
 0x497   : > { %v6606_v45 = vmax.f32 %v8116_v59, 0.0  ;;  %v8120_v41 = vadd.f32 %v10411_v53, %v8038_v52  ;;  %v6496_v51 = vpop.f32.mrb[83].mxu0 }
 0x498   : > { %v6604_v49 = vmax.f32 %v8118_v55, 0.0  ;;  %v8122_v3 = vadd.f32 %v10411_v53, %v6496_v51 }
 0x499   : > { %v7425_v56 = vpack.c.bf16 %v6606_v45, %v6606_v45  ;;  %v6607_v27 = vmax.f32 %v8120_v41, 0.0 }
 0x49a   : > { %v7423_v42 = vpack.c.bf16 %v6604_v49, %v6604_v49  ;;  %v6605_v8 = vmax.f32 %v8122_v3, 0.0 }
 0x49b   : > { %6767 = vst.msk [vmem:[%s10420_s20 + $0x48] sm:$0xf] %vm6748_vm13, %v7425_v56  ;;  %v7426_v16 = vpack.c.bf16 %v6607_v27, %v6607_v27 }
 0x49c   : > { %6765 = vst.msk [vmem:[%s10420_s20 + $0x40] sm:$0xf] %vm6748_vm13, %v7423_v42  ;;  %v7424_v50 = vpack.c.bf16 %v6605_v8, %v6605_v8  ;;  %v8041_v25 = vpop.f32.mrb[84].mxu0 }
 0x49d   : > { %6768 = vst.msk [vmem:[%s10420_s20 + $0x4c] sm:$0xf] %vm6748_vm13, %v7426_v16  ;;  %v8124_v58 = vadd.f32 %v10411_v53, %v8041_v25  ;;  %v6509_v6 = vpop.f32.mrb[85].mxu0 }
 0x49e   : > { %6766 = vst.msk [vmem:[%s10420_s20 + $0x44] sm:$0xf] %vm6748_vm13, %v7424_v50  ;;  %v8126_v15 = vadd.f32 %v10411_v53, %v6509_v6  ;;  %v8042_v47 = vpop.f32.mrb[86].mxu0 }
 0x49f   : > { %v6610_v7 = vmax.f32 %v8124_v58, 0.0  ;;  %v8128_v19 = vadd.f32 %v10411_v53, %v8042_v47  ;;  %v6512_v9 = vpop.f32.mrb[87].mxu0 }
 0x4a0   : > { %v6608_v17 = vmax.f32 %v8126_v15, 0.0  ;;  %v8130_v20 = vadd.f32 %v10411_v53, %v6512_v9 }
 0x4a1   : > { %v7429_v14 = vpack.c.bf16 %v6610_v7, %v6610_v7  ;;  %v6611_v38 = vmax.f32 %v8128_v19, 0.0 }
 0x4a2   : > { %v7427_v30 = vpack.c.bf16 %v6608_v17, %v6608_v17  ;;  %v6609_v63 = vmax.f32 %v8130_v20, 0.0 }
 0x4a3   : > { %6771 = vst.msk [vmem:[%s10420_s20 + $0x58] sm:$0xf] %vm6748_vm13, %v7429_v14  ;;  %v7430_v48 = vpack.c.bf16 %v6611_v38, %v6611_v38 }
 0x4a4   : > { %6769 = vst.msk [vmem:[%s10420_s20 + $0x50] sm:$0xf] %vm6748_vm13, %v7427_v30  ;;  %v7428_v36 = vpack.c.bf16 %v6609_v63, %v6609_v63  ;;  %v8045_v26 = vpop.f32.mrb[88].mxu0 }
 0x4a5   : > { %6772 = vst.msk [vmem:[%s10420_s20 + $0x5c] sm:$0xf] %vm6748_vm13, %v7430_v48  ;;  %v8132_v34 = vadd.f32 %v10411_v53, %v8045_v26  ;;  %v6525_v0 = vpop.f32.mrb[89].mxu0 }
 0x4a6   : > { %6770 = vst.msk [vmem:[%s10420_s20 + $0x54] sm:$0xf] %vm6748_vm13, %v7428_v36  ;;  %v8134_v54 = vadd.f32 %v10411_v53, %v6525_v0  ;;  %v8046_v18 = vpop.f32.mrb[90].mxu0 }
 0x4a7   : > { %v6614_v28 = vmax.f32 %v8132_v34, 0.0  ;;  %v8136_v2 = vadd.f32 %v10411_v53, %v8046_v18  ;;  %v6528_v11 = vpop.f32.mrb[91].mxu0 }
 0x4a8   : > { %v6612_v13 = vmax.f32 %v8134_v54, 0.0  ;;  %v8138_v5 = vadd.f32 %v10411_v53, %v6528_v11 }
 0x4a9   : > { %v7433_v46 = vpack.c.bf16 %v6614_v28, %v6614_v28  ;;  %v6615_v57 = vmax.f32 %v8136_v2, 0.0 }
 0x4aa   : > { %v7431_v4 = vpack.c.bf16 %v6612_v13, %v6612_v13  ;;  %v6613_v32 = vmax.f32 %v8138_v5, 0.0 }
 0x4ab   : > { %6775 = vst.msk [vmem:[%s10420_s20 + $0x68] sm:$0xf] %vm6748_vm13, %v7433_v46  ;;  %v7434_v62 = vpack.c.bf16 %v6615_v57, %v6615_v57 }
 0x4ac   : > { %6773 = vst.msk [vmem:[%s10420_s20 + $0x60] sm:$0xf] %vm6748_vm13, %v7431_v4  ;;  %v7432_v10 = vpack.c.bf16 %v6613_v32, %v6613_v32  ;;  %v8049_v40 = vpop.f32.mrb[92].mxu0 }
 0x4ad   : > { %6776 = vst.msk [vmem:[%s10420_s20 + $0x6c] sm:$0xf] %vm6748_vm13, %v7434_v62  ;;  %v8140_v1 = vadd.f32 %v10411_v53, %v8049_v40  ;;  %v6541_v43 = vpop.f32.mrb[93].mxu0 }
 0x4ae   : > { %6774 = vst.msk [vmem:[%s10420_s20 + $0x64] sm:$0xf] %vm6748_vm13, %v7432_v10  ;;  %v8142_v24 = vadd.f32 %v10411_v53, %v6541_v43  ;;  %v8050_v39 = vpop.f32.mrb[94].mxu0 }
 0x4af   : > { %v6618_v21 = vmax.f32 %v8140_v1, 0.0  ;;  %v8144_v35 = vadd.f32 %v10411_v53, %v8050_v39  ;;  %v6544_v37 = vpop.f32.mrb[95].mxu0 }
 0x4b0   : > { %v6616_v12 = vmax.f32 %v8142_v24, 0.0  ;;  %v8146_v61 = vadd.f32 %v10411_v53, %v6544_v37 }
 0x4b1   : > { %v7437_v44 = vpack.c.bf16 %v6618_v21, %v6618_v21  ;;  %v6619_v29 = vmax.f32 %v8144_v35, 0.0 }
 0x4b2   : > { %v7435_v33 = vpack.c.bf16 %v6616_v12, %v6616_v12  ;;  %v6617_v60 = vmax.f32 %v8146_v61, 0.0 }
 0x4b3   : > { %6779 = vst.msk [vmem:[%s10420_s20 + $0x78] sm:$0xf] %vm6748_vm13, %v7437_v44  ;;  %v7438_v23 = vpack.c.bf16 %v6619_v29, %v6619_v29 }
 0x4b4   : > { %6777 = vst.msk [vmem:[%s10420_s20 + $0x70] sm:$0xf] %vm6748_vm13, %v7435_v33  ;;  %v7436_v31 = vpack.c.bf16 %v6617_v60, %v6617_v60 }
 0x4b5   : > { %6780 = vst.msk [vmem:[%s10420_s20 + $0x7c] sm:$0xf] %vm6748_vm13, %v7438_v23 }
 0x4b6   : > { %6778 = vst.msk [vmem:[%s10420_s20 + $0x74] sm:$0xf] %vm6748_vm13, %v7436_v31 }
 0x4b7 PF: > { %s19_s11 = sadd.s32 1, %s8573_s11   ;;  %s10632_s30 = smov %s8569_s10 }
 0x4b8   : > { %p16_p5 = scmp.ge.s32.totalorder %s19_s11, 4   ;;  %s10633_s10 = smov %s10635_s12 }
 0x4ba   :  { %18 = sbr.rel (!%p16_p5) target bundleno = 2 (0x2), region = 117 }

</bundles_post_ra>
